<compile_context>
chip_gen: v7x
topology: tpu7x:2x2x1
jax: 0.10.0
libtpu: 0.0.40
codegen_flags: <defaults>
</compile_context>

<pallas_src>
import functools

import jax
import jax.numpy as jnp
from jax.experimental import pallas as pl
from jax.experimental.pallas import tpu as pltpu


# ---------------------------------------------------------------------------
# Helpers
# ---------------------------------------------------------------------------
def _round_up(v, m):
    return (v + m - 1) // m * m


def _pick_nb(n, howo, target_lanes=512, max_lanes=2048, min_steps=2):
    """Images per grid step: pack lanes up to target, keep >=2 grid steps."""
    best = 1
    for nb in range(1, n + 1):
        if n % nb or nb * howo > max_lanes:
            continue
        if nb > 1 and (n // nb) < min_steps:
            continue
        if nb * howo <= target_lanes:
            best = nb
    return best


# ---------------------------------------------------------------------------
# Fused BasicBlock kernel body
# ---------------------------------------------------------------------------
def _make_block_kernel(*, nb, ho, wo, stride, wc, cin_p, cout, cout_p,
                       c_res, res_off, tap_src):
    """tap_src: dx -> (parity, column offset) for the (parity-packed) input."""
    wp2 = wo + 2                       # padded width of the conv1 activation

    def kernel(x_ref, w1_ref, s1_ref, b1_ref, w2_ref, s2_ref, b2_ref, res_ref,
               o_ref, im1_ref, im2_ref, o1p_ref):
        # ---- conv1 im2col: (9*Cin, NB*Ho*Wo), lanes ordered (image, y, x) ---
        for b in range(nb):
            for dy in range(3):
                for dx in range(3):
                    par, coff = tap_src[dx]
                    t = dy * 3 + dx
                    for y in range(ho):
                        src = (stride * y + dy) * wc + coff
                        dst = (b * ho + y) * wo
                        im1_ref[t * cin_p:(t + 1) * cin_p, dst:dst + wo] = \
                            x_ref[b, par, :, src:src + wo]

        # ---- conv1: one K-packed MXU dot + f32 BN/ReLU epilogue -------------
        acc1 = jnp.dot(w1_ref[...], im1_ref[...],
                       preferred_element_type=jnp.float32)
        o1 = jnp.maximum(acc1 * s1_ref[...] + b1_ref[...], 0.0)
        o1 = o1.astype(jnp.bfloat16)

        # ---- scatter conv1 rows into the zero-padded VMEM activation --------
        o1p_ref[...] = jnp.zeros_like(o1p_ref)
        for b in range(nb):
            for y in range(ho):
                src = (b * ho + y) * wo
                dst = (1 + y) * wp2 + 1
                o1p_ref[b, :, dst:dst + wo] = o1[:, src:src + wo]

        # ---- conv2 im2col (stride 1) from the padded VMEM activation --------
        for b in range(nb):
            for dy in range(3):
                for dx in range(3):
                    t = dy * 3 + dx
                    for y in range(ho):
                        src = (y + dy) * wp2 + dx
                        dst = (b * ho + y) * wo
                        im2_ref[t * cout_p:(t + 1) * cout_p, dst:dst + wo] = \
                            o1p_ref[b, :, src:src + wo]

        # ---- conv2 dot + BN + shortcut (channel sub-range) + ReLU -----------
        acc2 = jnp.dot(w2_ref[...], im2_ref[...],
                       preferred_element_type=jnp.float32)
        v = acc2 * s2_ref[...] + b2_ref[...]
        r = res_ref[...]
        if res_off == 0 and c_res == cout_p:
            v = v + r
        else:
            parts = []
            if res_off > 0:
                parts.append(v[:res_off, :])
            parts.append(v[res_off:res_off + c_res, :] + r)
            if res_off + c_res < cout_p:
                parts.append(v[res_off + c_res:, :])
            v = jnp.concatenate(parts, axis=0)
        v = jnp.maximum(v, 0.0)
        o_ref[...] = v[:cout, :].astype(o_ref.dtype)

    return kernel


# ---------------------------------------------------------------------------
# BasicBlock forward (NCHW in / NCHW out), inference-mode BatchNorm
# ---------------------------------------------------------------------------
def basic_block_forward(x_nchw, params, in_planes, planes, stride, *,
                        nb=None, eps=1e-5):
    n, cin, h, w = x_nchw.shape
    assert cin == in_planes
    assert stride in (1, 2)
    if stride == 2:
        assert h % 2 == 0 and w % 2 == 0, "stride-2 path assumes even H, W"

    cout = planes
    ho = (h - 1) // stride + 1
    wo = (w - 1) // stride + 1
    howo = ho * wo
    cin_p = _round_up(cin, 8)
    cout_p = _round_up(cout, 8)

    if nb is None:
        nb = _pick_nb(n, howo)
    assert n % nb == 0
    g = n // nb
    lanes = nb * howo

    xf = x_nchw.astype(jnp.float32)

    # ---- conv1 input: spatial pad, channel pad, parity pack (stride 2), flat
    hp = h + 2
    xp = jnp.pad(xf, ((0, 0), (0, cin_p - cin), (1, 1), (1, 1)))  # (n,cin_p,hp,w+2)
    if stride == 1:
        wc = w + 2
        x_in = xp[:, None]                                        # (n,1,cin_p,hp,wc)
        tap_src = {0: (0, 0), 1: (0, 1), 2: (0, 2)}
        n_par = 1
    else:
        wc = wo + 1
        x_in = jnp.stack([xp[..., 0::2], xp[..., 1::2]], axis=1)  # (n,2,cin_p,hp,wc)
        tap_src = {0: (0, 0), 1: (1, 0), 2: (0, 1)}
        n_par = 2
    x_in = x_in.reshape(n, n_par, cin_p, hp * wc).astype(jnp.bfloat16)

    # ---- weights (K-packed, bf16) and BN scale/bias (f32, applied in-kernel)
    def prep(w_key, g_key, b_key, m_key, v_key, c_in, c_in_p):
        wt = params[w_key].astype(jnp.float32)
        wt = jnp.pad(wt, ((0, cout_p - cout), (0, c_in_p - c_in), (0, 0), (0, 0)))
        w2d = jnp.transpose(wt, (0, 2, 3, 1)).reshape(cout_p, 9 * c_in_p)
        gamma = jnp.pad(params[g_key].astype(jnp.float32), (0, cout_p - cout))
        beta = jnp.pad(params[b_key].astype(jnp.float32), (0, cout_p - cout))
        mean = jnp.pad(params[m_key].astype(jnp.float32), (0, cout_p - cout))
        var = jnp.pad(params[v_key].astype(jnp.float32), (0, cout_p - cout),
                      constant_values=1.0)
        scale = gamma / jnp.sqrt(var + eps)
        bias = beta - mean * scale
        return (w2d.astype(jnp.bfloat16),
                scale.reshape(cout_p, 1),
                bias.reshape(cout_p, 1))

    w1, s1, b1 = prep("conv1_w", "bn1_gamma", "bn1_beta", "bn1_mean", "bn1_var",
                      cin, cin_p)
    w2, s2, b2 = prep("conv2_w", "bn2_gamma", "bn2_beta", "bn2_mean", "bn2_var",
                      cout, cout_p)

    # ---- shortcut: un-padded channels in f32, added at a channel offset -----
    if stride != 1 or in_planes != planes:
        res = xf[:, :, ::2, ::2]
        c_res, res_off = in_planes, planes // 4
    else:
        res = xf
        c_res, res_off = in_planes, 0
    res = res.reshape(g, nb, c_res, howo)
    res = jnp.transpose(res, (0, 2, 1, 3)).reshape(g, c_res, lanes)

    kernel = _make_block_kernel(nb=nb, ho=ho, wo=wo, stride=stride, wc=wc,
                                cin_p=cin_p, cout=cout, cout_p=cout_p,
                                c_res=c_res, res_off=res_off, tap_src=tap_src)

    flops = 2 * 9 * n * howo * (cin_p * cout_p + cout_p * cout_p)
    bytes_accessed = (n * n_par * cin_p * hp * wc * 2        # x (bf16)
                      + n * c_res * howo * 4                 # residual (f32)
                      + n * cout * howo * 4                  # output (f32)
                      + cout_p * 9 * (cin_p + cout_p) * 2    # weights (bf16)
                      + 4 * cout_p * 4)                      # BN scale/bias

    grid_spec = pltpu.PrefetchScalarGridSpec(
        num_scalar_prefetch=0,
        grid=(g,),
        in_specs=[
            pl.BlockSpec((nb, n_par, cin_p, hp * wc), lambda i: (i, 0, 0, 0)),
            pl.BlockSpec((cout_p, 9 * cin_p), lambda i: (0, 0)),    # resident
            pl.BlockSpec((cout_p, 1), lambda i: (0, 0)),            # resident
            pl.BlockSpec((cout_p, 1), lambda i: (0, 0)),            # resident
            pl.BlockSpec((cout_p, 9 * cout_p), lambda i: (0, 0)),   # resident
            pl.BlockSpec((cout_p, 1), lambda i: (0, 0)),            # resident
            pl.BlockSpec((cout_p, 1), lambda i: (0, 0)),            # resident
            pl.BlockSpec((None, c_res, lanes), lambda i: (i, 0, 0)),
        ],
        out_specs=pl.BlockSpec((None, cout, lanes), lambda i: (i, 0, 0)),
        scratch_shapes=[
            pltpu.VMEM((9 * cin_p, lanes), jnp.bfloat16),            # im2col conv1
            pltpu.VMEM((9 * cout_p, lanes), jnp.bfloat16),           # im2col conv2
            pltpu.VMEM((nb, cout_p, (ho + 2) * (wo + 2)), jnp.bfloat16),  # out1 pad
        ],
    )

    out = pl.pallas_call(
        kernel,
        out_shape=jax.ShapeDtypeStruct((g, cout, lanes), jnp.float32),
        grid_spec=grid_spec,
        compiler_params=pltpu.CompilerParams(
            dimension_semantics=("parallel",)),
        cost_estimate=pl.CostEstimate(
            flops=flops, transcendentals=0, bytes_accessed=bytes_accessed),
    )(x_in, w1, s1, b1, w2, s2, b2, res)

    out = out.reshape(g, cout, nb, ho, wo)
    out = jnp.transpose(out, (0, 2, 1, 3, 4)).reshape(n, cout, ho, wo)
    return out


# ---------------------------------------------------------------------------
# Reference (pure JAX/XLA) for a sanity check
# ---------------------------------------------------------------------------
def _reference_forward(x, params, in_planes, planes, stride):
    def conv(x, w, s):
        return jax.lax.conv_general_dilated(
            x, w, window_strides=(s, s), padding=((1, 1), (1, 1)),
            dimension_numbers=("NCHW", "OIHW", "NCHW"),
            precision=jax.lax.Precision.HIGHEST)

    def bn(x, g, b, m, v, eps=1e-5):
        rs = lambda a: a.reshape(1, -1, 1, 1)
        return (x - rs(m)) / jnp.sqrt(rs(v) + eps) * rs(g) + rs(b)

    out = jax.nn.relu(bn(conv(x, params["conv1_w"], stride),
                         params["bn1_gamma"], params["bn1_beta"],
                         params["bn1_mean"], params["bn1_var"]))
    out = bn(conv(out, params["conv2_w"], 1),
             params["bn2_gamma"], params["bn2_beta"],
             params["bn2_mean"], params["bn2_var"])
    if stride != 1 or in_planes != planes:
        sc = x[:, :, ::2, ::2]
        pad = planes // 4
        sc = jnp.pad(sc, ((0, 0), (pad, pad), (0, 0), (0, 0)))
    else:
        sc = x
    return jax.nn.relu(out + sc)


# ---------------------------------------------------------------------------
def _make_params(key, in_planes, planes):
    ks = jax.random.split(key, 10)
    return {
        "conv1_w": 0.1 * jax.random.normal(ks[0], (planes, in_planes, 3, 3), jnp.float32),
        "conv2_w": 0.1 * jax.random.normal(ks[1], (planes, planes, 3, 3), jnp.float32),
        "bn1_gamma": 1.0 + 0.1 * jax.random.normal(ks[2], (planes,), jnp.float32),
        "bn1_beta": 0.1 * jax.random.normal(ks[3], (planes,), jnp.float32),
        "bn1_mean": 0.05 * jax.random.normal(ks[4], (planes,), jnp.float32),
        "bn1_var": 1.0 + 0.1 * jnp.abs(jax.random.normal(ks[5], (planes,), jnp.float32)),
        "bn2_gamma": 1.0 + 0.1 * jax.random.normal(ks[6], (planes,), jnp.float32),
        "bn2_beta": 0.1 * jax.random.normal(ks[7], (planes,), jnp.float32),
        "bn2_mean": 0.05 * jax.random.normal(ks[8], (planes,), jnp.float32),
        "bn2_var": 1.0 + 0.1 * jnp.abs(jax.random.normal(ks[9], (planes,), jnp.float32)),
    }


def _check(name, n, in_planes, planes, h, w, stride, nb=None):
    kp, kx = jax.random.split(jax.random.PRNGKey(0))
    params = _make_params(kp, in_planes, planes)
    x = jax.random.normal(kx, (n, in_planes, h, w), jnp.float32)

    fwd = jax.jit(functools.partial(basic_block_forward, in_planes=in_planes,
                                    planes=planes, stride=stride, nb=nb))
    out = jax.block_until_ready(fwd(x, params))
    ref = _reference_forward(x, params, in_planes, planes, stride)
    assert out.shape == ref.shape, (name, out.shape, ref.shape)
    err = float(jnp.max(jnp.abs(out - ref)))
    # bf16 MXU operands (f32 accumulation / epilogue / residual).
    assert jnp.allclose(out, ref, atol=2e-2, rtol=2e-2), (name, err)


if __name__ == "__main__":
    # Strided block with channel expansion (LambdaLayer shortcut).
    _check("stride2", n=2, in_planes=4, planes=8, h=16, w=16, stride=2)
    # Identity-shortcut block, stride 1.
    _check("stride1_identity", n=2, in_planes=8, planes=8, h=8, w=8, stride=1)
    # Batch-blocked path: 2 images packed along the lane dim per grid step.
    _check("stride2_batched", n=4, in_planes=4, planes=8, h=16, w=16, stride=2, nb=2)
    print("KERNEL_OK")
</pallas_src>

<mosaic_0001>
module attributes {stable_mosaic.version = 11 : i64} {
  func.func @kernel(%arg0: i32, %arg1: memref<1x2x8x162xbf16, #tpu.memory_space<vmem>>, %arg2: memref<8x72xbf16, #tpu.memory_space<vmem>>, %arg3: memref<8x1xf32, #tpu.memory_space<vmem>>, %arg4: memref<8x1xf32, #tpu.memory_space<vmem>>, %arg5: memref<8x72xbf16, #tpu.memory_space<vmem>>, %arg6: memref<8x1xf32, #tpu.memory_space<vmem>>, %arg7: memref<8x1xf32, #tpu.memory_space<vmem>>, %arg8: memref<1x4x64xf32, #tpu.memory_space<vmem>>, %arg9: memref<1x8x64xf32, #tpu.memory_space<vmem>>, %arg10: memref<72x64xbf16, #tpu.memory_space<vmem>>, %arg11: memref<72x64xbf16, #tpu.memory_space<vmem>>, %arg12: memref<1x8x100xbf16, #tpu.memory_space<vmem>>) attributes {dimension_semantics = [#tpu.dimension_semantics<parallel>], iteration_bounds = array<i64: 2>, scalar_prefetch = 0 : i64, scratch_operands = 3 : i64, tpu.core_type = #tpu.core_type<tc>, window_params = [{transform_indices = @transform_0, window_bounds = array<i64: 1, 2, 8, 162>}, {pipeline_mode = #tpu.pipeline_mode<synchronous>, transform_indices = @transform_1, window_bounds = array<i64: 8, 72>}, {pipeline_mode = #tpu.pipeline_mode<synchronous>, transform_indices = @transform_2, window_bounds = array<i64: 8, 1>}, {pipeline_mode = #tpu.pipeline_mode<synchronous>, transform_indices = @transform_3, window_bounds = array<i64: 8, 1>}, {pipeline_mode = #tpu.pipeline_mode<synchronous>, transform_indices = @transform_4, window_bounds = array<i64: 8, 72>}, {pipeline_mode = #tpu.pipeline_mode<synchronous>, transform_indices = @transform_5, window_bounds = array<i64: 8, 1>}, {pipeline_mode = #tpu.pipeline_mode<synchronous>, transform_indices = @transform_6, window_bounds = array<i64: 8, 1>}, {transform_indices = @transform_7, window_bounds = array<i64: 1, 4, 64>}, {transform_indices = @transform_8, window_bounds = array<i64: 1, 8, 64>}]} {
    %c0 = arith.constant 0 : index
    %c0_0 = arith.constant 0 : index
    %c0_1 = arith.constant 0 : index
    %c0_2 = arith.constant 0 : index
    %0 = vector.load %arg1[%c0, %c0_0, %c0_1, %c0_2] : memref<1x2x8x162xbf16, #tpu.memory_space<vmem>>, vector<1x1x8x8xbf16>
    %1 = vector.shape_cast %0 : vector<1x1x8x8xbf16> to vector<8x8xbf16>
    %c0_3 = arith.constant 0 : index
    %c0_4 = arith.constant 0 : index
    %2 = vector.load %arg10[%c0_3, %c0_4] : memref<72x64xbf16, #tpu.memory_space<vmem>>, vector<8x8xbf16>
    tpu.vector_store %arg10[%c0_3, %c0_4], %1 {strides = array<i32>} : memref<72x64xbf16, #tpu.memory_space<vmem>>, vector<8x8xbf16>,
    %c0_5 = arith.constant 0 : index
    %c0_6 = arith.constant 0 : index
    %c0_7 = arith.constant 0 : index
    %c18 = arith.constant 18 : index
    %3 = vector.load %arg1[%c0_5, %c0_6, %c0_7, %c18] : memref<1x2x8x162xbf16, #tpu.memory_space<vmem>>, vector<1x1x8x8xbf16>
    %4 = vector.shape_cast %3 : vector<1x1x8x8xbf16> to vector<8x8xbf16>
    %c0_8 = arith.constant 0 : index
    %c8 = arith.constant 8 : index
    %5 = vector.load %arg10[%c0_8, %c8] : memref<72x64xbf16, #tpu.memory_space<vmem>>, vector<8x8xbf16>
    tpu.vector_store %arg10[%c0_8, %c8], %4 {strides = array<i32>} : memref<72x64xbf16, #tpu.memory_space<vmem>>, vector<8x8xbf16>,
    %c0_9 = arith.constant 0 : index
    %c0_10 = arith.constant 0 : index
    %c0_11 = arith.constant 0 : index
    %c36 = arith.constant 36 : index
    %6 = vector.load %arg1[%c0_9, %c0_10, %c0_11, %c36] : memref<1x2x8x162xbf16, #tpu.memory_space<vmem>>, vector<1x1x8x8xbf16>
    %7 = vector.shape_cast %6 : vector<1x1x8x8xbf16> to vector<8x8xbf16>
    %c0_12 = arith.constant 0 : index
    %c16 = arith.constant 16 : index
    %8 = vector.load %arg10[%c0_12, %c16] : memref<72x64xbf16, #tpu.memory_space<vmem>>, vector<8x8xbf16>
    tpu.vector_store %arg10[%c0_12, %c16], %7 {strides = array<i32>} : memref<72x64xbf16, #tpu.memory_space<vmem>>, vector<8x8xbf16>,
    %c0_13 = arith.constant 0 : index
    %c0_14 = arith.constant 0 : index
    %c0_15 = arith.constant 0 : index
    %c54 = arith.constant 54 : index
    %9 = vector.load %arg1[%c0_13, %c0_14, %c0_15, %c54] : memref<1x2x8x162xbf16, #tpu.memory_space<vmem>>, vector<1x1x8x8xbf16>
    %10 = vector.shape_cast %9 : vector<1x1x8x8xbf16> to vector<8x8xbf16>
    %c0_16 = arith.constant 0 : index
    %c24 = arith.constant 24 : index
    %11 = vector.load %arg10[%c0_16, %c24] : memref<72x64xbf16, #tpu.memory_space<vmem>>, vector<8x8xbf16>
    tpu.vector_store %arg10[%c0_16, %c24], %10 {strides = array<i32>} : memref<72x64xbf16, #tpu.memory_space<vmem>>, vector<8x8xbf16>,
    %c0_17 = arith.constant 0 : index
    %c0_18 = arith.constant 0 : index
    %c0_19 = arith.constant 0 : index
    %c72 = arith.constant 72 : index
    %12 = vector.load %arg1[%c0_17, %c0_18, %c0_19, %c72] : memref<1x2x8x162xbf16, #tpu.memory_space<vmem>>, vector<1x1x8x8xbf16>
    %13 = vector.shape_cast %12 : vector<1x1x8x8xbf16> to vector<8x8xbf16>
    %c0_20 = arith.constant 0 : index
    %c32 = arith.constant 32 : index
    %14 = vector.load %arg10[%c0_20, %c32] : memref<72x64xbf16, #tpu.memory_space<vmem>>, vector<8x8xbf16>
    tpu.vector_store %arg10[%c0_20, %c32], %13 {strides = array<i32>} : memref<72x64xbf16, #tpu.memory_space<vmem>>, vector<8x8xbf16>,
    %c0_21 = arith.constant 0 : index
    %c0_22 = arith.constant 0 : index
    %c0_23 = arith.constant 0 : index
    %c90 = arith.constant 90 : index
    %15 = vector.load %arg1[%c0_21, %c0_22, %c0_23, %c90] : memref<1x2x8x162xbf16, #tpu.memory_space<vmem>>, vector<1x1x8x8xbf16>
    %16 = vector.shape_cast %15 : vector<1x1x8x8xbf16> to vector<8x8xbf16>
    %c0_24 = arith.constant 0 : index
    %c40 = arith.constant 40 : index
    %17 = vector.load %arg10[%c0_24, %c40] : memref<72x64xbf16, #tpu.memory_space<vmem>>, vector<8x8xbf16>
    tpu.vector_store %arg10[%c0_24, %c40], %16 {strides = array<i32>} : memref<72x64xbf16, #tpu.memory_space<vmem>>, vector<8x8xbf16>,
    %c0_25 = arith.constant 0 : index
    %c0_26 = arith.constant 0 : index
    %c0_27 = arith.constant 0 : index
    %c108 = arith.constant 108 : index
    %18 = vector.load %arg1[%c0_25, %c0_26, %c0_27, %c108] : memref<1x2x8x162xbf16, #tpu.memory_space<vmem>>, vector<1x1x8x8xbf16>
    %19 = vector.shape_cast %18 : vector<1x1x8x8xbf16> to vector<8x8xbf16>
    %c0_28 = arith.constant 0 : index
    %c48 = arith.constant 48 : index
    %20 = vector.load %arg10[%c0_28, %c48] : memref<72x64xbf16, #tpu.memory_space<vmem>>, vector<8x8xbf16>
    tpu.vector_store %arg10[%c0_28, %c48], %19 {strides = array<i32>} : memref<72x64xbf16, #tpu.memory_space<vmem>>, vector<8x8xbf16>,
    %c0_29 = arith.constant 0 : index
    %c0_30 = arith.constant 0 : index
    %c0_31 = arith.constant 0 : index
    %c126 = arith.constant 126 : index
    %21 = vector.load %arg1[%c0_29, %c0_30, %c0_31, %c126] : memref<1x2x8x162xbf16, #tpu.memory_space<vmem>>, vector<1x1x8x8xbf16>
    %22 = vector.shape_cast %21 : vector<1x1x8x8xbf16> to vector<8x8xbf16>
    %c0_32 = arith.constant 0 : index
    %c56 = arith.constant 56 : index
    %23 = vector.load %arg10[%c0_32, %c56] : memref<72x64xbf16, #tpu.memory_space<vmem>>, vector<8x8xbf16>
    tpu.vector_store %arg10[%c0_32, %c56], %22 {strides = array<i32>} : memref<72x64xbf16, #tpu.memory_space<vmem>>, vector<8x8xbf16>,
    %c0_33 = arith.constant 0 : index
    %c1 = arith.constant 1 : index
    %c0_34 = arith.constant 0 : index
    %c0_35 = arith.constant 0 : index
    %24 = vector.load %arg1[%c0_33, %c1, %c0_34, %c0_35] : memref<1x2x8x162xbf16, #tpu.memory_space<vmem>>, vector<1x1x8x8xbf16>
    %25 = vector.shape_cast %24 : vector<1x1x8x8xbf16> to vector<8x8xbf16>
    %c8_36 = arith.constant 8 : index
    %c0_37 = arith.constant 0 : index
    %26 = vector.load %arg10[%c8_36, %c0_37] : memref<72x64xbf16, #tpu.memory_space<vmem>>, vector<8x8xbf16>
    tpu.vector_store %arg10[%c8_36, %c0_37], %25 {strides = array<i32>} : memref<72x64xbf16, #tpu.memory_space<vmem>>, vector<8x8xbf16>,
    %c0_38 = arith.constant 0 : index
    %c1_39 = arith.constant 1 : index
    %c0_40 = arith.constant 0 : index
    %c18_41 = arith.constant 18 : index
    %27 = vector.load %arg1[%c0_38, %c1_39, %c0_40, %c18_41] : memref<1x2x8x162xbf16, #tpu.memory_space<vmem>>, vector<1x1x8x8xbf16>
    %28 = vector.shape_cast %27 : vector<1x1x8x8xbf16> to vector<8x8xbf16>
    %c8_42 = arith.constant 8 : index
    %c8_43 = arith.constant 8 : index
    %29 = vector.load %arg10[%c8_42, %c8_43] : memref<72x64xbf16, #tpu.memory_space<vmem>>, vector<8x8xbf16>
    tpu.vector_store %arg10[%c8_42, %c8_43], %28 {strides = array<i32>} : memref<72x64xbf16, #tpu.memory_space<vmem>>, vector<8x8xbf16>,
    %c0_44 = arith.constant 0 : index
    %c1_45 = arith.constant 1 : index
    %c0_46 = arith.constant 0 : index
    %c36_47 = arith.constant 36 : index
    %30 = vector.load %arg1[%c0_44, %c1_45, %c0_46, %c36_47] : memref<1x2x8x162xbf16, #tpu.memory_space<vmem>>, vector<1x1x8x8xbf16>
    %31 = vector.shape_cast %30 : vector<1x1x8x8xbf16> to vector<8x8xbf16>
    %c8_48 = arith.constant 8 : index
    %c16_49 = arith.constant 16 : index
    %32 = vector.load %arg10[%c8_48, %c16_49] : memref<72x64xbf16, #tpu.memory_space<vmem>>, vector<8x8xbf16>
    tpu.vector_store %arg10[%c8_48, %c16_49], %31 {strides = array<i32>} : memref<72x64xbf16, #tpu.memory_space<vmem>>, vector<8x8xbf16>,
    %c0_50 = arith.constant 0 : index
    %c1_51 = arith.constant 1 : index
    %c0_52 = arith.constant 0 : index
    %c54_53 = arith.constant 54 : index
    %33 = vector.load %arg1[%c0_50, %c1_51, %c0_52, %c54_53] : memref<1x2x8x162xbf16, #tpu.memory_space<vmem>>, vector<1x1x8x8xbf16>
    %34 = vector.shape_cast %33 : vector<1x1x8x8xbf16> to vector<8x8xbf16>
    %c8_54 = arith.constant 8 : index
    %c24_55 = arith.constant 24 : index
    %35 = vector.load %arg10[%c8_54, %c24_55] : memref<72x64xbf16, #tpu.memory_space<vmem>>, vector<8x8xbf16>
    tpu.vector_store %arg10[%c8_54, %c24_55], %34 {strides = array<i32>} : memref<72x64xbf16, #tpu.memory_space<vmem>>, vector<8x8xbf16>,
    %c0_56 = arith.constant 0 : index
    %c1_57 = arith.constant 1 : index
    %c0_58 = arith.constant 0 : index
    %c72_59 = arith.constant 72 : index
    %36 = vector.load %arg1[%c0_56, %c1_57, %c0_58, %c72_59] : memref<1x2x8x162xbf16, #tpu.memory_space<vmem>>, vector<1x1x8x8xbf16>
    %37 = vector.shape_cast %36 : vector<1x1x8x8xbf16> to vector<8x8xbf16>
    %c8_60 = arith.constant 8 : index
    %c32_61 = arith.constant 32 : index
    %38 = vector.load %arg10[%c8_60, %c32_61] : memref<72x64xbf16, #tpu.memory_space<vmem>>, vector<8x8xbf16>
    tpu.vector_store %arg10[%c8_60, %c32_61], %37 {strides = array<i32>} : memref<72x64xbf16, #tpu.memory_space<vmem>>, vector<8x8xbf16>,
    %c0_62 = arith.constant 0 : index
    %c1_63 = arith.constant 1 : index
    %c0_64 = arith.constant 0 : index
    %c90_65 = arith.constant 90 : index
    %39 = vector.load %arg1[%c0_62, %c1_63, %c0_64, %c90_65] : memref<1x2x8x162xbf16, #tpu.memory_space<vmem>>, vector<1x1x8x8xbf16>
    %40 = vector.shape_cast %39 : vector<1x1x8x8xbf16> to vector<8x8xbf16>
    %c8_66 = arith.constant 8 : index
    %c40_67 = arith.constant 40 : index
    %41 = vector.load %arg10[%c8_66, %c40_67] : memref<72x64xbf16, #tpu.memory_space<vmem>>, vector<8x8xbf16>
    tpu.vector_store %arg10[%c8_66, %c40_67], %40 {strides = array<i32>} : memref<72x64xbf16, #tpu.memory_space<vmem>>, vector<8x8xbf16>,
    %c0_68 = arith.constant 0 : index
    %c1_69 = arith.constant 1 : index
    %c0_70 = arith.constant 0 : index
    %c108_71 = arith.constant 108 : index
    %42 = vector.load %arg1[%c0_68, %c1_69, %c0_70, %c108_71] : memref<1x2x8x162xbf16, #tpu.memory_space<vmem>>, vector<1x1x8x8xbf16>
    %43 = vector.shape_cast %42 : vector<1x1x8x8xbf16> to vector<8x8xbf16>
    %c8_72 = arith.constant 8 : index
    %c48_73 = arith.constant 48 : index
    %44 = vector.load %arg10[%c8_72, %c48_73] : memref<72x64xbf16, #tpu.memory_space<vmem>>, vector<8x8xbf16>
    tpu.vector_store %arg10[%c8_72, %c48_73], %43 {strides = array<i32>} : memref<72x64xbf16, #tpu.memory_space<vmem>>, vector<8x8xbf16>,
    %c0_74 = arith.constant 0 : index
    %c1_75 = arith.constant 1 : index
    %c0_76 = arith.constant 0 : index
    %c126_77 = arith.constant 126 : index
    %45 = vector.load %arg1[%c0_74, %c1_75, %c0_76, %c126_77] : memref<1x2x8x162xbf16, #tpu.memory_space<vmem>>, vector<1x1x8x8xbf16>
    %46 = vector.shape_cast %45 : vector<1x1x8x8xbf16> to vector<8x8xbf16>
    %c8_78 = arith.constant 8 : index
    %c56_79 = arith.constant 56 : index
    %47 = vector.load %arg10[%c8_78, %c56_79] : memref<72x64xbf16, #tpu.memory_space<vmem>>, vector<8x8xbf16>
    tpu.vector_store %arg10[%c8_78, %c56_79], %46 {strides = array<i32>} : memref<72x64xbf16, #tpu.memory_space<vmem>>, vector<8x8xbf16>,
    %c0_80 = arith.constant 0 : index
    %c0_81 = arith.constant 0 : index
    %c0_82 = arith.constant 0 : index
    %c1_83 = arith.constant 1 : index
    %48 = vector.load %arg1[%c0_80, %c0_81, %c0_82, %c1_83] : memref<1x2x8x162xbf16, #tpu.memory_space<vmem>>, vector<1x1x8x8xbf16>
    %49 = vector.shape_cast %48 : vector<1x1x8x8xbf16> to vector<8x8xbf16>
    %c16_84 = arith.constant 16 : index
    %c0_85 = arith.constant 0 : index
    %50 = vector.load %arg10[%c16_84, %c0_85] : memref<72x64xbf16, #tpu.memory_space<vmem>>, vector<8x8xbf16>
    tpu.vector_store %arg10[%c16_84, %c0_85], %49 {strides = array<i32>} : memref<72x64xbf16, #tpu.memory_space<vmem>>, vector<8x8xbf16>,
    %c0_86 = arith.constant 0 : index
    %c0_87 = arith.constant 0 : index
    %c0_88 = arith.constant 0 : index
    %c19 = arith.constant 19 : index
    %51 = vector.load %arg1[%c0_86, %c0_87, %c0_88, %c19] : memref<1x2x8x162xbf16, #tpu.memory_space<vmem>>, vector<1x1x8x8xbf16>
    %52 = vector.shape_cast %51 : vector<1x1x8x8xbf16> to vector<8x8xbf16>
    %c16_89 = arith.constant 16 : index
    %c8_90 = arith.constant 8 : index
    %53 = vector.load %arg10[%c16_89, %c8_90] : memref<72x64xbf16, #tpu.memory_space<vmem>>, vector<8x8xbf16>
    tpu.vector_store %arg10[%c16_89, %c8_90], %52 {strides = array<i32>} : memref<72x64xbf16, #tpu.memory_space<vmem>>, vector<8x8xbf16>,
    %c0_91 = arith.constant 0 : index
    %c0_92 = arith.constant 0 : index
    %c0_93 = arith.constant 0 : index
    %c37 = arith.constant 37 : index
    %54 = vector.load %arg1[%c0_91, %c0_92, %c0_93, %c37] : memref<1x2x8x162xbf16, #tpu.memory_space<vmem>>, vector<1x1x8x8xbf16>
    %55 = vector.shape_cast %54 : vector<1x1x8x8xbf16> to vector<8x8xbf16>
    %c16_94 = arith.constant 16 : index
    %c16_95 = arith.constant 16 : index
    %56 = vector.load %arg10[%c16_94, %c16_95] : memref<72x64xbf16, #tpu.memory_space<vmem>>, vector<8x8xbf16>
    tpu.vector_store %arg10[%c16_94, %c16_95], %55 {strides = array<i32>} : memref<72x64xbf16, #tpu.memory_space<vmem>>, vector<8x8xbf16>,
    %c0_96 = arith.constant 0 : index
    %c0_97 = arith.constant 0 : index
    %c0_98 = arith.constant 0 : index
    %c55 = arith.constant 55 : index
    %57 = vector.load %arg1[%c0_96, %c0_97, %c0_98, %c55] : memref<1x2x8x162xbf16, #tpu.memory_space<vmem>>, vector<1x1x8x8xbf16>
    %58 = vector.shape_cast %57 : vector<1x1x8x8xbf16> to vector<8x8xbf16>
    %c16_99 = arith.constant 16 : index
    %c24_100 = arith.constant 24 : index
    %59 = vector.load %arg10[%c16_99, %c24_100] : memref<72x64xbf16, #tpu.memory_space<vmem>>, vector<8x8xbf16>
    tpu.vector_store %arg10[%c16_99, %c24_100], %58 {strides = array<i32>} : memref<72x64xbf16, #tpu.memory_space<vmem>>, vector<8x8xbf16>,
    %c0_101 = arith.constant 0 : index
    %c0_102 = arith.constant 0 : index
    %c0_103 = arith.constant 0 : index
    %c73 = arith.constant 73 : index
    %60 = vector.load %arg1[%c0_101, %c0_102, %c0_103, %c73] : memref<1x2x8x162xbf16, #tpu.memory_space<vmem>>, vector<1x1x8x8xbf16>
    %61 = vector.shape_cast %60 : vector<1x1x8x8xbf16> to vector<8x8xbf16>
    %c16_104 = arith.constant 16 : index
    %c32_105 = arith.constant 32 : index
    %62 = vector.load %arg10[%c16_104, %c32_105] : memref<72x64xbf16, #tpu.memory_space<vmem>>, vector<8x8xbf16>
    tpu.vector_store %arg10[%c16_104, %c32_105], %61 {strides = array<i32>} : memref<72x64xbf16, #tpu.memory_space<vmem>>, vector<8x8xbf16>,
    %c0_106 = arith.constant 0 : index
    %c0_107 = arith.constant 0 : index
    %c0_108 = arith.constant 0 : index
    %c91 = arith.constant 91 : index
    %63 = vector.load %arg1[%c0_106, %c0_107, %c0_108, %c91] : memref<1x2x8x162xbf16, #tpu.memory_space<vmem>>, vector<1x1x8x8xbf16>
    %64 = vector.shape_cast %63 : vector<1x1x8x8xbf16> to vector<8x8xbf16>
    %c16_109 = arith.constant 16 : index
    %c40_110 = arith.constant 40 : index
    %65 = vector.load %arg10[%c16_109, %c40_110] : memref<72x64xbf16, #tpu.memory_space<vmem>>, vector<8x8xbf16>
    tpu.vector_store %arg10[%c16_109, %c40_110], %64 {strides = array<i32>} : memref<72x64xbf16, #tpu.memory_space<vmem>>, vector<8x8xbf16>,
    %c0_111 = arith.constant 0 : index
    %c0_112 = arith.constant 0 : index
    %c0_113 = arith.constant 0 : index
    %c109 = arith.constant 109 : index
    %66 = vector.load %arg1[%c0_111, %c0_112, %c0_113, %c109] : memref<1x2x8x162xbf16, #tpu.memory_space<vmem>>, vector<1x1x8x8xbf16>
    %67 = vector.shape_cast %66 : vector<1x1x8x8xbf16> to vector<8x8xbf16>
    %c16_114 = arith.constant 16 : index
    %c48_115 = arith.constant 48 : index
    %68 = vector.load %arg10[%c16_114, %c48_115] : memref<72x64xbf16, #tpu.memory_space<vmem>>, vector<8x8xbf16>
    tpu.vector_store %arg10[%c16_114, %c48_115], %67 {strides = array<i32>} : memref<72x64xbf16, #tpu.memory_space<vmem>>, vector<8x8xbf16>,
    %c0_116 = arith.constant 0 : index
    %c0_117 = arith.constant 0 : index
    %c0_118 = arith.constant 0 : index
    %c127 = arith.constant 127 : index
    %69 = vector.load %arg1[%c0_116, %c0_117, %c0_118, %c127] : memref<1x2x8x162xbf16, #tpu.memory_space<vmem>>, vector<1x1x8x8xbf16>
    %70 = vector.shape_cast %69 : vector<1x1x8x8xbf16> to vector<8x8xbf16>
    %c16_119 = arith.constant 16 : index
    %c56_120 = arith.constant 56 : index
    %71 = vector.load %arg10[%c16_119, %c56_120] : memref<72x64xbf16, #tpu.memory_space<vmem>>, vector<8x8xbf16>
    tpu.vector_store %arg10[%c16_119, %c56_120], %70 {strides = array<i32>} : memref<72x64xbf16, #tpu.memory_space<vmem>>, vector<8x8xbf16>,
    %c0_121 = arith.constant 0 : index
    %c0_122 = arith.constant 0 : index
    %c0_123 = arith.constant 0 : index
    %c9 = arith.constant 9 : index
    %72 = vector.load %arg1[%c0_121, %c0_122, %c0_123, %c9] : memref<1x2x8x162xbf16, #tpu.memory_space<vmem>>, vector<1x1x8x8xbf16>
    %73 = vector.shape_cast %72 : vector<1x1x8x8xbf16> to vector<8x8xbf16>
    %c24_124 = arith.constant 24 : index
    %c0_125 = arith.constant 0 : index
    %74 = vector.load %arg10[%c24_124, %c0_125] : memref<72x64xbf16, #tpu.memory_space<vmem>>, vector<8x8xbf16>
    tpu.vector_store %arg10[%c24_124, %c0_125], %73 {strides = array<i32>} : memref<72x64xbf16, #tpu.memory_space<vmem>>, vector<8x8xbf16>,
    %c0_126 = arith.constant 0 : index
    %c0_127 = arith.constant 0 : index
    %c0_128 = arith.constant 0 : index
    %c27 = arith.constant 27 : index
    %75 = vector.load %arg1[%c0_126, %c0_127, %c0_128, %c27] : memref<1x2x8x162xbf16, #tpu.memory_space<vmem>>, vector<1x1x8x8xbf16>
    %76 = vector.shape_cast %75 : vector<1x1x8x8xbf16> to vector<8x8xbf16>
    %c24_129 = arith.constant 24 : index
    %c8_130 = arith.constant 8 : index
    %77 = vector.load %arg10[%c24_129, %c8_130] : memref<72x64xbf16, #tpu.memory_space<vmem>>, vector<8x8xbf16>
    tpu.vector_store %arg10[%c24_129, %c8_130], %76 {strides = array<i32>} : memref<72x64xbf16, #tpu.memory_space<vmem>>, vector<8x8xbf16>,
    %c0_131 = arith.constant 0 : index
    %c0_132 = arith.constant 0 : index
    %c0_133 = arith.constant 0 : index
    %c45 = arith.constant 45 : index
    %78 = vector.load %arg1[%c0_131, %c0_132, %c0_133, %c45] : memref<1x2x8x162xbf16, #tpu.memory_space<vmem>>, vector<1x1x8x8xbf16>
    %79 = vector.shape_cast %78 : vector<1x1x8x8xbf16> to vector<8x8xbf16>
    %c24_134 = arith.constant 24 : index
    %c16_135 = arith.constant 16 : index
    %80 = vector.load %arg10[%c24_134, %c16_135] : memref<72x64xbf16, #tpu.memory_space<vmem>>, vector<8x8xbf16>
    tpu.vector_store %arg10[%c24_134, %c16_135], %79 {strides = array<i32>} : memref<72x64xbf16, #tpu.memory_space<vmem>>, vector<8x8xbf16>,
    %c0_136 = arith.constant 0 : index
    %c0_137 = arith.constant 0 : index
    %c0_138 = arith.constant 0 : index
    %c63 = arith.constant 63 : index
    %81 = vector.load %arg1[%c0_136, %c0_137, %c0_138, %c63] : memref<1x2x8x162xbf16, #tpu.memory_space<vmem>>, vector<1x1x8x8xbf16>
    %82 = vector.shape_cast %81 : vector<1x1x8x8xbf16> to vector<8x8xbf16>
    %c24_139 = arith.constant 24 : index
    %c24_140 = arith.constant 24 : index
    %83 = vector.load %arg10[%c24_139, %c24_140] : memref<72x64xbf16, #tpu.memory_space<vmem>>, vector<8x8xbf16>
    tpu.vector_store %arg10[%c24_139, %c24_140], %82 {strides = array<i32>} : memref<72x64xbf16, #tpu.memory_space<vmem>>, vector<8x8xbf16>,
    %c0_141 = arith.constant 0 : index
    %c0_142 = arith.constant 0 : index
    %c0_143 = arith.constant 0 : index
    %c81 = arith.constant 81 : index
    %84 = vector.load %arg1[%c0_141, %c0_142, %c0_143, %c81] : memref<1x2x8x162xbf16, #tpu.memory_space<vmem>>, vector<1x1x8x8xbf16>
    %85 = vector.shape_cast %84 : vector<1x1x8x8xbf16> to vector<8x8xbf16>
    %c24_144 = arith.constant 24 : index
    %c32_145 = arith.constant 32 : index
    %86 = vector.load %arg10[%c24_144, %c32_145] : memref<72x64xbf16, #tpu.memory_space<vmem>>, vector<8x8xbf16>
    tpu.vector_store %arg10[%c24_144, %c32_145], %85 {strides = array<i32>} : memref<72x64xbf16, #tpu.memory_space<vmem>>, vector<8x8xbf16>,
    %c0_146 = arith.constant 0 : index
    %c0_147 = arith.constant 0 : index
    %c0_148 = arith.constant 0 : index
    %c99 = arith.constant 99 : index
    %87 = vector.load %arg1[%c0_146, %c0_147, %c0_148, %c99] : memref<1x2x8x162xbf16, #tpu.memory_space<vmem>>, vector<1x1x8x8xbf16>
    %88 = vector.shape_cast %87 : vector<1x1x8x8xbf16> to vector<8x8xbf16>
    %c24_149 = arith.constant 24 : index
    %c40_150 = arith.constant 40 : index
    %89 = vector.load %arg10[%c24_149, %c40_150] : memref<72x64xbf16, #tpu.memory_space<vmem>>, vector<8x8xbf16>
    tpu.vector_store %arg10[%c24_149, %c40_150], %88 {strides = array<i32>} : memref<72x64xbf16, #tpu.memory_space<vmem>>, vector<8x8xbf16>,
    %c0_151 = arith.constant 0 : index
    %c0_152 = arith.constant 0 : index
    %c0_153 = arith.constant 0 : index
    %c117 = arith.constant 117 : index
    %90 = vector.load %arg1[%c0_151, %c0_152, %c0_153, %c117] : memref<1x2x8x162xbf16, #tpu.memory_space<vmem>>, vector<1x1x8x8xbf16>
    %91 = vector.shape_cast %90 : vector<1x1x8x8xbf16> to vector<8x8xbf16>
    %c24_154 = arith.constant 24 : index
    %c48_155 = arith.constant 48 : index
    %92 = vector.load %arg10[%c24_154, %c48_155] : memref<72x64xbf16, #tpu.memory_space<vmem>>, vector<8x8xbf16>
    tpu.vector_store %arg10[%c24_154, %c48_155], %91 {strides = array<i32>} : memref<72x64xbf16, #tpu.memory_space<vmem>>, vector<8x8xbf16>,
    %c0_156 = arith.constant 0 : index
    %c0_157 = arith.constant 0 : index
    %c0_158 = arith.constant 0 : index
    %c135 = arith.constant 135 : index
    %93 = vector.load %arg1[%c0_156, %c0_157, %c0_158, %c135] : memref<1x2x8x162xbf16, #tpu.memory_space<vmem>>, vector<1x1x8x8xbf16>
    %94 = vector.shape_cast %93 : vector<1x1x8x8xbf16> to vector<8x8xbf16>
    %c24_159 = arith.constant 24 : index
    %c56_160 = arith.constant 56 : index
    %95 = vector.load %arg10[%c24_159, %c56_160] : memref<72x64xbf16, #tpu.memory_space<vmem>>, vector<8x8xbf16>
    tpu.vector_store %arg10[%c24_159, %c56_160], %94 {strides = array<i32>} : memref<72x64xbf16, #tpu.memory_space<vmem>>, vector<8x8xbf16>,
    %c0_161 = arith.constant 0 : index
    %c1_162 = arith.constant 1 : index
    %c0_163 = arith.constant 0 : index
    %c9_164 = arith.constant 9 : index
    %96 = vector.load %arg1[%c0_161, %c1_162, %c0_163, %c9_164] : memref<1x2x8x162xbf16, #tpu.memory_space<vmem>>, vector<1x1x8x8xbf16>
    %97 = vector.shape_cast %96 : vector<1x1x8x8xbf16> to vector<8x8xbf16>
    %c32_165 = arith.constant 32 : index
    %c0_166 = arith.constant 0 : index
    %98 = vector.load %arg10[%c32_165, %c0_166] : memref<72x64xbf16, #tpu.memory_space<vmem>>, vector<8x8xbf16>
    tpu.vector_store %arg10[%c32_165, %c0_166], %97 {strides = array<i32>} : memref<72x64xbf16, #tpu.memory_space<vmem>>, vector<8x8xbf16>,
    %c0_167 = arith.constant 0 : index
    %c1_168 = arith.constant 1 : index
    %c0_169 = arith.constant 0 : index
    %c27_170 = arith.constant 27 : index
    %99 = vector.load %arg1[%c0_167, %c1_168, %c0_169, %c27_170] : memref<1x2x8x162xbf16, #tpu.memory_space<vmem>>, vector<1x1x8x8xbf16>
    %100 = vector.shape_cast %99 : vector<1x1x8x8xbf16> to vector<8x8xbf16>
    %c32_171 = arith.constant 32 : index
    %c8_172 = arith.constant 8 : index
    %101 = vector.load %arg10[%c32_171, %c8_172] : memref<72x64xbf16, #tpu.memory_space<vmem>>, vector<8x8xbf16>
    tpu.vector_store %arg10[%c32_171, %c8_172], %100 {strides = array<i32>} : memref<72x64xbf16, #tpu.memory_space<vmem>>, vector<8x8xbf16>,
    %c0_173 = arith.constant 0 : index
    %c1_174 = arith.constant 1 : index
    %c0_175 = arith.constant 0 : index
    %c45_176 = arith.constant 45 : index
    %102 = vector.load %arg1[%c0_173, %c1_174, %c0_175, %c45_176] : memref<1x2x8x162xbf16, #tpu.memory_space<vmem>>, vector<1x1x8x8xbf16>
    %103 = vector.shape_cast %102 : vector<1x1x8x8xbf16> to vector<8x8xbf16>
    %c32_177 = arith.constant 32 : index
    %c16_178 = arith.constant 16 : index
    %104 = vector.load %arg10[%c32_177, %c16_178] : memref<72x64xbf16, #tpu.memory_space<vmem>>, vector<8x8xbf16>
    tpu.vector_store %arg10[%c32_177, %c16_178], %103 {strides = array<i32>} : memref<72x64xbf16, #tpu.memory_space<vmem>>, vector<8x8xbf16>,
    %c0_179 = arith.constant 0 : index
    %c1_180 = arith.constant 1 : index
    %c0_181 = arith.constant 0 : index
    %c63_182 = arith.constant 63 : index
    %105 = vector.load %arg1[%c0_179, %c1_180, %c0_181, %c63_182] : memref<1x2x8x162xbf16, #tpu.memory_space<vmem>>, vector<1x1x8x8xbf16>
    %106 = vector.shape_cast %105 : vector<1x1x8x8xbf16> to vector<8x8xbf16>
    %c32_183 = arith.constant 32 : index
    %c24_184 = arith.constant 24 : index
    %107 = vector.load %arg10[%c32_183, %c24_184] : memref<72x64xbf16, #tpu.memory_space<vmem>>, vector<8x8xbf16>
    tpu.vector_store %arg10[%c32_183, %c24_184], %106 {strides = array<i32>} : memref<72x64xbf16, #tpu.memory_space<vmem>>, vector<8x8xbf16>,
    %c0_185 = arith.constant 0 : index
    %c1_186 = arith.constant 1 : index
    %c0_187 = arith.constant 0 : index
    %c81_188 = arith.constant 81 : index
    %108 = vector.load %arg1[%c0_185, %c1_186, %c0_187, %c81_188] : memref<1x2x8x162xbf16, #tpu.memory_space<vmem>>, vector<1x1x8x8xbf16>
    %109 = vector.shape_cast %108 : vector<1x1x8x8xbf16> to vector<8x8xbf16>
    %c32_189 = arith.constant 32 : index
    %c32_190 = arith.constant 32 : index
    %110 = vector.load %arg10[%c32_189, %c32_190] : memref<72x64xbf16, #tpu.memory_space<vmem>>, vector<8x8xbf16>
    tpu.vector_store %arg10[%c32_189, %c32_190], %109 {strides = array<i32>} : memref<72x64xbf16, #tpu.memory_space<vmem>>, vector<8x8xbf16>,
    %c0_191 = arith.constant 0 : index
    %c1_192 = arith.constant 1 : index
    %c0_193 = arith.constant 0 : index
    %c99_194 = arith.constant 99 : index
    %111 = vector.load %arg1[%c0_191, %c1_192, %c0_193, %c99_194] : memref<1x2x8x162xbf16, #tpu.memory_space<vmem>>, vector<1x1x8x8xbf16>
    %112 = vector.shape_cast %111 : vector<1x1x8x8xbf16> to vector<8x8xbf16>
    %c32_195 = arith.constant 32 : index
    %c40_196 = arith.constant 40 : index
    %113 = vector.load %arg10[%c32_195, %c40_196] : memref<72x64xbf16, #tpu.memory_space<vmem>>, vector<8x8xbf16>
    tpu.vector_store %arg10[%c32_195, %c40_196], %112 {strides = array<i32>} : memref<72x64xbf16, #tpu.memory_space<vmem>>, vector<8x8xbf16>,
    %c0_197 = arith.constant 0 : index
    %c1_198 = arith.constant 1 : index
    %c0_199 = arith.constant 0 : index
    %c117_200 = arith.constant 117 : index
    %114 = vector.load %arg1[%c0_197, %c1_198, %c0_199, %c117_200] : memref<1x2x8x162xbf16, #tpu.memory_space<vmem>>, vector<1x1x8x8xbf16>
    %115 = vector.shape_cast %114 : vector<1x1x8x8xbf16> to vector<8x8xbf16>
    %c32_201 = arith.constant 32 : index
    %c48_202 = arith.constant 48 : index
    %116 = vector.load %arg10[%c32_201, %c48_202] : memref<72x64xbf16, #tpu.memory_space<vmem>>, vector<8x8xbf16>
    tpu.vector_store %arg10[%c32_201, %c48_202], %115 {strides = array<i32>} : memref<72x64xbf16, #tpu.memory_space<vmem>>, vector<8x8xbf16>,
    %c0_203 = arith.constant 0 : index
    %c1_204 = arith.constant 1 : index
    %c0_205 = arith.constant 0 : index
    %c135_206 = arith.constant 135 : index
    %117 = vector.load %arg1[%c0_203, %c1_204, %c0_205, %c135_206] : memref<1x2x8x162xbf16, #tpu.memory_space<vmem>>, vector<1x1x8x8xbf16>
    %118 = vector.shape_cast %117 : vector<1x1x8x8xbf16> to vector<8x8xbf16>
    %c32_207 = arith.constant 32 : index
    %c56_208 = arith.constant 56 : index
    %119 = vector.load %arg10[%c32_207, %c56_208] : memref<72x64xbf16, #tpu.memory_space<vmem>>, vector<8x8xbf16>
    tpu.vector_store %arg10[%c32_207, %c56_208], %118 {strides = array<i32>} : memref<72x64xbf16, #tpu.memory_space<vmem>>, vector<8x8xbf16>,
    %c0_209 = arith.constant 0 : index
    %c0_210 = arith.constant 0 : index
    %c0_211 = arith.constant 0 : index
    %c10 = arith.constant 10 : index
    %120 = vector.load %arg1[%c0_209, %c0_210, %c0_211, %c10] : memref<1x2x8x162xbf16, #tpu.memory_space<vmem>>, vector<1x1x8x8xbf16>
    %121 = vector.shape_cast %120 : vector<1x1x8x8xbf16> to vector<8x8xbf16>
    %c40_212 = arith.constant 40 : index
    %c0_213 = arith.constant 0 : index
    %122 = vector.load %arg10[%c40_212, %c0_213] : memref<72x64xbf16, #tpu.memory_space<vmem>>, vector<8x8xbf16>
    tpu.vector_store %arg10[%c40_212, %c0_213], %121 {strides = array<i32>} : memref<72x64xbf16, #tpu.memory_space<vmem>>, vector<8x8xbf16>,
    %c0_214 = arith.constant 0 : index
    %c0_215 = arith.constant 0 : index
    %c0_216 = arith.constant 0 : index
    %c28 = arith.constant 28 : index
    %123 = vector.load %arg1[%c0_214, %c0_215, %c0_216, %c28] : memref<1x2x8x162xbf16, #tpu.memory_space<vmem>>, vector<1x1x8x8xbf16>
    %124 = vector.shape_cast %123 : vector<1x1x8x8xbf16> to vector<8x8xbf16>
    %c40_217 = arith.constant 40 : index
    %c8_218 = arith.constant 8 : index
    %125 = vector.load %arg10[%c40_217, %c8_218] : memref<72x64xbf16, #tpu.memory_space<vmem>>, vector<8x8xbf16>
    tpu.vector_store %arg10[%c40_217, %c8_218], %124 {strides = array<i32>} : memref<72x64xbf16, #tpu.memory_space<vmem>>, vector<8x8xbf16>,
    %c0_219 = arith.constant 0 : index
    %c0_220 = arith.constant 0 : index
    %c0_221 = arith.constant 0 : index
    %c46 = arith.constant 46 : index
    %126 = vector.load %arg1[%c0_219, %c0_220, %c0_221, %c46] : memref<1x2x8x162xbf16, #tpu.memory_space<vmem>>, vector<1x1x8x8xbf16>
    %127 = vector.shape_cast %126 : vector<1x1x8x8xbf16> to vector<8x8xbf16>
    %c40_222 = arith.constant 40 : index
    %c16_223 = arith.constant 16 : index
    %128 = vector.load %arg10[%c40_222, %c16_223] : memref<72x64xbf16, #tpu.memory_space<vmem>>, vector<8x8xbf16>
    tpu.vector_store %arg10[%c40_222, %c16_223], %127 {strides = array<i32>} : memref<72x64xbf16, #tpu.memory_space<vmem>>, vector<8x8xbf16>,
    %c0_224 = arith.constant 0 : index
    %c0_225 = arith.constant 0 : index
    %c0_226 = arith.constant 0 : index
    %c64 = arith.constant 64 : index
    %129 = vector.load %arg1[%c0_224, %c0_225, %c0_226, %c64] : memref<1x2x8x162xbf16, #tpu.memory_space<vmem>>, vector<1x1x8x8xbf16>
    %130 = vector.shape_cast %129 : vector<1x1x8x8xbf16> to vector<8x8xbf16>
    %c40_227 = arith.constant 40 : index
    %c24_228 = arith.constant 24 : index
    %131 = vector.load %arg10[%c40_227, %c24_228] : memref<72x64xbf16, #tpu.memory_space<vmem>>, vector<8x8xbf16>
    tpu.vector_store %arg10[%c40_227, %c24_228], %130 {strides = array<i32>} : memref<72x64xbf16, #tpu.memory_space<vmem>>, vector<8x8xbf16>,
    %c0_229 = arith.constant 0 : index
    %c0_230 = arith.constant 0 : index
    %c0_231 = arith.constant 0 : index
    %c82 = arith.constant 82 : index
    %132 = vector.load %arg1[%c0_229, %c0_230, %c0_231, %c82] : memref<1x2x8x162xbf16, #tpu.memory_space<vmem>>, vector<1x1x8x8xbf16>
    %133 = vector.shape_cast %132 : vector<1x1x8x8xbf16> to vector<8x8xbf16>
    %c40_232 = arith.constant 40 : index
    %c32_233 = arith.constant 32 : index
    %134 = vector.load %arg10[%c40_232, %c32_233] : memref<72x64xbf16, #tpu.memory_space<vmem>>, vector<8x8xbf16>
    tpu.vector_store %arg10[%c40_232, %c32_233], %133 {strides = array<i32>} : memref<72x64xbf16, #tpu.memory_space<vmem>>, vector<8x8xbf16>,
    %c0_234 = arith.constant 0 : index
    %c0_235 = arith.constant 0 : index
    %c0_236 = arith.constant 0 : index
    %c100 = arith.constant 100 : index
    %135 = vector.load %arg1[%c0_234, %c0_235, %c0_236, %c100] : memref<1x2x8x162xbf16, #tpu.memory_space<vmem>>, vector<1x1x8x8xbf16>
    %136 = vector.shape_cast %135 : vector<1x1x8x8xbf16> to vector<8x8xbf16>
    %c40_237 = arith.constant 40 : index
    %c40_238 = arith.constant 40 : index
    %137 = vector.load %arg10[%c40_237, %c40_238] : memref<72x64xbf16, #tpu.memory_space<vmem>>, vector<8x8xbf16>
    tpu.vector_store %arg10[%c40_237, %c40_238], %136 {strides = array<i32>} : memref<72x64xbf16, #tpu.memory_space<vmem>>, vector<8x8xbf16>,
    %c0_239 = arith.constant 0 : index
    %c0_240 = arith.constant 0 : index
    %c0_241 = arith.constant 0 : index
    %c118 = arith.constant 118 : index
    %138 = vector.load %arg1[%c0_239, %c0_240, %c0_241, %c118] : memref<1x2x8x162xbf16, #tpu.memory_space<vmem>>, vector<1x1x8x8xbf16>
    %139 = vector.shape_cast %138 : vector<1x1x8x8xbf16> to vector<8x8xbf16>
    %c40_242 = arith.constant 40 : index
    %c48_243 = arith.constant 48 : index
    %140 = vector.load %arg10[%c40_242, %c48_243] : memref<72x64xbf16, #tpu.memory_space<vmem>>, vector<8x8xbf16>
    tpu.vector_store %arg10[%c40_242, %c48_243], %139 {strides = array<i32>} : memref<72x64xbf16, #tpu.memory_space<vmem>>, vector<8x8xbf16>,
    %c0_244 = arith.constant 0 : index
    %c0_245 = arith.constant 0 : index
    %c0_246 = arith.constant 0 : index
    %c136 = arith.constant 136 : index
    %141 = vector.load %arg1[%c0_244, %c0_245, %c0_246, %c136] : memref<1x2x8x162xbf16, #tpu.memory_space<vmem>>, vector<1x1x8x8xbf16>
    %142 = vector.shape_cast %141 : vector<1x1x8x8xbf16> to vector<8x8xbf16>
    %c40_247 = arith.constant 40 : index
    %c56_248 = arith.constant 56 : index
    %143 = vector.load %arg10[%c40_247, %c56_248] : memref<72x64xbf16, #tpu.memory_space<vmem>>, vector<8x8xbf16>
    tpu.vector_store %arg10[%c40_247, %c56_248], %142 {strides = array<i32>} : memref<72x64xbf16, #tpu.memory_space<vmem>>, vector<8x8xbf16>,
    %c0_249 = arith.constant 0 : index
    %c0_250 = arith.constant 0 : index
    %c0_251 = arith.constant 0 : index
    %c18_252 = arith.constant 18 : index
    %144 = vector.load %arg1[%c0_249, %c0_250, %c0_251, %c18_252] : memref<1x2x8x162xbf16, #tpu.memory_space<vmem>>, vector<1x1x8x8xbf16>
    %145 = vector.shape_cast %144 : vector<1x1x8x8xbf16> to vector<8x8xbf16>
    %c48_253 = arith.constant 48 : index
    %c0_254 = arith.constant 0 : index
    %146 = vector.load %arg10[%c48_253, %c0_254] : memref<72x64xbf16, #tpu.memory_space<vmem>>, vector<8x8xbf16>
    tpu.vector_store %arg10[%c48_253, %c0_254], %145 {strides = array<i32>} : memref<72x64xbf16, #tpu.memory_space<vmem>>, vector<8x8xbf16>,
    %c0_255 = arith.constant 0 : index
    %c0_256 = arith.constant 0 : index
    %c0_257 = arith.constant 0 : index
    %c36_258 = arith.constant 36 : index
    %147 = vector.load %arg1[%c0_255, %c0_256, %c0_257, %c36_258] : memref<1x2x8x162xbf16, #tpu.memory_space<vmem>>, vector<1x1x8x8xbf16>
    %148 = vector.shape_cast %147 : vector<1x1x8x8xbf16> to vector<8x8xbf16>
    %c48_259 = arith.constant 48 : index
    %c8_260 = arith.constant 8 : index
    %149 = vector.load %arg10[%c48_259, %c8_260] : memref<72x64xbf16, #tpu.memory_space<vmem>>, vector<8x8xbf16>
    tpu.vector_store %arg10[%c48_259, %c8_260], %148 {strides = array<i32>} : memref<72x64xbf16, #tpu.memory_space<vmem>>, vector<8x8xbf16>,
    %c0_261 = arith.constant 0 : index
    %c0_262 = arith.constant 0 : index
    %c0_263 = arith.constant 0 : index
    %c54_264 = arith.constant 54 : index
    %150 = vector.load %arg1[%c0_261, %c0_262, %c0_263, %c54_264] : memref<1x2x8x162xbf16, #tpu.memory_space<vmem>>, vector<1x1x8x8xbf16>
    %151 = vector.shape_cast %150 : vector<1x1x8x8xbf16> to vector<8x8xbf16>
    %c48_265 = arith.constant 48 : index
    %c16_266 = arith.constant 16 : index
    %152 = vector.load %arg10[%c48_265, %c16_266] : memref<72x64xbf16, #tpu.memory_space<vmem>>, vector<8x8xbf16>
    tpu.vector_store %arg10[%c48_265, %c16_266], %151 {strides = array<i32>} : memref<72x64xbf16, #tpu.memory_space<vmem>>, vector<8x8xbf16>,
    %c0_267 = arith.constant 0 : index
    %c0_268 = arith.constant 0 : index
    %c0_269 = arith.constant 0 : index
    %c72_270 = arith.constant 72 : index
    %153 = vector.load %arg1[%c0_267, %c0_268, %c0_269, %c72_270] : memref<1x2x8x162xbf16, #tpu.memory_space<vmem>>, vector<1x1x8x8xbf16>
    %154 = vector.shape_cast %153 : vector<1x1x8x8xbf16> to vector<8x8xbf16>
    %c48_271 = arith.constant 48 : index
    %c24_272 = arith.constant 24 : index
    %155 = vector.load %arg10[%c48_271, %c24_272] : memref<72x64xbf16, #tpu.memory_space<vmem>>, vector<8x8xbf16>
    tpu.vector_store %arg10[%c48_271, %c24_272], %154 {strides = array<i32>} : memref<72x64xbf16, #tpu.memory_space<vmem>>, vector<8x8xbf16>,
    %c0_273 = arith.constant 0 : index
    %c0_274 = arith.constant 0 : index
    %c0_275 = arith.constant 0 : index
    %c90_276 = arith.constant 90 : index
    %156 = vector.load %arg1[%c0_273, %c0_274, %c0_275, %c90_276] : memref<1x2x8x162xbf16, #tpu.memory_space<vmem>>, vector<1x1x8x8xbf16>
    %157 = vector.shape_cast %156 : vector<1x1x8x8xbf16> to vector<8x8xbf16>
    %c48_277 = arith.constant 48 : index
    %c32_278 = arith.constant 32 : index
    %158 = vector.load %arg10[%c48_277, %c32_278] : memref<72x64xbf16, #tpu.memory_space<vmem>>, vector<8x8xbf16>
    tpu.vector_store %arg10[%c48_277, %c32_278], %157 {strides = array<i32>} : memref<72x64xbf16, #tpu.memory_space<vmem>>, vector<8x8xbf16>,
    %c0_279 = arith.constant 0 : index
    %c0_280 = arith.constant 0 : index
    %c0_281 = arith.constant 0 : index
    %c108_282 = arith.constant 108 : index
    %159 = vector.load %arg1[%c0_279, %c0_280, %c0_281, %c108_282] : memref<1x2x8x162xbf16, #tpu.memory_space<vmem>>, vector<1x1x8x8xbf16>
    %160 = vector.shape_cast %159 : vector<1x1x8x8xbf16> to vector<8x8xbf16>
    %c48_283 = arith.constant 48 : index
    %c40_284 = arith.constant 40 : index
    %161 = vector.load %arg10[%c48_283, %c40_284] : memref<72x64xbf16, #tpu.memory_space<vmem>>, vector<8x8xbf16>
    tpu.vector_store %arg10[%c48_283, %c40_284], %160 {strides = array<i32>} : memref<72x64xbf16, #tpu.memory_space<vmem>>, vector<8x8xbf16>,
    %c0_285 = arith.constant 0 : index
    %c0_286 = arith.constant 0 : index
    %c0_287 = arith.constant 0 : index
    %c126_288 = arith.constant 126 : index
    %162 = vector.load %arg1[%c0_285, %c0_286, %c0_287, %c126_288] : memref<1x2x8x162xbf16, #tpu.memory_space<vmem>>, vector<1x1x8x8xbf16>
    %163 = vector.shape_cast %162 : vector<1x1x8x8xbf16> to vector<8x8xbf16>
    %c48_289 = arith.constant 48 : index
    %c48_290 = arith.constant 48 : index
    %164 = vector.load %arg10[%c48_289, %c48_290] : memref<72x64xbf16, #tpu.memory_space<vmem>>, vector<8x8xbf16>
    tpu.vector_store %arg10[%c48_289, %c48_290], %163 {strides = array<i32>} : memref<72x64xbf16, #tpu.memory_space<vmem>>, vector<8x8xbf16>,
    %c0_291 = arith.constant 0 : index
    %c0_292 = arith.constant 0 : index
    %c0_293 = arith.constant 0 : index
    %c144 = arith.constant 144 : index
    %165 = vector.load %arg1[%c0_291, %c0_292, %c0_293, %c144] : memref<1x2x8x162xbf16, #tpu.memory_space<vmem>>, vector<1x1x8x8xbf16>
    %166 = vector.shape_cast %165 : vector<1x1x8x8xbf16> to vector<8x8xbf16>
    %c48_294 = arith.constant 48 : index
    %c56_295 = arith.constant 56 : index
    %167 = vector.load %arg10[%c48_294, %c56_295] : memref<72x64xbf16, #tpu.memory_space<vmem>>, vector<8x8xbf16>
    tpu.vector_store %arg10[%c48_294, %c56_295], %166 {strides = array<i32>} : memref<72x64xbf16, #tpu.memory_space<vmem>>, vector<8x8xbf16>,
    %c0_296 = arith.constant 0 : index
    %c1_297 = arith.constant 1 : index
    %c0_298 = arith.constant 0 : index
    %c18_299 = arith.constant 18 : index
    %168 = vector.load %arg1[%c0_296, %c1_297, %c0_298, %c18_299] : memref<1x2x8x162xbf16, #tpu.memory_space<vmem>>, vector<1x1x8x8xbf16>
    %169 = vector.shape_cast %168 : vector<1x1x8x8xbf16> to vector<8x8xbf16>
    %c56_300 = arith.constant 56 : index
    %c0_301 = arith.constant 0 : index
    %170 = vector.load %arg10[%c56_300, %c0_301] : memref<72x64xbf16, #tpu.memory_space<vmem>>, vector<8x8xbf16>
    tpu.vector_store %arg10[%c56_300, %c0_301], %169 {strides = array<i32>} : memref<72x64xbf16, #tpu.memory_space<vmem>>, vector<8x8xbf16>,
    %c0_302 = arith.constant 0 : index
    %c1_303 = arith.constant 1 : index
    %c0_304 = arith.constant 0 : index
    %c36_305 = arith.constant 36 : index
    %171 = vector.load %arg1[%c0_302, %c1_303, %c0_304, %c36_305] : memref<1x2x8x162xbf16, #tpu.memory_space<vmem>>, vector<1x1x8x8xbf16>
    %172 = vector.shape_cast %171 : vector<1x1x8x8xbf16> to vector<8x8xbf16>
    %c56_306 = arith.constant 56 : index
    %c8_307 = arith.constant 8 : index
    %173 = vector.load %arg10[%c56_306, %c8_307] : memref<72x64xbf16, #tpu.memory_space<vmem>>, vector<8x8xbf16>
    tpu.vector_store %arg10[%c56_306, %c8_307], %172 {strides = array<i32>} : memref<72x64xbf16, #tpu.memory_space<vmem>>, vector<8x8xbf16>,
    %c0_308 = arith.constant 0 : index
    %c1_309 = arith.constant 1 : index
    %c0_310 = arith.constant 0 : index
    %c54_311 = arith.constant 54 : index
    %174 = vector.load %arg1[%c0_308, %c1_309, %c0_310, %c54_311] : memref<1x2x8x162xbf16, #tpu.memory_space<vmem>>, vector<1x1x8x8xbf16>
    %175 = vector.shape_cast %174 : vector<1x1x8x8xbf16> to vector<8x8xbf16>
    %c56_312 = arith.constant 56 : index
    %c16_313 = arith.constant 16 : index
    %176 = vector.load %arg10[%c56_312, %c16_313] : memref<72x64xbf16, #tpu.memory_space<vmem>>, vector<8x8xbf16>
    tpu.vector_store %arg10[%c56_312, %c16_313], %175 {strides = array<i32>} : memref<72x64xbf16, #tpu.memory_space<vmem>>, vector<8x8xbf16>,
    %c0_314 = arith.constant 0 : index
    %c1_315 = arith.constant 1 : index
    %c0_316 = arith.constant 0 : index
    %c72_317 = arith.constant 72 : index
    %177 = vector.load %arg1[%c0_314, %c1_315, %c0_316, %c72_317] : memref<1x2x8x162xbf16, #tpu.memory_space<vmem>>, vector<1x1x8x8xbf16>
    %178 = vector.shape_cast %177 : vector<1x1x8x8xbf16> to vector<8x8xbf16>
    %c56_318 = arith.constant 56 : index
    %c24_319 = arith.constant 24 : index
    %179 = vector.load %arg10[%c56_318, %c24_319] : memref<72x64xbf16, #tpu.memory_space<vmem>>, vector<8x8xbf16>
    tpu.vector_store %arg10[%c56_318, %c24_319], %178 {strides = array<i32>} : memref<72x64xbf16, #tpu.memory_space<vmem>>, vector<8x8xbf16>,
    %c0_320 = arith.constant 0 : index
    %c1_321 = arith.constant 1 : index
    %c0_322 = arith.constant 0 : index
    %c90_323 = arith.constant 90 : index
    %180 = vector.load %arg1[%c0_320, %c1_321, %c0_322, %c90_323] : memref<1x2x8x162xbf16, #tpu.memory_space<vmem>>, vector<1x1x8x8xbf16>
    %181 = vector.shape_cast %180 : vector<1x1x8x8xbf16> to vector<8x8xbf16>
    %c56_324 = arith.constant 56 : index
    %c32_325 = arith.constant 32 : index
    %182 = vector.load %arg10[%c56_324, %c32_325] : memref<72x64xbf16, #tpu.memory_space<vmem>>, vector<8x8xbf16>
    tpu.vector_store %arg10[%c56_324, %c32_325], %181 {strides = array<i32>} : memref<72x64xbf16, #tpu.memory_space<vmem>>, vector<8x8xbf16>,
    %c0_326 = arith.constant 0 : index
    %c1_327 = arith.constant 1 : index
    %c0_328 = arith.constant 0 : index
    %c108_329 = arith.constant 108 : index
    %183 = vector.load %arg1[%c0_326, %c1_327, %c0_328, %c108_329] : memref<1x2x8x162xbf16, #tpu.memory_space<vmem>>, vector<1x1x8x8xbf16>
    %184 = vector.shape_cast %183 : vector<1x1x8x8xbf16> to vector<8x8xbf16>
    %c56_330 = arith.constant 56 : index
    %c40_331 = arith.constant 40 : index
    %185 = vector.load %arg10[%c56_330, %c40_331] : memref<72x64xbf16, #tpu.memory_space<vmem>>, vector<8x8xbf16>
    tpu.vector_store %arg10[%c56_330, %c40_331], %184 {strides = array<i32>} : memref<72x64xbf16, #tpu.memory_space<vmem>>, vector<8x8xbf16>,
    %c0_332 = arith.constant 0 : index
    %c1_333 = arith.constant 1 : index
    %c0_334 = arith.constant 0 : index
    %c126_335 = arith.constant 126 : index
    %186 = vector.load %arg1[%c0_332, %c1_333, %c0_334, %c126_335] : memref<1x2x8x162xbf16, #tpu.memory_space<vmem>>, vector<1x1x8x8xbf16>
    %187 = vector.shape_cast %186 : vector<1x1x8x8xbf16> to vector<8x8xbf16>
    %c56_336 = arith.constant 56 : index
    %c48_337 = arith.constant 48 : index
    %188 = vector.load %arg10[%c56_336, %c48_337] : memref<72x64xbf16, #tpu.memory_space<vmem>>, vector<8x8xbf16>
    tpu.vector_store %arg10[%c56_336, %c48_337], %187 {strides = array<i32>} : memref<72x64xbf16, #tpu.memory_space<vmem>>, vector<8x8xbf16>,
    %c0_338 = arith.constant 0 : index
    %c1_339 = arith.constant 1 : index
    %c0_340 = arith.constant 0 : index
    %c144_341 = arith.constant 144 : index
    %189 = vector.load %arg1[%c0_338, %c1_339, %c0_340, %c144_341] : memref<1x2x8x162xbf16, #tpu.memory_space<vmem>>, vector<1x1x8x8xbf16>
    %190 = vector.shape_cast %189 : vector<1x1x8x8xbf16> to vector<8x8xbf16>
    %c56_342 = arith.constant 56 : index
    %c56_343 = arith.constant 56 : index
    %191 = vector.load %arg10[%c56_342, %c56_343] : memref<72x64xbf16, #tpu.memory_space<vmem>>, vector<8x8xbf16>
    tpu.vector_store %arg10[%c56_342, %c56_343], %190 {strides = array<i32>} : memref<72x64xbf16, #tpu.memory_space<vmem>>, vector<8x8xbf16>,
    %c0_344 = arith.constant 0 : index
    %c0_345 = arith.constant 0 : index
    %c0_346 = arith.constant 0 : index
    %c19_347 = arith.constant 19 : index
    %192 = vector.load %arg1[%c0_344, %c0_345, %c0_346, %c19_347] : memref<1x2x8x162xbf16, #tpu.memory_space<vmem>>, vector<1x1x8x8xbf16>
    %193 = vector.shape_cast %192 : vector<1x1x8x8xbf16> to vector<8x8xbf16>
    %c64_348 = arith.constant 64 : index
    %c0_349 = arith.constant 0 : index
    %194 = vector.load %arg10[%c64_348, %c0_349] : memref<72x64xbf16, #tpu.memory_space<vmem>>, vector<8x8xbf16>
    tpu.vector_store %arg10[%c64_348, %c0_349], %193 {strides = array<i32>} : memref<72x64xbf16, #tpu.memory_space<vmem>>, vector<8x8xbf16>,
    %c0_350 = arith.constant 0 : index
    %c0_351 = arith.constant 0 : index
    %c0_352 = arith.constant 0 : index
    %c37_353 = arith.constant 37 : index
    %195 = vector.load %arg1[%c0_350, %c0_351, %c0_352, %c37_353] : memref<1x2x8x162xbf16, #tpu.memory_space<vmem>>, vector<1x1x8x8xbf16>
    %196 = vector.shape_cast %195 : vector<1x1x8x8xbf16> to vector<8x8xbf16>
    %c64_354 = arith.constant 64 : index
    %c8_355 = arith.constant 8 : index
    %197 = vector.load %arg10[%c64_354, %c8_355] : memref<72x64xbf16, #tpu.memory_space<vmem>>, vector<8x8xbf16>
    tpu.vector_store %arg10[%c64_354, %c8_355], %196 {strides = array<i32>} : memref<72x64xbf16, #tpu.memory_space<vmem>>, vector<8x8xbf16>,
    %c0_356 = arith.constant 0 : index
    %c0_357 = arith.constant 0 : index
    %c0_358 = arith.constant 0 : index
    %c55_359 = arith.constant 55 : index
    %198 = vector.load %arg1[%c0_356, %c0_357, %c0_358, %c55_359] : memref<1x2x8x162xbf16, #tpu.memory_space<vmem>>, vector<1x1x8x8xbf16>
    %199 = vector.shape_cast %198 : vector<1x1x8x8xbf16> to vector<8x8xbf16>
    %c64_360 = arith.constant 64 : index
    %c16_361 = arith.constant 16 : index
    %200 = vector.load %arg10[%c64_360, %c16_361] : memref<72x64xbf16, #tpu.memory_space<vmem>>, vector<8x8xbf16>
    tpu.vector_store %arg10[%c64_360, %c16_361], %199 {strides = array<i32>} : memref<72x64xbf16, #tpu.memory_space<vmem>>, vector<8x8xbf16>,
    %c0_362 = arith.constant 0 : index
    %c0_363 = arith.constant 0 : index
    %c0_364 = arith.constant 0 : index
    %c73_365 = arith.constant 73 : index
    %201 = vector.load %arg1[%c0_362, %c0_363, %c0_364, %c73_365] : memref<1x2x8x162xbf16, #tpu.memory_space<vmem>>, vector<1x1x8x8xbf16>
    %202 = vector.shape_cast %201 : vector<1x1x8x8xbf16> to vector<8x8xbf16>
    %c64_366 = arith.constant 64 : index
    %c24_367 = arith.constant 24 : index
    %203 = vector.load %arg10[%c64_366, %c24_367] : memref<72x64xbf16, #tpu.memory_space<vmem>>, vector<8x8xbf16>
    tpu.vector_store %arg10[%c64_366, %c24_367], %202 {strides = array<i32>} : memref<72x64xbf16, #tpu.memory_space<vmem>>, vector<8x8xbf16>,
    %c0_368 = arith.constant 0 : index
    %c0_369 = arith.constant 0 : index
    %c0_370 = arith.constant 0 : index
    %c91_371 = arith.constant 91 : index
    %204 = vector.load %arg1[%c0_368, %c0_369, %c0_370, %c91_371] : memref<1x2x8x162xbf16, #tpu.memory_space<vmem>>, vector<1x1x8x8xbf16>
    %205 = vector.shape_cast %204 : vector<1x1x8x8xbf16> to vector<8x8xbf16>
    %c64_372 = arith.constant 64 : index
    %c32_373 = arith.constant 32 : index
    %206 = vector.load %arg10[%c64_372, %c32_373] : memref<72x64xbf16, #tpu.memory_space<vmem>>, vector<8x8xbf16>
    tpu.vector_store %arg10[%c64_372, %c32_373], %205 {strides = array<i32>} : memref<72x64xbf16, #tpu.memory_space<vmem>>, vector<8x8xbf16>,
    %c0_374 = arith.constant 0 : index
    %c0_375 = arith.constant 0 : index
    %c0_376 = arith.constant 0 : index
    %c109_377 = arith.constant 109 : index
    %207 = vector.load %arg1[%c0_374, %c0_375, %c0_376, %c109_377] : memref<1x2x8x162xbf16, #tpu.memory_space<vmem>>, vector<1x1x8x8xbf16>
    %208 = vector.shape_cast %207 : vector<1x1x8x8xbf16> to vector<8x8xbf16>
    %c64_378 = arith.constant 64 : index
    %c40_379 = arith.constant 40 : index
    %209 = vector.load %arg10[%c64_378, %c40_379] : memref<72x64xbf16, #tpu.memory_space<vmem>>, vector<8x8xbf16>
    tpu.vector_store %arg10[%c64_378, %c40_379], %208 {strides = array<i32>} : memref<72x64xbf16, #tpu.memory_space<vmem>>, vector<8x8xbf16>,
    %c0_380 = arith.constant 0 : index
    %c0_381 = arith.constant 0 : index
    %c0_382 = arith.constant 0 : index
    %c127_383 = arith.constant 127 : index
    %210 = vector.load %arg1[%c0_380, %c0_381, %c0_382, %c127_383] : memref<1x2x8x162xbf16, #tpu.memory_space<vmem>>, vector<1x1x8x8xbf16>
    %211 = vector.shape_cast %210 : vector<1x1x8x8xbf16> to vector<8x8xbf16>
    %c64_384 = arith.constant 64 : index
    %c48_385 = arith.constant 48 : index
    %212 = vector.load %arg10[%c64_384, %c48_385] : memref<72x64xbf16, #tpu.memory_space<vmem>>, vector<8x8xbf16>
    tpu.vector_store %arg10[%c64_384, %c48_385], %211 {strides = array<i32>} : memref<72x64xbf16, #tpu.memory_space<vmem>>, vector<8x8xbf16>,
    %c0_386 = arith.constant 0 : index
    %c0_387 = arith.constant 0 : index
    %c0_388 = arith.constant 0 : index
    %c145 = arith.constant 145 : index
    %213 = vector.load %arg1[%c0_386, %c0_387, %c0_388, %c145] : memref<1x2x8x162xbf16, #tpu.memory_space<vmem>>, vector<1x1x8x8xbf16>
    %214 = vector.shape_cast %213 : vector<1x1x8x8xbf16> to vector<8x8xbf16>
    %c64_389 = arith.constant 64 : index
    %c56_390 = arith.constant 56 : index
    %215 = vector.load %arg10[%c64_389, %c56_390] : memref<72x64xbf16, #tpu.memory_space<vmem>>, vector<8x8xbf16>
    tpu.vector_store %arg10[%c64_389, %c56_390], %214 {strides = array<i32>} : memref<72x64xbf16, #tpu.memory_space<vmem>>, vector<8x8xbf16>,
    %c0_391 = arith.constant 0 : index
    %c0_392 = arith.constant 0 : index
    %216 = vector.load %arg2[%c0_391, %c0_392] : memref<8x72xbf16, #tpu.memory_space<vmem>>, vector<8x72xbf16>
    %c0_393 = arith.constant 0 : index
    %c0_394 = arith.constant 0 : index
    %217 = vector.load %arg10[%c0_393, %c0_394] : memref<72x64xbf16, #tpu.memory_space<vmem>>, vector<72x64xbf16>
    %cst = arith.constant dense<0.000000e+00> : vector<8x64xf32>
    %218 = tpu.matmul %216, %217, %cst {dimension_numbers = #tpu.dot_dimension_numbers<[1], [0], [0], [1], [0, 0, 1, 1], [], []>} : vector<8x72xbf16>, vector<72x64xbf16>, vector<8x64xf32> -> vector<8x64xf32>
    %c0_395 = arith.constant 0 : index
    %c0_396 = arith.constant 0 : index
    %219 = vector.load %arg3[%c0_395, %c0_396] : memref<8x1xf32, #tpu.memory_space<vmem>>, vector<8x1xf32>
    %220 = vector.broadcast %219 : vector<8x1xf32> to vector<8x64xf32>
    %221 = arith.mulf %218, %220 : vector<8x64xf32>
    %c0_397 = arith.constant 0 : index
    %c0_398 = arith.constant 0 : index
    %222 = vector.load %arg4[%c0_397, %c0_398] : memref<8x1xf32, #tpu.memory_space<vmem>>, vector<8x1xf32>
    %223 = vector.broadcast %222 : vector<8x1xf32> to vector<8x64xf32>
    %224 = arith.addf %221, %223 : vector<8x64xf32>
    %cst_399 = arith.constant 0.000000e+00 : f32
    %225 = vector.broadcast %cst_399 : f32 to vector<8x64xf32>
    %226 = arith.maximumf %224, %225 : vector<8x64xf32>
    %227 = arith.truncf %226 : vector<8x64xf32> to vector<8x64xbf16>
    %cst_400 = arith.constant 0.000000e+00 : bf16
    %228 = vector.broadcast %cst_400 : bf16 to vector<1x8x100xbf16>
    %c0_401 = arith.constant 0 : index
    %c0_402 = arith.constant 0 : index
    %c0_403 = arith.constant 0 : index
    %229 = vector.load %arg12[%c0_401, %c0_402, %c0_403] : memref<1x8x100xbf16, #tpu.memory_space<vmem>>, vector<1x8x100xbf16>
    tpu.vector_store %arg12[%c0_401, %c0_402, %c0_403], %228 {strides = array<i32>} : memref<1x8x100xbf16, #tpu.memory_space<vmem>>, vector<1x8x100xbf16>,
    %230 = vector.extract_strided_slice %227 {offsets = [0, 0], sizes = [8, 8], strides = [1, 1]} : vector<8x64xbf16> to vector<8x8xbf16>
    %c0_404 = arith.constant 0 : index
    %c0_405 = arith.constant 0 : index
    %c11 = arith.constant 11 : index
    %231 = vector.load %arg12[%c0_404, %c0_405, %c11] : memref<1x8x100xbf16, #tpu.memory_space<vmem>>, vector<1x8x8xbf16>
    %232 = vector.shape_cast %231 : vector<1x8x8xbf16> to vector<8x8xbf16>
    %233 = vector.shape_cast %230 : vector<8x8xbf16> to vector<1x8x8xbf16>
    tpu.vector_store %arg12[%c0_404, %c0_405, %c11], %233 {strides = array<i32>} : memref<1x8x100xbf16, #tpu.memory_space<vmem>>, vector<1x8x8xbf16>,
    %234 = vector.extract_strided_slice %227 {offsets = [0, 8], sizes = [8, 8], strides = [1, 1]} : vector<8x64xbf16> to vector<8x8xbf16>
    %c0_406 = arith.constant 0 : index
    %c0_407 = arith.constant 0 : index
    %c21 = arith.constant 21 : index
    %235 = vector.load %arg12[%c0_406, %c0_407, %c21] : memref<1x8x100xbf16, #tpu.memory_space<vmem>>, vector<1x8x8xbf16>
    %236 = vector.shape_cast %235 : vector<1x8x8xbf16> to vector<8x8xbf16>
    %237 = vector.shape_cast %234 : vector<8x8xbf16> to vector<1x8x8xbf16>
    tpu.vector_store %arg12[%c0_406, %c0_407, %c21], %237 {strides = array<i32>} : memref<1x8x100xbf16, #tpu.memory_space<vmem>>, vector<1x8x8xbf16>,
    %238 = vector.extract_strided_slice %227 {offsets = [0, 16], sizes = [8, 8], strides = [1, 1]} : vector<8x64xbf16> to vector<8x8xbf16>
    %c0_408 = arith.constant 0 : index
    %c0_409 = arith.constant 0 : index
    %c31 = arith.constant 31 : index
    %239 = vector.load %arg12[%c0_408, %c0_409, %c31] : memref<1x8x100xbf16, #tpu.memory_space<vmem>>, vector<1x8x8xbf16>
    %240 = vector.shape_cast %239 : vector<1x8x8xbf16> to vector<8x8xbf16>
    %241 = vector.shape_cast %238 : vector<8x8xbf16> to vector<1x8x8xbf16>
    tpu.vector_store %arg12[%c0_408, %c0_409, %c31], %241 {strides = array<i32>} : memref<1x8x100xbf16, #tpu.memory_space<vmem>>, vector<1x8x8xbf16>,
    %242 = vector.extract_strided_slice %227 {offsets = [0, 24], sizes = [8, 8], strides = [1, 1]} : vector<8x64xbf16> to vector<8x8xbf16>
    %c0_410 = arith.constant 0 : index
    %c0_411 = arith.constant 0 : index
    %c41 = arith.constant 41 : index
    %243 = vector.load %arg12[%c0_410, %c0_411, %c41] : memref<1x8x100xbf16, #tpu.memory_space<vmem>>, vector<1x8x8xbf16>
    %244 = vector.shape_cast %243 : vector<1x8x8xbf16> to vector<8x8xbf16>
    %245 = vector.shape_cast %242 : vector<8x8xbf16> to vector<1x8x8xbf16>
    tpu.vector_store %arg12[%c0_410, %c0_411, %c41], %245 {strides = array<i32>} : memref<1x8x100xbf16, #tpu.memory_space<vmem>>, vector<1x8x8xbf16>,
    %246 = vector.extract_strided_slice %227 {offsets = [0, 32], sizes = [8, 8], strides = [1, 1]} : vector<8x64xbf16> to vector<8x8xbf16>
    %c0_412 = arith.constant 0 : index
    %c0_413 = arith.constant 0 : index
    %c51 = arith.constant 51 : index
    %247 = vector.load %arg12[%c0_412, %c0_413, %c51] : memref<1x8x100xbf16, #tpu.memory_space<vmem>>, vector<1x8x8xbf16>
    %248 = vector.shape_cast %247 : vector<1x8x8xbf16> to vector<8x8xbf16>
    %249 = vector.shape_cast %246 : vector<8x8xbf16> to vector<1x8x8xbf16>
    tpu.vector_store %arg12[%c0_412, %c0_413, %c51], %249 {strides = array<i32>} : memref<1x8x100xbf16, #tpu.memory_space<vmem>>, vector<1x8x8xbf16>,
    %250 = vector.extract_strided_slice %227 {offsets = [0, 40], sizes = [8, 8], strides = [1, 1]} : vector<8x64xbf16> to vector<8x8xbf16>
    %c0_414 = arith.constant 0 : index
    %c0_415 = arith.constant 0 : index
    %c61 = arith.constant 61 : index
    %251 = vector.load %arg12[%c0_414, %c0_415, %c61] : memref<1x8x100xbf16, #tpu.memory_space<vmem>>, vector<1x8x8xbf16>
    %252 = vector.shape_cast %251 : vector<1x8x8xbf16> to vector<8x8xbf16>
    %253 = vector.shape_cast %250 : vector<8x8xbf16> to vector<1x8x8xbf16>
    tpu.vector_store %arg12[%c0_414, %c0_415, %c61], %253 {strides = array<i32>} : memref<1x8x100xbf16, #tpu.memory_space<vmem>>, vector<1x8x8xbf16>,
    %254 = vector.extract_strided_slice %227 {offsets = [0, 48], sizes = [8, 8], strides = [1, 1]} : vector<8x64xbf16> to vector<8x8xbf16>
    %c0_416 = arith.constant 0 : index
    %c0_417 = arith.constant 0 : index
    %c71 = arith.constant 71 : index
    %255 = vector.load %arg12[%c0_416, %c0_417, %c71] : memref<1x8x100xbf16, #tpu.memory_space<vmem>>, vector<1x8x8xbf16>
    %256 = vector.shape_cast %255 : vector<1x8x8xbf16> to vector<8x8xbf16>
    %257 = vector.shape_cast %254 : vector<8x8xbf16> to vector<1x8x8xbf16>
    tpu.vector_store %arg12[%c0_416, %c0_417, %c71], %257 {strides = array<i32>} : memref<1x8x100xbf16, #tpu.memory_space<vmem>>, vector<1x8x8xbf16>,
    %258 = vector.extract_strided_slice %227 {offsets = [0, 56], sizes = [8, 8], strides = [1, 1]} : vector<8x64xbf16> to vector<8x8xbf16>
    %c0_418 = arith.constant 0 : index
    %c0_419 = arith.constant 0 : index
    %c81_420 = arith.constant 81 : index
    %259 = vector.load %arg12[%c0_418, %c0_419, %c81_420] : memref<1x8x100xbf16, #tpu.memory_space<vmem>>, vector<1x8x8xbf16>
    %260 = vector.shape_cast %259 : vector<1x8x8xbf16> to vector<8x8xbf16>
    %261 = vector.shape_cast %258 : vector<8x8xbf16> to vector<1x8x8xbf16>
    tpu.vector_store %arg12[%c0_418, %c0_419, %c81_420], %261 {strides = array<i32>} : memref<1x8x100xbf16, #tpu.memory_space<vmem>>, vector<1x8x8xbf16>,
    %c0_421 = arith.constant 0 : index
    %c0_422 = arith.constant 0 : index
    %c0_423 = arith.constant 0 : index
    %262 = vector.load %arg12[%c0_421, %c0_422, %c0_423] : memref<1x8x100xbf16, #tpu.memory_space<vmem>>, vector<1x8x8xbf16>
    %263 = vector.shape_cast %262 : vector<1x8x8xbf16> to vector<8x8xbf16>
    %c0_424 = arith.constant 0 : index
    %c0_425 = arith.constant 0 : index
    %264 = vector.load %arg11[%c0_424, %c0_425] : memref<72x64xbf16, #tpu.memory_space<vmem>>, vector<8x8xbf16>
    tpu.vector_store %arg11[%c0_424, %c0_425], %263 {strides = array<i32>} : memref<72x64xbf16, #tpu.memory_space<vmem>>, vector<8x8xbf16>,
    %c0_426 = arith.constant 0 : index
    %c0_427 = arith.constant 0 : index
    %c10_428 = arith.constant 10 : index
    %265 = vector.load %arg12[%c0_426, %c0_427, %c10_428] : memref<1x8x100xbf16, #tpu.memory_space<vmem>>, vector<1x8x8xbf16>
    %266 = vector.shape_cast %265 : vector<1x8x8xbf16> to vector<8x8xbf16>
    %c0_429 = arith.constant 0 : index
    %c8_430 = arith.constant 8 : index
    %267 = vector.load %arg11[%c0_429, %c8_430] : memref<72x64xbf16, #tpu.memory_space<vmem>>, vector<8x8xbf16>
    tpu.vector_store %arg11[%c0_429, %c8_430], %266 {strides = array<i32>} : memref<72x64xbf16, #tpu.memory_space<vmem>>, vector<8x8xbf16>,
    %c0_431 = arith.constant 0 : index
    %c0_432 = arith.constant 0 : index
    %c20 = arith.constant 20 : index
    %268 = vector.load %arg12[%c0_431, %c0_432, %c20] : memref<1x8x100xbf16, #tpu.memory_space<vmem>>, vector<1x8x8xbf16>
    %269 = vector.shape_cast %268 : vector<1x8x8xbf16> to vector<8x8xbf16>
    %c0_433 = arith.constant 0 : index
    %c16_434 = arith.constant 16 : index
    %270 = vector.load %arg11[%c0_433, %c16_434] : memref<72x64xbf16, #tpu.memory_space<vmem>>, vector<8x8xbf16>
    tpu.vector_store %arg11[%c0_433, %c16_434], %269 {strides = array<i32>} : memref<72x64xbf16, #tpu.memory_space<vmem>>, vector<8x8xbf16>,
    %c0_435 = arith.constant 0 : index
    %c0_436 = arith.constant 0 : index
    %c30 = arith.constant 30 : index
    %271 = vector.load %arg12[%c0_435, %c0_436, %c30] : memref<1x8x100xbf16, #tpu.memory_space<vmem>>, vector<1x8x8xbf16>
    %272 = vector.shape_cast %271 : vector<1x8x8xbf16> to vector<8x8xbf16>
    %c0_437 = arith.constant 0 : index
    %c24_438 = arith.constant 24 : index
    %273 = vector.load %arg11[%c0_437, %c24_438] : memref<72x64xbf16, #tpu.memory_space<vmem>>, vector<8x8xbf16>
    tpu.vector_store %arg11[%c0_437, %c24_438], %272 {strides = array<i32>} : memref<72x64xbf16, #tpu.memory_space<vmem>>, vector<8x8xbf16>,
    %c0_439 = arith.constant 0 : index
    %c0_440 = arith.constant 0 : index
    %c40_441 = arith.constant 40 : index
    %274 = vector.load %arg12[%c0_439, %c0_440, %c40_441] : memref<1x8x100xbf16, #tpu.memory_space<vmem>>, vector<1x8x8xbf16>
    %275 = vector.shape_cast %274 : vector<1x8x8xbf16> to vector<8x8xbf16>
    %c0_442 = arith.constant 0 : index
    %c32_443 = arith.constant 32 : index
    %276 = vector.load %arg11[%c0_442, %c32_443] : memref<72x64xbf16, #tpu.memory_space<vmem>>, vector<8x8xbf16>
    tpu.vector_store %arg11[%c0_442, %c32_443], %275 {strides = array<i32>} : memref<72x64xbf16, #tpu.memory_space<vmem>>, vector<8x8xbf16>,
    %c0_444 = arith.constant 0 : index
    %c0_445 = arith.constant 0 : index
    %c50 = arith.constant 50 : index
    %277 = vector.load %arg12[%c0_444, %c0_445, %c50] : memref<1x8x100xbf16, #tpu.memory_space<vmem>>, vector<1x8x8xbf16>
    %278 = vector.shape_cast %277 : vector<1x8x8xbf16> to vector<8x8xbf16>
    %c0_446 = arith.constant 0 : index
    %c40_447 = arith.constant 40 : index
    %279 = vector.load %arg11[%c0_446, %c40_447] : memref<72x64xbf16, #tpu.memory_space<vmem>>, vector<8x8xbf16>
    tpu.vector_store %arg11[%c0_446, %c40_447], %278 {strides = array<i32>} : memref<72x64xbf16, #tpu.memory_space<vmem>>, vector<8x8xbf16>,
    %c0_448 = arith.constant 0 : index
    %c0_449 = arith.constant 0 : index
    %c60 = arith.constant 60 : index
    %280 = vector.load %arg12[%c0_448, %c0_449, %c60] : memref<1x8x100xbf16, #tpu.memory_space<vmem>>, vector<1x8x8xbf16>
    %281 = vector.shape_cast %280 : vector<1x8x8xbf16> to vector<8x8xbf16>
    %c0_450 = arith.constant 0 : index
    %c48_451 = arith.constant 48 : index
    %282 = vector.load %arg11[%c0_450, %c48_451] : memref<72x64xbf16, #tpu.memory_space<vmem>>, vector<8x8xbf16>
    tpu.vector_store %arg11[%c0_450, %c48_451], %281 {strides = array<i32>} : memref<72x64xbf16, #tpu.memory_space<vmem>>, vector<8x8xbf16>,
    %c0_452 = arith.constant 0 : index
    %c0_453 = arith.constant 0 : index
    %c70 = arith.constant 70 : index
    %283 = vector.load %arg12[%c0_452, %c0_453, %c70] : memref<1x8x100xbf16, #tpu.memory_space<vmem>>, vector<1x8x8xbf16>
    %284 = vector.shape_cast %283 : vector<1x8x8xbf16> to vector<8x8xbf16>
    %c0_454 = arith.constant 0 : index
    %c56_455 = arith.constant 56 : index
    %285 = vector.load %arg11[%c0_454, %c56_455] : memref<72x64xbf16, #tpu.memory_space<vmem>>, vector<8x8xbf16>
    tpu.vector_store %arg11[%c0_454, %c56_455], %284 {strides = array<i32>} : memref<72x64xbf16, #tpu.memory_space<vmem>>, vector<8x8xbf16>,
    %c0_456 = arith.constant 0 : index
    %c0_457 = arith.constant 0 : index
    %c1_458 = arith.constant 1 : index
    %286 = vector.load %arg12[%c0_456, %c0_457, %c1_458] : memref<1x8x100xbf16, #tpu.memory_space<vmem>>, vector<1x8x8xbf16>
    %287 = vector.shape_cast %286 : vector<1x8x8xbf16> to vector<8x8xbf16>
    %c8_459 = arith.constant 8 : index
    %c0_460 = arith.constant 0 : index
    %288 = vector.load %arg11[%c8_459, %c0_460] : memref<72x64xbf16, #tpu.memory_space<vmem>>, vector<8x8xbf16>
    tpu.vector_store %arg11[%c8_459, %c0_460], %287 {strides = array<i32>} : memref<72x64xbf16, #tpu.memory_space<vmem>>, vector<8x8xbf16>,
    %c0_461 = arith.constant 0 : index
    %c0_462 = arith.constant 0 : index
    %c11_463 = arith.constant 11 : index
    %289 = vector.load %arg12[%c0_461, %c0_462, %c11_463] : memref<1x8x100xbf16, #tpu.memory_space<vmem>>, vector<1x8x8xbf16>
    %290 = vector.shape_cast %289 : vector<1x8x8xbf16> to vector<8x8xbf16>
    %c8_464 = arith.constant 8 : index
    %c8_465 = arith.constant 8 : index
    %291 = vector.load %arg11[%c8_464, %c8_465] : memref<72x64xbf16, #tpu.memory_space<vmem>>, vector<8x8xbf16>
    tpu.vector_store %arg11[%c8_464, %c8_465], %290 {strides = array<i32>} : memref<72x64xbf16, #tpu.memory_space<vmem>>, vector<8x8xbf16>,
    %c0_466 = arith.constant 0 : index
    %c0_467 = arith.constant 0 : index
    %c21_468 = arith.constant 21 : index
    %292 = vector.load %arg12[%c0_466, %c0_467, %c21_468] : memref<1x8x100xbf16, #tpu.memory_space<vmem>>, vector<1x8x8xbf16>
    %293 = vector.shape_cast %292 : vector<1x8x8xbf16> to vector<8x8xbf16>
    %c8_469 = arith.constant 8 : index
    %c16_470 = arith.constant 16 : index
    %294 = vector.load %arg11[%c8_469, %c16_470] : memref<72x64xbf16, #tpu.memory_space<vmem>>, vector<8x8xbf16>
    tpu.vector_store %arg11[%c8_469, %c16_470], %293 {strides = array<i32>} : memref<72x64xbf16, #tpu.memory_space<vmem>>, vector<8x8xbf16>,
    %c0_471 = arith.constant 0 : index
    %c0_472 = arith.constant 0 : index
    %c31_473 = arith.constant 31 : index
    %295 = vector.load %arg12[%c0_471, %c0_472, %c31_473] : memref<1x8x100xbf16, #tpu.memory_space<vmem>>, vector<1x8x8xbf16>
    %296 = vector.shape_cast %295 : vector<1x8x8xbf16> to vector<8x8xbf16>
    %c8_474 = arith.constant 8 : index
    %c24_475 = arith.constant 24 : index
    %297 = vector.load %arg11[%c8_474, %c24_475] : memref<72x64xbf16, #tpu.memory_space<vmem>>, vector<8x8xbf16>
    tpu.vector_store %arg11[%c8_474, %c24_475], %296 {strides = array<i32>} : memref<72x64xbf16, #tpu.memory_space<vmem>>, vector<8x8xbf16>,
    %c0_476 = arith.constant 0 : index
    %c0_477 = arith.constant 0 : index
    %c41_478 = arith.constant 41 : index
    %298 = vector.load %arg12[%c0_476, %c0_477, %c41_478] : memref<1x8x100xbf16, #tpu.memory_space<vmem>>, vector<1x8x8xbf16>
    %299 = vector.shape_cast %298 : vector<1x8x8xbf16> to vector<8x8xbf16>
    %c8_479 = arith.constant 8 : index
    %c32_480 = arith.constant 32 : index
    %300 = vector.load %arg11[%c8_479, %c32_480] : memref<72x64xbf16, #tpu.memory_space<vmem>>, vector<8x8xbf16>
    tpu.vector_store %arg11[%c8_479, %c32_480], %299 {strides = array<i32>} : memref<72x64xbf16, #tpu.memory_space<vmem>>, vector<8x8xbf16>,
    %c0_481 = arith.constant 0 : index
    %c0_482 = arith.constant 0 : index
    %c51_483 = arith.constant 51 : index
    %301 = vector.load %arg12[%c0_481, %c0_482, %c51_483] : memref<1x8x100xbf16, #tpu.memory_space<vmem>>, vector<1x8x8xbf16>
    %302 = vector.shape_cast %301 : vector<1x8x8xbf16> to vector<8x8xbf16>
    %c8_484 = arith.constant 8 : index
    %c40_485 = arith.constant 40 : index
    %303 = vector.load %arg11[%c8_484, %c40_485] : memref<72x64xbf16, #tpu.memory_space<vmem>>, vector<8x8xbf16>
    tpu.vector_store %arg11[%c8_484, %c40_485], %302 {strides = array<i32>} : memref<72x64xbf16, #tpu.memory_space<vmem>>, vector<8x8xbf16>,
    %c0_486 = arith.constant 0 : index
    %c0_487 = arith.constant 0 : index
    %c61_488 = arith.constant 61 : index
    %304 = vector.load %arg12[%c0_486, %c0_487, %c61_488] : memref<1x8x100xbf16, #tpu.memory_space<vmem>>, vector<1x8x8xbf16>
    %305 = vector.shape_cast %304 : vector<1x8x8xbf16> to vector<8x8xbf16>
    %c8_489 = arith.constant 8 : index
    %c48_490 = arith.constant 48 : index
    %306 = vector.load %arg11[%c8_489, %c48_490] : memref<72x64xbf16, #tpu.memory_space<vmem>>, vector<8x8xbf16>
    tpu.vector_store %arg11[%c8_489, %c48_490], %305 {strides = array<i32>} : memref<72x64xbf16, #tpu.memory_space<vmem>>, vector<8x8xbf16>,
    %c0_491 = arith.constant 0 : index
    %c0_492 = arith.constant 0 : index
    %c71_493 = arith.constant 71 : index
    %307 = vector.load %arg12[%c0_491, %c0_492, %c71_493] : memref<1x8x100xbf16, #tpu.memory_space<vmem>>, vector<1x8x8xbf16>
    %308 = vector.shape_cast %307 : vector<1x8x8xbf16> to vector<8x8xbf16>
    %c8_494 = arith.constant 8 : index
    %c56_495 = arith.constant 56 : index
    %309 = vector.load %arg11[%c8_494, %c56_495] : memref<72x64xbf16, #tpu.memory_space<vmem>>, vector<8x8xbf16>
    tpu.vector_store %arg11[%c8_494, %c56_495], %308 {strides = array<i32>} : memref<72x64xbf16, #tpu.memory_space<vmem>>, vector<8x8xbf16>,
    %c0_496 = arith.constant 0 : index
    %c0_497 = arith.constant 0 : index
    %c2 = arith.constant 2 : index
    %310 = vector.load %arg12[%c0_496, %c0_497, %c2] : memref<1x8x100xbf16, #tpu.memory_space<vmem>>, vector<1x8x8xbf16>
    %311 = vector.shape_cast %310 : vector<1x8x8xbf16> to vector<8x8xbf16>
    %c16_498 = arith.constant 16 : index
    %c0_499 = arith.constant 0 : index
    %312 = vector.load %arg11[%c16_498, %c0_499] : memref<72x64xbf16, #tpu.memory_space<vmem>>, vector<8x8xbf16>
    tpu.vector_store %arg11[%c16_498, %c0_499], %311 {strides = array<i32>} : memref<72x64xbf16, #tpu.memory_space<vmem>>, vector<8x8xbf16>,
    %c0_500 = arith.constant 0 : index
    %c0_501 = arith.constant 0 : index
    %c12 = arith.constant 12 : index
    %313 = vector.load %arg12[%c0_500, %c0_501, %c12] : memref<1x8x100xbf16, #tpu.memory_space<vmem>>, vector<1x8x8xbf16>
    %314 = vector.shape_cast %313 : vector<1x8x8xbf16> to vector<8x8xbf16>
    %c16_502 = arith.constant 16 : index
    %c8_503 = arith.constant 8 : index
    %315 = vector.load %arg11[%c16_502, %c8_503] : memref<72x64xbf16, #tpu.memory_space<vmem>>, vector<8x8xbf16>
    tpu.vector_store %arg11[%c16_502, %c8_503], %314 {strides = array<i32>} : memref<72x64xbf16, #tpu.memory_space<vmem>>, vector<8x8xbf16>,
    %c0_504 = arith.constant 0 : index
    %c0_505 = arith.constant 0 : index
    %c22 = arith.constant 22 : index
    %316 = vector.load %arg12[%c0_504, %c0_505, %c22] : memref<1x8x100xbf16, #tpu.memory_space<vmem>>, vector<1x8x8xbf16>
    %317 = vector.shape_cast %316 : vector<1x8x8xbf16> to vector<8x8xbf16>
    %c16_506 = arith.constant 16 : index
    %c16_507 = arith.constant 16 : index
    %318 = vector.load %arg11[%c16_506, %c16_507] : memref<72x64xbf16, #tpu.memory_space<vmem>>, vector<8x8xbf16>
    tpu.vector_store %arg11[%c16_506, %c16_507], %317 {strides = array<i32>} : memref<72x64xbf16, #tpu.memory_space<vmem>>, vector<8x8xbf16>,
    %c0_508 = arith.constant 0 : index
    %c0_509 = arith.constant 0 : index
    %c32_510 = arith.constant 32 : index
    %319 = vector.load %arg12[%c0_508, %c0_509, %c32_510] : memref<1x8x100xbf16, #tpu.memory_space<vmem>>, vector<1x8x8xbf16>
    %320 = vector.shape_cast %319 : vector<1x8x8xbf16> to vector<8x8xbf16>
    %c16_511 = arith.constant 16 : index
    %c24_512 = arith.constant 24 : index
    %321 = vector.load %arg11[%c16_511, %c24_512] : memref<72x64xbf16, #tpu.memory_space<vmem>>, vector<8x8xbf16>
    tpu.vector_store %arg11[%c16_511, %c24_512], %320 {strides = array<i32>} : memref<72x64xbf16, #tpu.memory_space<vmem>>, vector<8x8xbf16>,
    %c0_513 = arith.constant 0 : index
    %c0_514 = arith.constant 0 : index
    %c42 = arith.constant 42 : index
    %322 = vector.load %arg12[%c0_513, %c0_514, %c42] : memref<1x8x100xbf16, #tpu.memory_space<vmem>>, vector<1x8x8xbf16>
    %323 = vector.shape_cast %322 : vector<1x8x8xbf16> to vector<8x8xbf16>
    %c16_515 = arith.constant 16 : index
    %c32_516 = arith.constant 32 : index
    %324 = vector.load %arg11[%c16_515, %c32_516] : memref<72x64xbf16, #tpu.memory_space<vmem>>, vector<8x8xbf16>
    tpu.vector_store %arg11[%c16_515, %c32_516], %323 {strides = array<i32>} : memref<72x64xbf16, #tpu.memory_space<vmem>>, vector<8x8xbf16>,
    %c0_517 = arith.constant 0 : index
    %c0_518 = arith.constant 0 : index
    %c52 = arith.constant 52 : index
    %325 = vector.load %arg12[%c0_517, %c0_518, %c52] : memref<1x8x100xbf16, #tpu.memory_space<vmem>>, vector<1x8x8xbf16>
    %326 = vector.shape_cast %325 : vector<1x8x8xbf16> to vector<8x8xbf16>
    %c16_519 = arith.constant 16 : index
    %c40_520 = arith.constant 40 : index
    %327 = vector.load %arg11[%c16_519, %c40_520] : memref<72x64xbf16, #tpu.memory_space<vmem>>, vector<8x8xbf16>
    tpu.vector_store %arg11[%c16_519, %c40_520], %326 {strides = array<i32>} : memref<72x64xbf16, #tpu.memory_space<vmem>>, vector<8x8xbf16>,
    %c0_521 = arith.constant 0 : index
    %c0_522 = arith.constant 0 : index
    %c62 = arith.constant 62 : index
    %328 = vector.load %arg12[%c0_521, %c0_522, %c62] : memref<1x8x100xbf16, #tpu.memory_space<vmem>>, vector<1x8x8xbf16>
    %329 = vector.shape_cast %328 : vector<1x8x8xbf16> to vector<8x8xbf16>
    %c16_523 = arith.constant 16 : index
    %c48_524 = arith.constant 48 : index
    %330 = vector.load %arg11[%c16_523, %c48_524] : memref<72x64xbf16, #tpu.memory_space<vmem>>, vector<8x8xbf16>
    tpu.vector_store %arg11[%c16_523, %c48_524], %329 {strides = array<i32>} : memref<72x64xbf16, #tpu.memory_space<vmem>>, vector<8x8xbf16>,
    %c0_525 = arith.constant 0 : index
    %c0_526 = arith.constant 0 : index
    %c72_527 = arith.constant 72 : index
    %331 = vector.load %arg12[%c0_525, %c0_526, %c72_527] : memref<1x8x100xbf16, #tpu.memory_space<vmem>>, vector<1x8x8xbf16>
    %332 = vector.shape_cast %331 : vector<1x8x8xbf16> to vector<8x8xbf16>
    %c16_528 = arith.constant 16 : index
    %c56_529 = arith.constant 56 : index
    %333 = vector.load %arg11[%c16_528, %c56_529] : memref<72x64xbf16, #tpu.memory_space<vmem>>, vector<8x8xbf16>
    tpu.vector_store %arg11[%c16_528, %c56_529], %332 {strides = array<i32>} : memref<72x64xbf16, #tpu.memory_space<vmem>>, vector<8x8xbf16>,
    %c0_530 = arith.constant 0 : index
    %c0_531 = arith.constant 0 : index
    %c10_532 = arith.constant 10 : index
    %334 = vector.load %arg12[%c0_530, %c0_531, %c10_532] : memref<1x8x100xbf16, #tpu.memory_space<vmem>>, vector<1x8x8xbf16>
    %335 = vector.shape_cast %334 : vector<1x8x8xbf16> to vector<8x8xbf16>
    %c24_533 = arith.constant 24 : index
    %c0_534 = arith.constant 0 : index
    %336 = vector.load %arg11[%c24_533, %c0_534] : memref<72x64xbf16, #tpu.memory_space<vmem>>, vector<8x8xbf16>
    tpu.vector_store %arg11[%c24_533, %c0_534], %335 {strides = array<i32>} : memref<72x64xbf16, #tpu.memory_space<vmem>>, vector<8x8xbf16>,
    %c0_535 = arith.constant 0 : index
    %c0_536 = arith.constant 0 : index
    %c20_537 = arith.constant 20 : index
    %337 = vector.load %arg12[%c0_535, %c0_536, %c20_537] : memref<1x8x100xbf16, #tpu.memory_space<vmem>>, vector<1x8x8xbf16>
    %338 = vector.shape_cast %337 : vector<1x8x8xbf16> to vector<8x8xbf16>
    %c24_538 = arith.constant 24 : index
    %c8_539 = arith.constant 8 : index
    %339 = vector.load %arg11[%c24_538, %c8_539] : memref<72x64xbf16, #tpu.memory_space<vmem>>, vector<8x8xbf16>
    tpu.vector_store %arg11[%c24_538, %c8_539], %338 {strides = array<i32>} : memref<72x64xbf16, #tpu.memory_space<vmem>>, vector<8x8xbf16>,
    %c0_540 = arith.constant 0 : index
    %c0_541 = arith.constant 0 : index
    %c30_542 = arith.constant 30 : index
    %340 = vector.load %arg12[%c0_540, %c0_541, %c30_542] : memref<1x8x100xbf16, #tpu.memory_space<vmem>>, vector<1x8x8xbf16>
    %341 = vector.shape_cast %340 : vector<1x8x8xbf16> to vector<8x8xbf16>
    %c24_543 = arith.constant 24 : index
    %c16_544 = arith.constant 16 : index
    %342 = vector.load %arg11[%c24_543, %c16_544] : memref<72x64xbf16, #tpu.memory_space<vmem>>, vector<8x8xbf16>
    tpu.vector_store %arg11[%c24_543, %c16_544], %341 {strides = array<i32>} : memref<72x64xbf16, #tpu.memory_space<vmem>>, vector<8x8xbf16>,
    %c0_545 = arith.constant 0 : index
    %c0_546 = arith.constant 0 : index
    %c40_547 = arith.constant 40 : index
    %343 = vector.load %arg12[%c0_545, %c0_546, %c40_547] : memref<1x8x100xbf16, #tpu.memory_space<vmem>>, vector<1x8x8xbf16>
    %344 = vector.shape_cast %343 : vector<1x8x8xbf16> to vector<8x8xbf16>
    %c24_548 = arith.constant 24 : index
    %c24_549 = arith.constant 24 : index
    %345 = vector.load %arg11[%c24_548, %c24_549] : memref<72x64xbf16, #tpu.memory_space<vmem>>, vector<8x8xbf16>
    tpu.vector_store %arg11[%c24_548, %c24_549], %344 {strides = array<i32>} : memref<72x64xbf16, #tpu.memory_space<vmem>>, vector<8x8xbf16>,
    %c0_550 = arith.constant 0 : index
    %c0_551 = arith.constant 0 : index
    %c50_552 = arith.constant 50 : index
    %346 = vector.load %arg12[%c0_550, %c0_551, %c50_552] : memref<1x8x100xbf16, #tpu.memory_space<vmem>>, vector<1x8x8xbf16>
    %347 = vector.shape_cast %346 : vector<1x8x8xbf16> to vector<8x8xbf16>
    %c24_553 = arith.constant 24 : index
    %c32_554 = arith.constant 32 : index
    %348 = vector.load %arg11[%c24_553, %c32_554] : memref<72x64xbf16, #tpu.memory_space<vmem>>, vector<8x8xbf16>
    tpu.vector_store %arg11[%c24_553, %c32_554], %347 {strides = array<i32>} : memref<72x64xbf16, #tpu.memory_space<vmem>>, vector<8x8xbf16>,
    %c0_555 = arith.constant 0 : index
    %c0_556 = arith.constant 0 : index
    %c60_557 = arith.constant 60 : index
    %349 = vector.load %arg12[%c0_555, %c0_556, %c60_557] : memref<1x8x100xbf16, #tpu.memory_space<vmem>>, vector<1x8x8xbf16>
    %350 = vector.shape_cast %349 : vector<1x8x8xbf16> to vector<8x8xbf16>
    %c24_558 = arith.constant 24 : index
    %c40_559 = arith.constant 40 : index
    %351 = vector.load %arg11[%c24_558, %c40_559] : memref<72x64xbf16, #tpu.memory_space<vmem>>, vector<8x8xbf16>
    tpu.vector_store %arg11[%c24_558, %c40_559], %350 {strides = array<i32>} : memref<72x64xbf16, #tpu.memory_space<vmem>>, vector<8x8xbf16>,
    %c0_560 = arith.constant 0 : index
    %c0_561 = arith.constant 0 : index
    %c70_562 = arith.constant 70 : index
    %352 = vector.load %arg12[%c0_560, %c0_561, %c70_562] : memref<1x8x100xbf16, #tpu.memory_space<vmem>>, vector<1x8x8xbf16>
    %353 = vector.shape_cast %352 : vector<1x8x8xbf16> to vector<8x8xbf16>
    %c24_563 = arith.constant 24 : index
    %c48_564 = arith.constant 48 : index
    %354 = vector.load %arg11[%c24_563, %c48_564] : memref<72x64xbf16, #tpu.memory_space<vmem>>, vector<8x8xbf16>
    tpu.vector_store %arg11[%c24_563, %c48_564], %353 {strides = array<i32>} : memref<72x64xbf16, #tpu.memory_space<vmem>>, vector<8x8xbf16>,
    %c0_565 = arith.constant 0 : index
    %c0_566 = arith.constant 0 : index
    %c80 = arith.constant 80 : index
    %355 = vector.load %arg12[%c0_565, %c0_566, %c80] : memref<1x8x100xbf16, #tpu.memory_space<vmem>>, vector<1x8x8xbf16>
    %356 = vector.shape_cast %355 : vector<1x8x8xbf16> to vector<8x8xbf16>
    %c24_567 = arith.constant 24 : index
    %c56_568 = arith.constant 56 : index
    %357 = vector.load %arg11[%c24_567, %c56_568] : memref<72x64xbf16, #tpu.memory_space<vmem>>, vector<8x8xbf16>
    tpu.vector_store %arg11[%c24_567, %c56_568], %356 {strides = array<i32>} : memref<72x64xbf16, #tpu.memory_space<vmem>>, vector<8x8xbf16>,
    %c0_569 = arith.constant 0 : index
    %c0_570 = arith.constant 0 : index
    %c11_571 = arith.constant 11 : index
    %358 = vector.load %arg12[%c0_569, %c0_570, %c11_571] : memref<1x8x100xbf16, #tpu.memory_space<vmem>>, vector<1x8x8xbf16>
    %359 = vector.shape_cast %358 : vector<1x8x8xbf16> to vector<8x8xbf16>
    %c32_572 = arith.constant 32 : index
    %c0_573 = arith.constant 0 : index
    %360 = vector.load %arg11[%c32_572, %c0_573] : memref<72x64xbf16, #tpu.memory_space<vmem>>, vector<8x8xbf16>
    tpu.vector_store %arg11[%c32_572, %c0_573], %359 {strides = array<i32>} : memref<72x64xbf16, #tpu.memory_space<vmem>>, vector<8x8xbf16>,
    %c0_574 = arith.constant 0 : index
    %c0_575 = arith.constant 0 : index
    %c21_576 = arith.constant 21 : index
    %361 = vector.load %arg12[%c0_574, %c0_575, %c21_576] : memref<1x8x100xbf16, #tpu.memory_space<vmem>>, vector<1x8x8xbf16>
    %362 = vector.shape_cast %361 : vector<1x8x8xbf16> to vector<8x8xbf16>
    %c32_577 = arith.constant 32 : index
    %c8_578 = arith.constant 8 : index
    %363 = vector.load %arg11[%c32_577, %c8_578] : memref<72x64xbf16, #tpu.memory_space<vmem>>, vector<8x8xbf16>
    tpu.vector_store %arg11[%c32_577, %c8_578], %362 {strides = array<i32>} : memref<72x64xbf16, #tpu.memory_space<vmem>>, vector<8x8xbf16>,
    %c0_579 = arith.constant 0 : index
    %c0_580 = arith.constant 0 : index
    %c31_581 = arith.constant 31 : index
    %364 = vector.load %arg12[%c0_579, %c0_580, %c31_581] : memref<1x8x100xbf16, #tpu.memory_space<vmem>>, vector<1x8x8xbf16>
    %365 = vector.shape_cast %364 : vector<1x8x8xbf16> to vector<8x8xbf16>
    %c32_582 = arith.constant 32 : index
    %c16_583 = arith.constant 16 : index
    %366 = vector.load %arg11[%c32_582, %c16_583] : memref<72x64xbf16, #tpu.memory_space<vmem>>, vector<8x8xbf16>
    tpu.vector_store %arg11[%c32_582, %c16_583], %365 {strides = array<i32>} : memref<72x64xbf16, #tpu.memory_space<vmem>>, vector<8x8xbf16>,
    %c0_584 = arith.constant 0 : index
    %c0_585 = arith.constant 0 : index
    %c41_586 = arith.constant 41 : index
    %367 = vector.load %arg12[%c0_584, %c0_585, %c41_586] : memref<1x8x100xbf16, #tpu.memory_space<vmem>>, vector<1x8x8xbf16>
    %368 = vector.shape_cast %367 : vector<1x8x8xbf16> to vector<8x8xbf16>
    %c32_587 = arith.constant 32 : index
    %c24_588 = arith.constant 24 : index
    %369 = vector.load %arg11[%c32_587, %c24_588] : memref<72x64xbf16, #tpu.memory_space<vmem>>, vector<8x8xbf16>
    tpu.vector_store %arg11[%c32_587, %c24_588], %368 {strides = array<i32>} : memref<72x64xbf16, #tpu.memory_space<vmem>>, vector<8x8xbf16>,
    %c0_589 = arith.constant 0 : index
    %c0_590 = arith.constant 0 : index
    %c51_591 = arith.constant 51 : index
    %370 = vector.load %arg12[%c0_589, %c0_590, %c51_591] : memref<1x8x100xbf16, #tpu.memory_space<vmem>>, vector<1x8x8xbf16>
    %371 = vector.shape_cast %370 : vector<1x8x8xbf16> to vector<8x8xbf16>
    %c32_592 = arith.constant 32 : index
    %c32_593 = arith.constant 32 : index
    %372 = vector.load %arg11[%c32_592, %c32_593] : memref<72x64xbf16, #tpu.memory_space<vmem>>, vector<8x8xbf16>
    tpu.vector_store %arg11[%c32_592, %c32_593], %371 {strides = array<i32>} : memref<72x64xbf16, #tpu.memory_space<vmem>>, vector<8x8xbf16>,
    %c0_594 = arith.constant 0 : index
    %c0_595 = arith.constant 0 : index
    %c61_596 = arith.constant 61 : index
    %373 = vector.load %arg12[%c0_594, %c0_595, %c61_596] : memref<1x8x100xbf16, #tpu.memory_space<vmem>>, vector<1x8x8xbf16>
    %374 = vector.shape_cast %373 : vector<1x8x8xbf16> to vector<8x8xbf16>
    %c32_597 = arith.constant 32 : index
    %c40_598 = arith.constant 40 : index
    %375 = vector.load %arg11[%c32_597, %c40_598] : memref<72x64xbf16, #tpu.memory_space<vmem>>, vector<8x8xbf16>
    tpu.vector_store %arg11[%c32_597, %c40_598], %374 {strides = array<i32>} : memref<72x64xbf16, #tpu.memory_space<vmem>>, vector<8x8xbf16>,
    %c0_599 = arith.constant 0 : index
    %c0_600 = arith.constant 0 : index
    %c71_601 = arith.constant 71 : index
    %376 = vector.load %arg12[%c0_599, %c0_600, %c71_601] : memref<1x8x100xbf16, #tpu.memory_space<vmem>>, vector<1x8x8xbf16>
    %377 = vector.shape_cast %376 : vector<1x8x8xbf16> to vector<8x8xbf16>
    %c32_602 = arith.constant 32 : index
    %c48_603 = arith.constant 48 : index
    %378 = vector.load %arg11[%c32_602, %c48_603] : memref<72x64xbf16, #tpu.memory_space<vmem>>, vector<8x8xbf16>
    tpu.vector_store %arg11[%c32_602, %c48_603], %377 {strides = array<i32>} : memref<72x64xbf16, #tpu.memory_space<vmem>>, vector<8x8xbf16>,
    %c0_604 = arith.constant 0 : index
    %c0_605 = arith.constant 0 : index
    %c81_606 = arith.constant 81 : index
    %379 = vector.load %arg12[%c0_604, %c0_605, %c81_606] : memref<1x8x100xbf16, #tpu.memory_space<vmem>>, vector<1x8x8xbf16>
    %380 = vector.shape_cast %379 : vector<1x8x8xbf16> to vector<8x8xbf16>
    %c32_607 = arith.constant 32 : index
    %c56_608 = arith.constant 56 : index
    %381 = vector.load %arg11[%c32_607, %c56_608] : memref<72x64xbf16, #tpu.memory_space<vmem>>, vector<8x8xbf16>
    tpu.vector_store %arg11[%c32_607, %c56_608], %380 {strides = array<i32>} : memref<72x64xbf16, #tpu.memory_space<vmem>>, vector<8x8xbf16>,
    %c0_609 = arith.constant 0 : index
    %c0_610 = arith.constant 0 : index
    %c12_611 = arith.constant 12 : index
    %382 = vector.load %arg12[%c0_609, %c0_610, %c12_611] : memref<1x8x100xbf16, #tpu.memory_space<vmem>>, vector<1x8x8xbf16>
    %383 = vector.shape_cast %382 : vector<1x8x8xbf16> to vector<8x8xbf16>
    %c40_612 = arith.constant 40 : index
    %c0_613 = arith.constant 0 : index
    %384 = vector.load %arg11[%c40_612, %c0_613] : memref<72x64xbf16, #tpu.memory_space<vmem>>, vector<8x8xbf16>
    tpu.vector_store %arg11[%c40_612, %c0_613], %383 {strides = array<i32>} : memref<72x64xbf16, #tpu.memory_space<vmem>>, vector<8x8xbf16>,
    %c0_614 = arith.constant 0 : index
    %c0_615 = arith.constant 0 : index
    %c22_616 = arith.constant 22 : index
    %385 = vector.load %arg12[%c0_614, %c0_615, %c22_616] : memref<1x8x100xbf16, #tpu.memory_space<vmem>>, vector<1x8x8xbf16>
    %386 = vector.shape_cast %385 : vector<1x8x8xbf16> to vector<8x8xbf16>
    %c40_617 = arith.constant 40 : index
    %c8_618 = arith.constant 8 : index
    %387 = vector.load %arg11[%c40_617, %c8_618] : memref<72x64xbf16, #tpu.memory_space<vmem>>, vector<8x8xbf16>
    tpu.vector_store %arg11[%c40_617, %c8_618], %386 {strides = array<i32>} : memref<72x64xbf16, #tpu.memory_space<vmem>>, vector<8x8xbf16>,
    %c0_619 = arith.constant 0 : index
    %c0_620 = arith.constant 0 : index
    %c32_621 = arith.constant 32 : index
    %388 = vector.load %arg12[%c0_619, %c0_620, %c32_621] : memref<1x8x100xbf16, #tpu.memory_space<vmem>>, vector<1x8x8xbf16>
    %389 = vector.shape_cast %388 : vector<1x8x8xbf16> to vector<8x8xbf16>
    %c40_622 = arith.constant 40 : index
    %c16_623 = arith.constant 16 : index
    %390 = vector.load %arg11[%c40_622, %c16_623] : memref<72x64xbf16, #tpu.memory_space<vmem>>, vector<8x8xbf16>
    tpu.vector_store %arg11[%c40_622, %c16_623], %389 {strides = array<i32>} : memref<72x64xbf16, #tpu.memory_space<vmem>>, vector<8x8xbf16>,
    %c0_624 = arith.constant 0 : index
    %c0_625 = arith.constant 0 : index
    %c42_626 = arith.constant 42 : index
    %391 = vector.load %arg12[%c0_624, %c0_625, %c42_626] : memref<1x8x100xbf16, #tpu.memory_space<vmem>>, vector<1x8x8xbf16>
    %392 = vector.shape_cast %391 : vector<1x8x8xbf16> to vector<8x8xbf16>
    %c40_627 = arith.constant 40 : index
    %c24_628 = arith.constant 24 : index
    %393 = vector.load %arg11[%c40_627, %c24_628] : memref<72x64xbf16, #tpu.memory_space<vmem>>, vector<8x8xbf16>
    tpu.vector_store %arg11[%c40_627, %c24_628], %392 {strides = array<i32>} : memref<72x64xbf16, #tpu.memory_space<vmem>>, vector<8x8xbf16>,
    %c0_629 = arith.constant 0 : index
    %c0_630 = arith.constant 0 : index
    %c52_631 = arith.constant 52 : index
    %394 = vector.load %arg12[%c0_629, %c0_630, %c52_631] : memref<1x8x100xbf16, #tpu.memory_space<vmem>>, vector<1x8x8xbf16>
    %395 = vector.shape_cast %394 : vector<1x8x8xbf16> to vector<8x8xbf16>
    %c40_632 = arith.constant 40 : index
    %c32_633 = arith.constant 32 : index
    %396 = vector.load %arg11[%c40_632, %c32_633] : memref<72x64xbf16, #tpu.memory_space<vmem>>, vector<8x8xbf16>
    tpu.vector_store %arg11[%c40_632, %c32_633], %395 {strides = array<i32>} : memref<72x64xbf16, #tpu.memory_space<vmem>>, vector<8x8xbf16>,
    %c0_634 = arith.constant 0 : index
    %c0_635 = arith.constant 0 : index
    %c62_636 = arith.constant 62 : index
    %397 = vector.load %arg12[%c0_634, %c0_635, %c62_636] : memref<1x8x100xbf16, #tpu.memory_space<vmem>>, vector<1x8x8xbf16>
    %398 = vector.shape_cast %397 : vector<1x8x8xbf16> to vector<8x8xbf16>
    %c40_637 = arith.constant 40 : index
    %c40_638 = arith.constant 40 : index
    %399 = vector.load %arg11[%c40_637, %c40_638] : memref<72x64xbf16, #tpu.memory_space<vmem>>, vector<8x8xbf16>
    tpu.vector_store %arg11[%c40_637, %c40_638], %398 {strides = array<i32>} : memref<72x64xbf16, #tpu.memory_space<vmem>>, vector<8x8xbf16>,
    %c0_639 = arith.constant 0 : index
    %c0_640 = arith.constant 0 : index
    %c72_641 = arith.constant 72 : index
    %400 = vector.load %arg12[%c0_639, %c0_640, %c72_641] : memref<1x8x100xbf16, #tpu.memory_space<vmem>>, vector<1x8x8xbf16>
    %401 = vector.shape_cast %400 : vector<1x8x8xbf16> to vector<8x8xbf16>
    %c40_642 = arith.constant 40 : index
    %c48_643 = arith.constant 48 : index
    %402 = vector.load %arg11[%c40_642, %c48_643] : memref<72x64xbf16, #tpu.memory_space<vmem>>, vector<8x8xbf16>
    tpu.vector_store %arg11[%c40_642, %c48_643], %401 {strides = array<i32>} : memref<72x64xbf16, #tpu.memory_space<vmem>>, vector<8x8xbf16>,
    %c0_644 = arith.constant 0 : index
    %c0_645 = arith.constant 0 : index
    %c82_646 = arith.constant 82 : index
    %403 = vector.load %arg12[%c0_644, %c0_645, %c82_646] : memref<1x8x100xbf16, #tpu.memory_space<vmem>>, vector<1x8x8xbf16>
    %404 = vector.shape_cast %403 : vector<1x8x8xbf16> to vector<8x8xbf16>
    %c40_647 = arith.constant 40 : index
    %c56_648 = arith.constant 56 : index
    %405 = vector.load %arg11[%c40_647, %c56_648] : memref<72x64xbf16, #tpu.memory_space<vmem>>, vector<8x8xbf16>
    tpu.vector_store %arg11[%c40_647, %c56_648], %404 {strides = array<i32>} : memref<72x64xbf16, #tpu.memory_space<vmem>>, vector<8x8xbf16>,
    %c0_649 = arith.constant 0 : index
    %c0_650 = arith.constant 0 : index
    %c20_651 = arith.constant 20 : index
    %406 = vector.load %arg12[%c0_649, %c0_650, %c20_651] : memref<1x8x100xbf16, #tpu.memory_space<vmem>>, vector<1x8x8xbf16>
    %407 = vector.shape_cast %406 : vector<1x8x8xbf16> to vector<8x8xbf16>
    %c48_652 = arith.constant 48 : index
    %c0_653 = arith.constant 0 : index
    %408 = vector.load %arg11[%c48_652, %c0_653] : memref<72x64xbf16, #tpu.memory_space<vmem>>, vector<8x8xbf16>
    tpu.vector_store %arg11[%c48_652, %c0_653], %407 {strides = array<i32>} : memref<72x64xbf16, #tpu.memory_space<vmem>>, vector<8x8xbf16>,
    %c0_654 = arith.constant 0 : index
    %c0_655 = arith.constant 0 : index
    %c30_656 = arith.constant 30 : index
    %409 = vector.load %arg12[%c0_654, %c0_655, %c30_656] : memref<1x8x100xbf16, #tpu.memory_space<vmem>>, vector<1x8x8xbf16>
    %410 = vector.shape_cast %409 : vector<1x8x8xbf16> to vector<8x8xbf16>
    %c48_657 = arith.constant 48 : index
    %c8_658 = arith.constant 8 : index
    %411 = vector.load %arg11[%c48_657, %c8_658] : memref<72x64xbf16, #tpu.memory_space<vmem>>, vector<8x8xbf16>
    tpu.vector_store %arg11[%c48_657, %c8_658], %410 {strides = array<i32>} : memref<72x64xbf16, #tpu.memory_space<vmem>>, vector<8x8xbf16>,
    %c0_659 = arith.constant 0 : index
    %c0_660 = arith.constant 0 : index
    %c40_661 = arith.constant 40 : index
    %412 = vector.load %arg12[%c0_659, %c0_660, %c40_661] : memref<1x8x100xbf16, #tpu.memory_space<vmem>>, vector<1x8x8xbf16>
    %413 = vector.shape_cast %412 : vector<1x8x8xbf16> to vector<8x8xbf16>
    %c48_662 = arith.constant 48 : index
    %c16_663 = arith.constant 16 : index
    %414 = vector.load %arg11[%c48_662, %c16_663] : memref<72x64xbf16, #tpu.memory_space<vmem>>, vector<8x8xbf16>
    tpu.vector_store %arg11[%c48_662, %c16_663], %413 {strides = array<i32>} : memref<72x64xbf16, #tpu.memory_space<vmem>>, vector<8x8xbf16>,
    %c0_664 = arith.constant 0 : index
    %c0_665 = arith.constant 0 : index
    %c50_666 = arith.constant 50 : index
    %415 = vector.load %arg12[%c0_664, %c0_665, %c50_666] : memref<1x8x100xbf16, #tpu.memory_space<vmem>>, vector<1x8x8xbf16>
    %416 = vector.shape_cast %415 : vector<1x8x8xbf16> to vector<8x8xbf16>
    %c48_667 = arith.constant 48 : index
    %c24_668 = arith.constant 24 : index
    %417 = vector.load %arg11[%c48_667, %c24_668] : memref<72x64xbf16, #tpu.memory_space<vmem>>, vector<8x8xbf16>
    tpu.vector_store %arg11[%c48_667, %c24_668], %416 {strides = array<i32>} : memref<72x64xbf16, #tpu.memory_space<vmem>>, vector<8x8xbf16>,
    %c0_669 = arith.constant 0 : index
    %c0_670 = arith.constant 0 : index
    %c60_671 = arith.constant 60 : index
    %418 = vector.load %arg12[%c0_669, %c0_670, %c60_671] : memref<1x8x100xbf16, #tpu.memory_space<vmem>>, vector<1x8x8xbf16>
    %419 = vector.shape_cast %418 : vector<1x8x8xbf16> to vector<8x8xbf16>
    %c48_672 = arith.constant 48 : index
    %c32_673 = arith.constant 32 : index
    %420 = vector.load %arg11[%c48_672, %c32_673] : memref<72x64xbf16, #tpu.memory_space<vmem>>, vector<8x8xbf16>
    tpu.vector_store %arg11[%c48_672, %c32_673], %419 {strides = array<i32>} : memref<72x64xbf16, #tpu.memory_space<vmem>>, vector<8x8xbf16>,
    %c0_674 = arith.constant 0 : index
    %c0_675 = arith.constant 0 : index
    %c70_676 = arith.constant 70 : index
    %421 = vector.load %arg12[%c0_674, %c0_675, %c70_676] : memref<1x8x100xbf16, #tpu.memory_space<vmem>>, vector<1x8x8xbf16>
    %422 = vector.shape_cast %421 : vector<1x8x8xbf16> to vector<8x8xbf16>
    %c48_677 = arith.constant 48 : index
    %c40_678 = arith.constant 40 : index
    %423 = vector.load %arg11[%c48_677, %c40_678] : memref<72x64xbf16, #tpu.memory_space<vmem>>, vector<8x8xbf16>
    tpu.vector_store %arg11[%c48_677, %c40_678], %422 {strides = array<i32>} : memref<72x64xbf16, #tpu.memory_space<vmem>>, vector<8x8xbf16>,
    %c0_679 = arith.constant 0 : index
    %c0_680 = arith.constant 0 : index
    %c80_681 = arith.constant 80 : index
    %424 = vector.load %arg12[%c0_679, %c0_680, %c80_681] : memref<1x8x100xbf16, #tpu.memory_space<vmem>>, vector<1x8x8xbf16>
    %425 = vector.shape_cast %424 : vector<1x8x8xbf16> to vector<8x8xbf16>
    %c48_682 = arith.constant 48 : index
    %c48_683 = arith.constant 48 : index
    %426 = vector.load %arg11[%c48_682, %c48_683] : memref<72x64xbf16, #tpu.memory_space<vmem>>, vector<8x8xbf16>
    tpu.vector_store %arg11[%c48_682, %c48_683], %425 {strides = array<i32>} : memref<72x64xbf16, #tpu.memory_space<vmem>>, vector<8x8xbf16>,
    %c0_684 = arith.constant 0 : index
    %c0_685 = arith.constant 0 : index
    %c90_686 = arith.constant 90 : index
    %427 = vector.load %arg12[%c0_684, %c0_685, %c90_686] : memref<1x8x100xbf16, #tpu.memory_space<vmem>>, vector<1x8x8xbf16>
    %428 = vector.shape_cast %427 : vector<1x8x8xbf16> to vector<8x8xbf16>
    %c48_687 = arith.constant 48 : index
    %c56_688 = arith.constant 56 : index
    %429 = vector.load %arg11[%c48_687, %c56_688] : memref<72x64xbf16, #tpu.memory_space<vmem>>, vector<8x8xbf16>
    tpu.vector_store %arg11[%c48_687, %c56_688], %428 {strides = array<i32>} : memref<72x64xbf16, #tpu.memory_space<vmem>>, vector<8x8xbf16>,
    %c0_689 = arith.constant 0 : index
    %c0_690 = arith.constant 0 : index
    %c21_691 = arith.constant 21 : index
    %430 = vector.load %arg12[%c0_689, %c0_690, %c21_691] : memref<1x8x100xbf16, #tpu.memory_space<vmem>>, vector<1x8x8xbf16>
    %431 = vector.shape_cast %430 : vector<1x8x8xbf16> to vector<8x8xbf16>
    %c56_692 = arith.constant 56 : index
    %c0_693 = arith.constant 0 : index
    %432 = vector.load %arg11[%c56_692, %c0_693] : memref<72x64xbf16, #tpu.memory_space<vmem>>, vector<8x8xbf16>
    tpu.vector_store %arg11[%c56_692, %c0_693], %431 {strides = array<i32>} : memref<72x64xbf16, #tpu.memory_space<vmem>>, vector<8x8xbf16>,
    %c0_694 = arith.constant 0 : index
    %c0_695 = arith.constant 0 : index
    %c31_696 = arith.constant 31 : index
    %433 = vector.load %arg12[%c0_694, %c0_695, %c31_696] : memref<1x8x100xbf16, #tpu.memory_space<vmem>>, vector<1x8x8xbf16>
    %434 = vector.shape_cast %433 : vector<1x8x8xbf16> to vector<8x8xbf16>
    %c56_697 = arith.constant 56 : index
    %c8_698 = arith.constant 8 : index
    %435 = vector.load %arg11[%c56_697, %c8_698] : memref<72x64xbf16, #tpu.memory_space<vmem>>, vector<8x8xbf16>
    tpu.vector_store %arg11[%c56_697, %c8_698], %434 {strides = array<i32>} : memref<72x64xbf16, #tpu.memory_space<vmem>>, vector<8x8xbf16>,
    %c0_699 = arith.constant 0 : index
    %c0_700 = arith.constant 0 : index
    %c41_701 = arith.constant 41 : index
    %436 = vector.load %arg12[%c0_699, %c0_700, %c41_701] : memref<1x8x100xbf16, #tpu.memory_space<vmem>>, vector<1x8x8xbf16>
    %437 = vector.shape_cast %436 : vector<1x8x8xbf16> to vector<8x8xbf16>
    %c56_702 = arith.constant 56 : index
    %c16_703 = arith.constant 16 : index
    %438 = vector.load %arg11[%c56_702, %c16_703] : memref<72x64xbf16, #tpu.memory_space<vmem>>, vector<8x8xbf16>
    tpu.vector_store %arg11[%c56_702, %c16_703], %437 {strides = array<i32>} : memref<72x64xbf16, #tpu.memory_space<vmem>>, vector<8x8xbf16>,
    %c0_704 = arith.constant 0 : index
    %c0_705 = arith.constant 0 : index
    %c51_706 = arith.constant 51 : index
    %439 = vector.load %arg12[%c0_704, %c0_705, %c51_706] : memref<1x8x100xbf16, #tpu.memory_space<vmem>>, vector<1x8x8xbf16>
    %440 = vector.shape_cast %439 : vector<1x8x8xbf16> to vector<8x8xbf16>
    %c56_707 = arith.constant 56 : index
    %c24_708 = arith.constant 24 : index
    %441 = vector.load %arg11[%c56_707, %c24_708] : memref<72x64xbf16, #tpu.memory_space<vmem>>, vector<8x8xbf16>
    tpu.vector_store %arg11[%c56_707, %c24_708], %440 {strides = array<i32>} : memref<72x64xbf16, #tpu.memory_space<vmem>>, vector<8x8xbf16>,
    %c0_709 = arith.constant 0 : index
    %c0_710 = arith.constant 0 : index
    %c61_711 = arith.constant 61 : index
    %442 = vector.load %arg12[%c0_709, %c0_710, %c61_711] : memref<1x8x100xbf16, #tpu.memory_space<vmem>>, vector<1x8x8xbf16>
    %443 = vector.shape_cast %442 : vector<1x8x8xbf16> to vector<8x8xbf16>
    %c56_712 = arith.constant 56 : index
    %c32_713 = arith.constant 32 : index
    %444 = vector.load %arg11[%c56_712, %c32_713] : memref<72x64xbf16, #tpu.memory_space<vmem>>, vector<8x8xbf16>
    tpu.vector_store %arg11[%c56_712, %c32_713], %443 {strides = array<i32>} : memref<72x64xbf16, #tpu.memory_space<vmem>>, vector<8x8xbf16>,
    %c0_714 = arith.constant 0 : index
    %c0_715 = arith.constant 0 : index
    %c71_716 = arith.constant 71 : index
    %445 = vector.load %arg12[%c0_714, %c0_715, %c71_716] : memref<1x8x100xbf16, #tpu.memory_space<vmem>>, vector<1x8x8xbf16>
    %446 = vector.shape_cast %445 : vector<1x8x8xbf16> to vector<8x8xbf16>
    %c56_717 = arith.constant 56 : index
    %c40_718 = arith.constant 40 : index
    %447 = vector.load %arg11[%c56_717, %c40_718] : memref<72x64xbf16, #tpu.memory_space<vmem>>, vector<8x8xbf16>
    tpu.vector_store %arg11[%c56_717, %c40_718], %446 {strides = array<i32>} : memref<72x64xbf16, #tpu.memory_space<vmem>>, vector<8x8xbf16>,
    %c0_719 = arith.constant 0 : index
    %c0_720 = arith.constant 0 : index
    %c81_721 = arith.constant 81 : index
    %448 = vector.load %arg12[%c0_719, %c0_720, %c81_721] : memref<1x8x100xbf16, #tpu.memory_space<vmem>>, vector<1x8x8xbf16>
    %449 = vector.shape_cast %448 : vector<1x8x8xbf16> to vector<8x8xbf16>
    %c56_722 = arith.constant 56 : index
    %c48_723 = arith.constant 48 : index
    %450 = vector.load %arg11[%c56_722, %c48_723] : memref<72x64xbf16, #tpu.memory_space<vmem>>, vector<8x8xbf16>
    tpu.vector_store %arg11[%c56_722, %c48_723], %449 {strides = array<i32>} : memref<72x64xbf16, #tpu.memory_space<vmem>>, vector<8x8xbf16>,
    %c0_724 = arith.constant 0 : index
    %c0_725 = arith.constant 0 : index
    %c91_726 = arith.constant 91 : index
    %451 = vector.load %arg12[%c0_724, %c0_725, %c91_726] : memref<1x8x100xbf16, #tpu.memory_space<vmem>>, vector<1x8x8xbf16>
    %452 = vector.shape_cast %451 : vector<1x8x8xbf16> to vector<8x8xbf16>
    %c56_727 = arith.constant 56 : index
    %c56_728 = arith.constant 56 : index
    %453 = vector.load %arg11[%c56_727, %c56_728] : memref<72x64xbf16, #tpu.memory_space<vmem>>, vector<8x8xbf16>
    tpu.vector_store %arg11[%c56_727, %c56_728], %452 {strides = array<i32>} : memref<72x64xbf16, #tpu.memory_space<vmem>>, vector<8x8xbf16>,
    %c0_729 = arith.constant 0 : index
    %c0_730 = arith.constant 0 : index
    %c22_731 = arith.constant 22 : index
    %454 = vector.load %arg12[%c0_729, %c0_730, %c22_731] : memref<1x8x100xbf16, #tpu.memory_space<vmem>>, vector<1x8x8xbf16>
    %455 = vector.shape_cast %454 : vector<1x8x8xbf16> to vector<8x8xbf16>
    %c64_732 = arith.constant 64 : index
    %c0_733 = arith.constant 0 : index
    %456 = vector.load %arg11[%c64_732, %c0_733] : memref<72x64xbf16, #tpu.memory_space<vmem>>, vector<8x8xbf16>
    tpu.vector_store %arg11[%c64_732, %c0_733], %455 {strides = array<i32>} : memref<72x64xbf16, #tpu.memory_space<vmem>>, vector<8x8xbf16>,
    %c0_734 = arith.constant 0 : index
    %c0_735 = arith.constant 0 : index
    %c32_736 = arith.constant 32 : index
    %457 = vector.load %arg12[%c0_734, %c0_735, %c32_736] : memref<1x8x100xbf16, #tpu.memory_space<vmem>>, vector<1x8x8xbf16>
    %458 = vector.shape_cast %457 : vector<1x8x8xbf16> to vector<8x8xbf16>
    %c64_737 = arith.constant 64 : index
    %c8_738 = arith.constant 8 : index
    %459 = vector.load %arg11[%c64_737, %c8_738] : memref<72x64xbf16, #tpu.memory_space<vmem>>, vector<8x8xbf16>
    tpu.vector_store %arg11[%c64_737, %c8_738], %458 {strides = array<i32>} : memref<72x64xbf16, #tpu.memory_space<vmem>>, vector<8x8xbf16>,
    %c0_739 = arith.constant 0 : index
    %c0_740 = arith.constant 0 : index
    %c42_741 = arith.constant 42 : index
    %460 = vector.load %arg12[%c0_739, %c0_740, %c42_741] : memref<1x8x100xbf16, #tpu.memory_space<vmem>>, vector<1x8x8xbf16>
    %461 = vector.shape_cast %460 : vector<1x8x8xbf16> to vector<8x8xbf16>
    %c64_742 = arith.constant 64 : index
    %c16_743 = arith.constant 16 : index
    %462 = vector.load %arg11[%c64_742, %c16_743] : memref<72x64xbf16, #tpu.memory_space<vmem>>, vector<8x8xbf16>
    tpu.vector_store %arg11[%c64_742, %c16_743], %461 {strides = array<i32>} : memref<72x64xbf16, #tpu.memory_space<vmem>>, vector<8x8xbf16>,
    %c0_744 = arith.constant 0 : index
    %c0_745 = arith.constant 0 : index
    %c52_746 = arith.constant 52 : index
    %463 = vector.load %arg12[%c0_744, %c0_745, %c52_746] : memref<1x8x100xbf16, #tpu.memory_space<vmem>>, vector<1x8x8xbf16>
    %464 = vector.shape_cast %463 : vector<1x8x8xbf16> to vector<8x8xbf16>
    %c64_747 = arith.constant 64 : index
    %c24_748 = arith.constant 24 : index
    %465 = vector.load %arg11[%c64_747, %c24_748] : memref<72x64xbf16, #tpu.memory_space<vmem>>, vector<8x8xbf16>
    tpu.vector_store %arg11[%c64_747, %c24_748], %464 {strides = array<i32>} : memref<72x64xbf16, #tpu.memory_space<vmem>>, vector<8x8xbf16>,
    %c0_749 = arith.constant 0 : index
    %c0_750 = arith.constant 0 : index
    %c62_751 = arith.constant 62 : index
    %466 = vector.load %arg12[%c0_749, %c0_750, %c62_751] : memref<1x8x100xbf16, #tpu.memory_space<vmem>>, vector<1x8x8xbf16>
    %467 = vector.shape_cast %466 : vector<1x8x8xbf16> to vector<8x8xbf16>
    %c64_752 = arith.constant 64 : index
    %c32_753 = arith.constant 32 : index
    %468 = vector.load %arg11[%c64_752, %c32_753] : memref<72x64xbf16, #tpu.memory_space<vmem>>, vector<8x8xbf16>
    tpu.vector_store %arg11[%c64_752, %c32_753], %467 {strides = array<i32>} : memref<72x64xbf16, #tpu.memory_space<vmem>>, vector<8x8xbf16>,
    %c0_754 = arith.constant 0 : index
    %c0_755 = arith.constant 0 : index
    %c72_756 = arith.constant 72 : index
    %469 = vector.load %arg12[%c0_754, %c0_755, %c72_756] : memref<1x8x100xbf16, #tpu.memory_space<vmem>>, vector<1x8x8xbf16>
    %470 = vector.shape_cast %469 : vector<1x8x8xbf16> to vector<8x8xbf16>
    %c64_757 = arith.constant 64 : index
    %c40_758 = arith.constant 40 : index
    %471 = vector.load %arg11[%c64_757, %c40_758] : memref<72x64xbf16, #tpu.memory_space<vmem>>, vector<8x8xbf16>
    tpu.vector_store %arg11[%c64_757, %c40_758], %470 {strides = array<i32>} : memref<72x64xbf16, #tpu.memory_space<vmem>>, vector<8x8xbf16>,
    %c0_759 = arith.constant 0 : index
    %c0_760 = arith.constant 0 : index
    %c82_761 = arith.constant 82 : index
    %472 = vector.load %arg12[%c0_759, %c0_760, %c82_761] : memref<1x8x100xbf16, #tpu.memory_space<vmem>>, vector<1x8x8xbf16>
    %473 = vector.shape_cast %472 : vector<1x8x8xbf16> to vector<8x8xbf16>
    %c64_762 = arith.constant 64 : index
    %c48_763 = arith.constant 48 : index
    %474 = vector.load %arg11[%c64_762, %c48_763] : memref<72x64xbf16, #tpu.memory_space<vmem>>, vector<8x8xbf16>
    tpu.vector_store %arg11[%c64_762, %c48_763], %473 {strides = array<i32>} : memref<72x64xbf16, #tpu.memory_space<vmem>>, vector<8x8xbf16>,
    %c0_764 = arith.constant 0 : index
    %c0_765 = arith.constant 0 : index
    %c92 = arith.constant 92 : index
    %475 = vector.load %arg12[%c0_764, %c0_765, %c92] : memref<1x8x100xbf16, #tpu.memory_space<vmem>>, vector<1x8x8xbf16>
    %476 = vector.shape_cast %475 : vector<1x8x8xbf16> to vector<8x8xbf16>
    %c64_766 = arith.constant 64 : index
    %c56_767 = arith.constant 56 : index
    %477 = vector.load %arg11[%c64_766, %c56_767] : memref<72x64xbf16, #tpu.memory_space<vmem>>, vector<8x8xbf16>
    tpu.vector_store %arg11[%c64_766, %c56_767], %476 {strides = array<i32>} : memref<72x64xbf16, #tpu.memory_space<vmem>>, vector<8x8xbf16>,
    %c0_768 = arith.constant 0 : index
    %c0_769 = arith.constant 0 : index
    %478 = vector.load %arg5[%c0_768, %c0_769] : memref<8x72xbf16, #tpu.memory_space<vmem>>, vector<8x72xbf16>
    %c0_770 = arith.constant 0 : index
    %c0_771 = arith.constant 0 : index
    %479 = vector.load %arg11[%c0_770, %c0_771] : memref<72x64xbf16, #tpu.memory_space<vmem>>, vector<72x64xbf16>
    %cst_772 = arith.constant dense<0.000000e+00> : vector<8x64xf32>
    %480 = tpu.matmul %478, %479, %cst_772 {dimension_numbers = #tpu.dot_dimension_numbers<[1], [0], [0], [1], [0, 0, 1, 1], [], []>} : vector<8x72xbf16>, vector<72x64xbf16>, vector<8x64xf32> -> vector<8x64xf32>
    %c0_773 = arith.constant 0 : index
    %c0_774 = arith.constant 0 : index
    %481 = vector.load %arg6[%c0_773, %c0_774] : memref<8x1xf32, #tpu.memory_space<vmem>>, vector<8x1xf32>
    %482 = vector.broadcast %481 : vector<8x1xf32> to vector<8x64xf32>
    %483 = arith.mulf %480, %482 : vector<8x64xf32>
    %c0_775 = arith.constant 0 : index
    %c0_776 = arith.constant 0 : index
    %484 = vector.load %arg7[%c0_775, %c0_776] : memref<8x1xf32, #tpu.memory_space<vmem>>, vector<8x1xf32>
    %485 = vector.broadcast %484 : vector<8x1xf32> to vector<8x64xf32>
    %486 = arith.addf %483, %485 : vector<8x64xf32>
    %c0_777 = arith.constant 0 : index
    %c0_778 = arith.constant 0 : index
    %c0_779 = arith.constant 0 : index
    %487 = vector.load %arg8[%c0_777, %c0_778, %c0_779] : memref<1x4x64xf32, #tpu.memory_space<vmem>>, vector<1x4x64xf32>
    %488 = vector.shape_cast %487 : vector<1x4x64xf32> to vector<4x64xf32>
    %489 = vector.extract_strided_slice %486 {offsets = [0, 0], sizes = [2, 64], strides = [1, 1]} : vector<8x64xf32> to vector<2x64xf32>
    %490 = vector.extract_strided_slice %486 {offsets = [2, 0], sizes = [4, 64], strides = [1, 1]} : vector<8x64xf32> to vector<4x64xf32>
    %491 = arith.addf %490, %488 : vector<4x64xf32>
    %492 = vector.extract_strided_slice %486 {offsets = [6, 0], sizes = [2, 64], strides = [1, 1]} : vector<8x64xf32> to vector<2x64xf32>
    %493 = tpu.concatenate %489, %491, %492 in 0 : vector<2x64xf32>, vector<4x64xf32>, vector<2x64xf32> -> vector<8x64xf32>
    %cst_780 = arith.constant 0.000000e+00 : f32
    %494 = vector.broadcast %cst_780 : f32 to vector<8x64xf32>
    %495 = arith.maximumf %493, %494 : vector<8x64xf32>
    %c0_781 = arith.constant 0 : index
    %c0_782 = arith.constant 0 : index
    %c0_783 = arith.constant 0 : index
    %496 = vector.load %arg9[%c0_781, %c0_782, %c0_783] : memref<1x8x64xf32, #tpu.memory_space<vmem>>, vector<1x8x64xf32>
    %497 = vector.shape_cast %496 : vector<1x8x64xf32> to vector<8x64xf32>
    %498 = vector.shape_cast %495 : vector<8x64xf32> to vector<1x8x64xf32>
    tpu.vector_store %arg9[%c0_781, %c0_782, %c0_783], %498 {strides = array<i32>} : memref<1x8x64xf32, #tpu.memory_space<vmem>>, vector<1x8x64xf32>,
    return
  }
  func.func @transform_0(%arg0: i32) -> (i32, i32, i32, i32) {
    %c0_i32 = arith.constant 0 : i32
    %c0_i32_0 = arith.constant 0 : i32
    %c0_i32_1 = arith.constant 0 : i32
    %c0_i32_2 = arith.constant 0 : i32
    return %arg0, %c0_i32, %c0_i32_0, %c0_i32_1 : i32, i32, i32, i32
  }
  func.func @transform_1(%arg0: i32) -> (i32, i32) {
    %c0_i32 = arith.constant 0 : i32
    %c0_i32_0 = arith.constant 0 : i32
    %c0_i32_1 = arith.constant 0 : i32
    return %c0_i32, %c0_i32_0 : i32, i32
  }
  func.func @transform_2(%arg0: i32) -> (i32, i32) {
    %c0_i32 = arith.constant 0 : i32
    %c0_i32_0 = arith.constant 0 : i32
    %c0_i32_1 = arith.constant 0 : i32
    return %c0_i32, %c0_i32_0 : i32, i32
  }
  func.func @transform_3(%arg0: i32) -> (i32, i32) {
    %c0_i32 = arith.constant 0 : i32
    %c0_i32_0 = arith.constant 0 : i32
    %c0_i32_1 = arith.constant 0 : i32
    return %c0_i32, %c0_i32_0 : i32, i32
  }
  func.func @transform_4(%arg0: i32) -> (i32, i32) {
    %c0_i32 = arith.constant 0 : i32
    %c0_i32_0 = arith.constant 0 : i32
    %c0_i32_1 = arith.constant 0 : i32
    return %c0_i32, %c0_i32_0 : i32, i32
  }
  func.func @transform_5(%arg0: i32) -> (i32, i32) {
    %c0_i32 = arith.constant 0 : i32
    %c0_i32_0 = arith.constant 0 : i32
    %c0_i32_1 = arith.constant 0 : i32
    return %c0_i32, %c0_i32_0 : i32, i32
  }
  func.func @transform_6(%arg0: i32) -> (i32, i32) {
    %c0_i32 = arith.constant 0 : i32
    %c0_i32_0 = arith.constant 0 : i32
    %c0_i32_1 = arith.constant 0 : i32
    return %c0_i32, %c0_i32_0 : i32, i32
  }
  func.func @transform_7(%arg0: i32) -> (i32, i32, i32) {
    %c0_i32 = arith.constant 0 : i32
    %c0_i32_0 = arith.constant 0 : i32
    %c0_i32_1 = arith.constant 0 : i32
    return %arg0, %c0_i32, %c0_i32_0 : i32, i32, i32
  }
  func.func @transform_8(%arg0: i32) -> (i32, i32, i32) {
    %c0_i32 = arith.constant 0 : i32
    %c0_i32_0 = arith.constant 0 : i32
    %c0_i32_1 = arith.constant 0 : i32
    return %arg0, %c0_i32, %c0_i32_0 : i32, i32, i32
  }
}

</mosaic_0001>

<bundles_post_ra>
// kernel: basic_block_forward.1
= control target key start
LH: loop header
LB: loop body
LE: loop exit
PB: predicated region body
PF: predicated region fallthrough
CT: control target
= control target key end

     0   :  { %s1818_s27 = smov 0   ;;  %s2189_s0 = inlined_call_operand.vmem [shape: bf16[2,2,8,162], index: 0, kind: input, shape index: {}]   ;;  %s2190_s1 = inlined_call_operand.vmem [shape: bf16[8,72], index: 1, kind: input, shape index: {}]   ;;  %s2191_s2 = inlined_call_operand.vmem [shape: f32[8,1], index: 2, kind: input, shape index: {}]   ;;  %s2192_s3 = inlined_call_operand.vmem [shape: f32[8,1], index: 3, kind: input, shape index: {}]   ;;  %s2193_s4 = inlined_call_operand.vmem [shape: bf16[8,72], index: 4, kind: input, shape index: {}]   ;;  %s2194_s5 = inlined_call_operand.vmem [shape: f32[8,1], index: 5, kind: input, shape index: {}]   ;;  %s2195_s6 = inlined_call_operand.vmem [shape: f32[8,1], index: 6, kind: input, shape index: {}]   ;;  %s2196_s7 = inlined_call_operand.vmem [shape: f32[2,4,64], index: 7, kind: input, shape index: {}]   ;;  %s2197_s8 = inlined_call_operand.vmem [shape: f32[2,8,64], index: 8, kind: output, shape index: {}]  }
   0x1 LB: > { %s1519_s28 = sadd.s32 4294967295, %s1703_s27   ;;  %p1523_p0 = scmp.ge.s32.totalorder %s1703_s27, 1  ;;  %s1703_s27 = sphi %s1818_s27, %s18_s27  }
   0x2   : > { %p271_p1 = scmp.lt.s32.totalorder %s1703_s27, 3 }
   0x4   : > { %p272_p2 = pnand %p1523_p0, %p271_p1 }
   0x5   : > { %p308_p3 = scmp.lt.s32.totalorder (!%p272_p2), %s1519_s28, 1  ;;  %s1705_s11 = smov (!%p272_p2), 108   ;;  %vm323_vm0 = vcmask (!%p272_p2), 60416   ;;  %v1715_v20 = vmov (!%p272_p2), 0.0   ;;  %vm330_vm1 = vcmask (!%p272_p2), 126016   ;;  %vm337_vm2 = vcmask (!%p272_p2), 191616  }
   0x6   : > { %275 = sbr.rel (%p272_p2) target bundleno = 1129 (0x469), region = 52  ;;  %s1706_s12 = smov (!%p272_p2), 118   ;;  %1581 = vmatprep.subr.bf16.mxu0 (!%p272_p2), %v1715_v20  ;;  %1595 = vmatprep.subr.bf16.mxu1 (!%p272_p2), %v1715_v20  ;;  %vm344_vm3 = vcmask (!%p272_p2), 257216   ;;  %vm351_vm4 = vcmask (!%p272_p2), 322816   ;;  %vm358_vm5 = vcmask (!%p272_p2), 388416   ;;  %vm1739_vm6 = vmmov (!%p272_p2), 0  }
   0x7   : > { %s2199_s13 = smov (!%p272_p2), 98   ;;  %s1708_s14 = smov (!%p272_p2), 58   ;;  %1591 = vmatprep.mubr.msk.bf16.mxu0 (!%p272_p2), %vm1739_vm6, %v1715_v20  ;;  %1605 = vmatprep.mubr.msk.bf16.mxu1 (!%p272_p2), %vm1739_vm6, %v1715_v20  ;;  %vm372_vm7 = vcmask (!%p272_p2), 474112   ;;  %vm365_vm8 = vcmask (!%p272_p2), 454016   ;;  %vm375_vm9 = vcmask (!%p272_p2), 519616   ;;  %vm471_vm10 = vcmask (!%p272_p2), 465920  }
   0x8   : > { %s1709_s15 = smov (!%p272_p2), 88   ;;  %s1710_s16 = smov (!%p272_p2), 119   ;;  %vm660_vm11 = vcmask (!%p272_p2), 408576   ;;  %vm761_vm12 = vcmask (!%p272_p2), 400384   ;;  %vm2202_vm13 = vcmask (!%p272_p2), 1043456   ;;  %vm2201_vm14 = vcmask (!%p272_p2), 588800  }
   0x9   : > { %s1711_s17 = smov (!%p272_p2), 127   ;;  %s1712_s18 = smov (!%p272_p2), 78   ;;  %vm872_vm15 = vcmask (!%p272_p2), 814080   ;;  %vm880_vm6 = vcmask (!%p272_p2), 150616  }
   0xa   : > { %s1713_s19 = smov (!%p272_p2), 109   ;;  %s1714_s20 = smov (!%p272_p2), 117  }
   0xb   : > { %s1716_s21 = smov (!%p272_p2), 68   ;;  %s1717_s22 = smov (!%p272_p2), 99  }
   0xc   : > { %s1718_s23 = smov (!%p272_p2), 107   ;;  %s1719_s24 = smov (!%p272_p2), 89  }
   0xd   : > { %s2208_s28 = smov (!%p308_p3, %s1519_s28), 1  ;;  %s2198_s25 = smov 97  }
   0xe   : > { %s1567_s29 = sshll.u32 %s2208_s28, 4  ;;  %s1721_s26 = smov 57  }
   0xf   : > { %s1832_s10 = scalar_lea.vmem %s2189_s0, %s1567_s29  ;;  %s1722_s29 = smov 87  }
  0x10   : > { %v332_v0 = vld [vmem:[%s1832_s10] sm:$0xf]  ;;  %v1530_v2 = vld [vmem:[%s1832_s10 + $0x8] sm:$0xf]  ;;  %s1723_s30 = smov 79   ;;  %s1724_s9 = smov 77  }
  0x11   : > { %v325_v1 = vld [vmem:[%s1832_s10] sm:$0xf]  ;;  %334 = vrot.lane.b32.xlu1 %v332_v0, %s1705_s11  ;;  %v1529_v3 = vld [vmem:[%s1832_s10 + $0x8] sm:$0xf]  ;;  %v517_v36 = vld [vmem:[%s1832_s10 + $0x4] sm:$0xf] }
  0x12   : > { %327 = vrot.lane.b32.xlu0 %v325_v1, %s1706_s12  ;;  %v1531_v4 = vld [vmem:[%s1832_s10 + $0x8] sm:$0xf]  ;;  %v339_v5 = vld [vmem:[%s1832_s10] sm:$0xf]  ;;  %v613_v52 = vld [vmem:[%s1832_s10 + $0x4] sm:$0xf] }
  0x13   : > { %v1847_v6 = vld [vmem:[%s1832_s10] sm:$0xff]  ;;  %v1854_v8 = vld [vmem:[%s1832_s10 + $0x8] sm:$0xff] }
  0x14   : > { %v346_v7 = vld [vmem:[%s1832_s10] sm:$0xf]  ;;  %v1532_v9 = vld [vmem:[%s1832_s10 + $0x8] sm:$0xf]  ;;  %v1543_v53 = vld [vmem:[%s1832_s10 + $0xc] sm:$0xf] }
  0x15   : > { %388 = vrot.lane.b32.xlu1 %v1530_v2, %s1705_s11  ;;  %v475_v10 = vld [vmem:[%s1832_s10] sm:$0xf]  ;;  %v1533_v12 = vld [vmem:[%s1832_s10 + $0x8] sm:$0xf] }
  0x16   : > { %382 = vrot.lane.b32.xlu0 %v1529_v3, %s1706_s12  ;;  %v424_v11 = vld [vmem:[%s1832_s10] sm:$0xf]  ;;  %v1528_v15 = vld [vmem:[%s1832_s10 + $0x8] sm:$0xf] }
  0x17   : > { %v353_v13 = vld [vmem:[%s1832_s10] sm:$0xf]  ;;  %379 = vst.msk [vmem:[#allocation2 + $0x4] sm:$0xf] %vm323_vm0, %v1528_v15  ;;  %v1534_v18 = vld [vmem:[%s1832_s10 + $0x8] sm:$0xf] }
  0x18   : > { %v322_v14 = vld [vmem:[%s1832_s10] sm:$0xf]  ;;  %v1536_v26 = vld [vmem:[%s1832_s10 + $0x8] sm:$0xf]  ;;  %v765_v15 = vld [vmem:[%s1832_s10 + $0x4] sm:$0xf] }
  0x19   : > { %394 = vrot.lane.b32.xlu1 %v1531_v4, %s2199_s13  ;;  %324 = vst.msk [vmem:[#allocation2] sm:$0xf] %vm323_vm0, %v322_v14  ;;  %v481_v16 = vld [vmem:[%s1832_s10] sm:$0xf]  ;;  %v1537_v30 = vld [vmem:[%s1832_s10 + $0x8] sm:$0xf] }
  0x1a   : > { %341 = vrot.lane.b32.xlu0 %v339_v5, %s2199_s13  ;;  %v430_v17 = vld [vmem:[%s1832_s10] sm:$0xf]  ;;  %v1538_v34 = vld [vmem:[%s1832_s10 + $0x8] sm:$0xf] }
  0x1b   : > { %v360_v19 = vld [vmem:[%s1832_s10] sm:$0xf]  ;;  %v1539_v39 = vld [vmem:[%s1832_s10 + $0x8] sm:$0xf] }
  0x1c   : > { %v487_v21 = vld [vmem:[%s1832_s10] sm:$0xf]  ;;  %v1540_v41 = vld [vmem:[%s1832_s10 + $0x8] sm:$0xf] }
  0x1d   : > { %369 = vrot.lane.b32.xlu1 %v1847_v6, %s1708_s14  ;;  %v436_v22 = vld [vmem:[%s1832_s10] sm:$0xf]  ;;  %v1544_v42 = vld [vmem:[%s1832_s10 + $0x8] sm:$0xf] }
  0x1e   : > { %348 = vrot.lane.b32.xlu0 %v346_v7, %s1709_s15  ;;  %v493_v23 = vld [vmem:[%s1832_s10] sm:$0xf]  ;;  %v1541_v45 = vld [vmem:[%s1832_s10 + $0x8] sm:$0xf]  ;;  %v664_v7 = vld [vmem:[%s1832_s10 + $0x4] sm:$0xf] }
  0x1f   : > { %v442_v24 = vld [vmem:[%s1832_s10] sm:$0xf]  ;;  %v1545_v46 = vld [vmem:[%s1832_s10 + $0x8] sm:$0xf] }
  0x20   : > { %v448_v25 = vld [vmem:[%s1832_s10] sm:$0xf]  ;;  %v1542_v49 = vld [vmem:[%s1832_s10 + $0x8] sm:$0xf] }
  0x21   : > { %418 = vrot.lane.b32.xlu1 %v1854_v8, %s1708_s14  ;;  %v499_v27 = vld [vmem:[%s1832_s10] sm:$0xf]  ;;  %v1546_v50 = vld [vmem:[%s1832_s10 + $0x8] sm:$0xf] }
  0x22   : > { %400 = vrot.lane.b32.xlu0 %v1532_v9, %s1709_s15  ;;  %v454_v28 = vld [vmem:[%s1832_s10] sm:$0xf]  ;;  %v1547_v55 = vld [vmem:[%s1832_s10 + $0x8] sm:$0xf] }
  0x23   : > { %v571_v29 = vld [vmem:[%s1832_s10] sm:$0xf]  ;;  %v1548_v59 = vld [vmem:[%s1832_s10 + $0x8] sm:$0xf] }
  0x24   : > { %v505_v31 = vld [vmem:[%s1832_s10] sm:$0xf]  ;;  %v1549_v62 = vld [vmem:[%s1832_s10 + $0x8] sm:$0xf] }
  0x25   : > { %477 = vrot.lane.b32.xlu1 %v475_v10, %s1710_s16  ;;  %v460_v32 = vld [vmem:[%s1832_s10] sm:$0xf]  ;;  %v1551_v10 = vld [vmem:[%s1832_s10 + $0xc] sm:$0xf] }
  0x26   : > { %426 = vrot.lane.b32.xlu0 %v424_v11, %s1711_s17  ;;  %v577_v33 = vld [vmem:[%s1832_s10] sm:$0xf] }
  0x27   : > { %v511_v35 = vld [vmem:[%s1832_s10] sm:$0xf] }
  0x28   : > { %v583_v37 = vld [vmem:[%s1832_s10] sm:$0xf] }
  0x29   : > { %406 = vrot.lane.b32.xlu1 %v1533_v12, %s1712_s18  ;;  %v589_v38 = vld [vmem:[%s1832_s10] sm:$0xf] }
  0x2a   : > { %355 = vrot.lane.b32.xlu0 %v353_v13, %s1712_s18  ;;  %v595_v40 = vld [vmem:[%s1832_s10] sm:$0xf] }
  0x2b   : > { %v619_v43 = vld [vmem:[%s1832_s10] sm:$0xf] }
  0x2c   : > { %v601_v44 = vld [vmem:[%s1832_s10] sm:$0xf] }
  0x2d   : > { %483 = vrot.lane.b32.xlu1 %v481_v16, %s1713_s19  ;;  %v625_v47 = vld [vmem:[%s1832_s10] sm:$0xf] }
  0x2e   : > { %432 = vrot.lane.b32.xlu0 %v430_v17, %s1714_s20  ;;  %v607_v48 = vld [vmem:[%s1832_s10] sm:$0xf] }
  0x2f   : > { %v631_v51 = vld [vmem:[%s1832_s10] sm:$0xf] }
  0x30   : > { %v637_v54 = vld [vmem:[%s1832_s10] sm:$0xf] }
  0x31   : > { %412 = vrot.lane.b32.xlu1 %v1534_v18, %s1716_s21  ;;  %v643_v56 = vld [vmem:[%s1832_s10] sm:$0xf] }
  0x32   : > { %362 = vrot.lane.b32.xlu0 %v360_v19, %s1716_s21  ;;  %v720_v57 = vld [vmem:[%s1832_s10] sm:$0xf] }
  0x33   : > { %v726_v58 = vld [vmem:[%s1832_s10] sm:$0xf] }
  0x34   : > { %v649_v63 = vld [vmem:[%s1832_s10] sm:$0xf] }
  0x35   : > { %489 = vrot.lane.b32.xlu1 %v487_v21, %s1717_s22  ;;  %v732_v2 = vld [vmem:[%s1832_s10] sm:$0xf] }
  0x36   : > { %438 = vrot.lane.b32.xlu0 %v436_v22, %s1718_s23  ;;  %v738_v3 = vld [vmem:[%s1832_s10] sm:$0xf]  ;;  %v1740_v22 = vmov 0  }
  0x37   : > { %v744_v11 = vld [vmem:[%s1832_s10] sm:$0xf]  ;;  %1685 = vset.pattern.permute.xlu0 %v1740_v22  ;;  %1686 = vset.pattern.permute.xlu1 %v1740_v22  ;;  %873 = vst.msk [vmem:[#allocation4] sm:$0xf] %vm872_vm15, %v1740_v22  ;;  %vm905_vm15 = vcmask 560616  }
  0x38   : > { %v750_v14 = vld [vmem:[%s1832_s10] sm:$0xf]  ;;  %s1746_s10 = smov 19  }
  0x39   : > { %495 = vrot.lane.b32.xlu1 %v493_v23, %s1719_s24  ;;  %v856_v19 = vld [vmem:[%s2191_s2] sm:$0xff] }
  0x3a   : > { %444 = vrot.lane.b32.xlu0 %v442_v24, %s2198_s25  ;;  %s1728_s25 = smov 49   ;;  %v863_v21 = vld [vmem:[%s2192_s3] sm:$0xff] }
  0x3d   : > { %468 = vrot.lane.b32.xlu1 %v1847_v6, %s1721_s26  ;;  %s1725_s26 = smov 69  }
  0x3e   : > { %450 = vrot.lane.b32.xlu0 %v448_v25, %s1722_s29  ;;  %s1726_s29 = smov 67  }
  0x41   : > { %525 = vrot.lane.b32.xlu1 %v1536_v26, %s1710_s16 }
  0x42   : > { %501 = vrot.lane.b32.xlu0 %v499_v27, %s1723_s30 }
  0x45   : > { %456 = vrot.lane.b32.xlu1 %v454_v28, %s1724_s9  ;;  %s1727_s9 = smov 59  }
  0x46   : > { %573 = vrot.lane.b32.xlu0 %v571_v29, %s1706_s12 }
  0x49   : > { %531 = vrot.lane.b32.xlu1 %v1537_v30, %s1713_s19 }
  0x4a   : > { %507 = vrot.lane.b32.xlu0 %v505_v31, %s1725_s26 }
  0x4d   : > { %462 = vrot.lane.b32.xlu1 %v460_v32, %s1726_s29  ;;  %s1729_s29 = smov 110  }
  0x4e   : > { %579 = vrot.lane.b32.xlu0 %v577_v33, %s1705_s11 }
  0x51   : > { %537 = vrot.lane.b32.xlu1 %v1538_v34, %s1717_s22 }
  0x52   : > { %513 = vrot.lane.b32.xlu0 %v511_v35, %s1727_s9 }
  0x55   : > { %519 = vrot.lane.b32.xlu1 %v517_v36, %s1728_s25 }
  0x56   : > { %585 = vrot.lane.b32.xlu0 %v583_v37, %s2199_s13  ;;  %s1734_s13 = smov 80  }
  0x59   : > { %591 = vrot.lane.b32.xlu1 %v589_v38, %s1709_s15  ;;  %s1730_s15 = smov 100  }
  0x5a   : > { %543 = vrot.lane.b32.xlu0 %v1539_v39, %s1719_s24 }
  0x5d   : > { %597 = vrot.lane.b32.xlu1 %v595_v40, %s1712_s18  ;;  %s1731_s18 = smov 90  }
  0x5e   : > { %549 = vrot.lane.b32.xlu0 %v1540_v41, %s1723_s30 }
  0x61   : > { %672 = vrot.lane.b32.xlu1 %v1544_v42, %s1729_s29 }
  0x62   : > { %621 = vrot.lane.b32.xlu0 %v619_v43, %s1729_s29 }
  0x65   : > { %603 = vrot.lane.b32.xlu1 %v601_v44, %s1716_s21  ;;  %s1732_s21 = smov 48  }
  0x66   : > { %555 = vrot.lane.b32.xlu0 %v1541_v45, %s1725_s26 }
  0x69   : > { %678 = vrot.lane.b32.xlu1 %v1545_v46, %s1730_s15 }
  0x6a   : > { %627 = vrot.lane.b32.xlu0 %v625_v47, %s1730_s15 }
  0x6d   : > { %609 = vrot.lane.b32.xlu1 %v607_v48, %s1708_s14  ;;  %s1733_s14 = smov 50  }
  0x6e   : > { %561 = vrot.lane.b32.xlu0 %v1542_v49, %s1727_s9 }
  0x71   : > { %684 = vrot.lane.b32.xlu1 %v1546_v50, %s1731_s18 }
  0x72   : > { %633 = vrot.lane.b32.xlu0 %v631_v51, %s1731_s18  ;;  %s1735_s18 = smov 70  }
  0x75   : > { %615 = vrot.lane.b32.xlu1 %v613_v52, %s1732_s21  ;;  %s1737_s21 = smov 40  }
  0x76   : > { %567 = vrot.lane.b32.xlu0 %v1543_v53, %s1728_s25 }
  0x79   : > { %657 = vrot.lane.b32.xlu1 %v1847_v6, %s1733_s14 }
  0x7a   : > { %639 = vrot.lane.b32.xlu0 %v637_v54, %s1734_s13 }
  0x7d   : > { %708 = vrot.lane.b32.xlu1 %v1854_v8, %s1733_s14  ;;  %s1750_s14 = smov 125  }
  0x7e   : > { %690 = vrot.lane.b32.xlu0 %v1547_v55, %s1734_s13  ;;  %s1736_s13 = smov 60  }
  0x81   : > { %645 = vrot.lane.b32.xlu1 %v643_v56, %s1735_s18 }
  0x82   : > { %722 = vrot.lane.b32.xlu0 %v720_v57, %s1713_s19 }
  0x83   : > { %v335_v60 = vpop.permute.xlu1 %334 }
  0x84   : > { %v328_v61 = vpop.permute.xlu0 %327 }
  0x85   : > { %331 = vst.msk [vmem:[#allocation2] sm:$0xf] %vm330_vm1, %v328_v61  ;;  %728 = vrot.lane.b32.xlu1 %v726_v58, %s1717_s22 }
  0x86   : > { %696 = vrot.lane.b32.xlu0 %v1548_v59, %s1735_s18  ;;  %338 = vst.msk [vmem:[#allocation2] sm:$0xf] %vm337_vm2, %v335_v60  ;;  %s1741_s18 = smov 13  }
  0x87   : > { %v389_v0 = vpop.permute.xlu1 %388 }
  0x88   : > { %v383_v1 = vpop.permute.xlu0 %382 }
  0x89   : > { %385 = vst.msk [vmem:[#allocation2 + $0x4] sm:$0xf] %vm330_vm1, %v383_v1  ;;  %702 = vrot.lane.b32.xlu1 %v1549_v62, %s1736_s13 }
  0x8a   : > { %651 = vrot.lane.b32.xlu0 %v649_v63, %s1736_s13  ;;  %391 = vst.msk [vmem:[#allocation2 + $0x4] sm:$0xf] %vm337_vm2, %v389_v0  ;;  %s1742_s13 = smov 11  }
  0x8b   : > { %v395_v4 = vpop.permute.xlu1 %394 }
  0x8c   : > { %v342_v5 = vpop.permute.xlu0 %341  ;;  %397 = vst.msk [vmem:[#allocation2 + $0x4] sm:$0xf] %vm344_vm3, %v395_v4 }
  0x8d   : > { %345 = vst.msk [vmem:[#allocation2] sm:$0xf] %vm344_vm3, %v342_v5  ;;  %740 = vrot.lane.b32.xlu1 %v738_v3, %s1723_s30  ;;  %s1747_s30 = smov 25  }
  0x8e   : > { %734 = vrot.lane.b32.xlu0 %v732_v2, %s1719_s24  ;;  %s1738_s24 = smov 39  }
  0x8f   : > { %v370_v8 = vpop.permute.xlu1 %369 }
  0x90   : > { %v349_v9 = vpop.permute.xlu0 %348  ;;  %v371_v25 = vrot.slane %v370_v8, 4 }
  0x91   : > { %352 = vst.msk [vmem:[#allocation2] sm:$0xf] %vm351_vm4, %v349_v9  ;;  %666 = vrot.lane.b32.xlu1 %v664_v7, %s1737_s21 }
  0x92   : > { %758 = vrot.lane.b32.xlu0 %v1847_v6, %s1728_s25  ;;  %v373_v29 = vsel %vm372_vm7, %v370_v8, %v371_v25  ;;  %s1745_s25 = smov 21  }
  0x93   : > { %v419_v12 = vpop.permute.xlu1 %418 }
  0x94   : > { %v401_v13 = vpop.permute.xlu0 %400  ;;  %v420_v26 = vrot.slane %v419_v12, 4 }
  0x95   : > { %403 = vst.msk [vmem:[#allocation2 + $0x4] sm:$0xf] %vm351_vm4, %v401_v13  ;;  %746 = vrot.lane.b32.xlu1 %v744_v11, %s1725_s26  ;;  %s1748_s26 = smov 23  }
  0x96   : > { %716 = vrot.lane.b32.xlu0 %v1551_v10, %s1737_s21  ;;  %v421_v30 = vsel %vm372_vm7, %v419_v12, %v420_v26  ;;  %s1743_s21 = smov 17   ;;  %vm885_vm7 = vcmask 232616  }
  0x97   : > { %v478_v16 = vpop.permute.xlu1 %477 }
  0x98   : > { %v427_v17 = vpop.permute.xlu0 %426  ;;  %480 = vst.msk [vmem:[#allocation2 + $0xc] sm:$0xf] %vm323_vm0, %v478_v16 }
  0x99   : > { %429 = vst.msk [vmem:[#allocation2 + $0x8] sm:$0xf] %vm323_vm0, %v427_v17  ;;  %767 = vrot.lane.b32.xlu1 %v765_v15, %s1738_s24  ;;  %s1744_s24 = smov 15  }
  0x9a   : > { %752 = vrot.lane.b32.xlu0 %v750_v14, %s1727_s9  ;;  %s1749_s9 = smov 126  }
  0x9b   : > { %v407_v6 = vpop.permute.xlu1 %406 }
  0x9c   : > { %v356_v18 = vpop.permute.xlu0 %355  ;;  %409 = vst.msk [vmem:[#allocation2 + $0x4] sm:$0xf] %vm358_vm5, %v407_v6 }
  0x9d   : > { %359 = vst.msk [vmem:[#allocation2] sm:$0xf] %vm358_vm5, %v356_v18  ;;  %866 = vperm.xlu1 %1686, %v863_v21  }
  0x9e   : > { %859 = vperm.xlu0 %1685, %v856_v19  }
  0x9f   : > { %v484_v23 = vpop.permute.xlu1 %483 }
  0xa0   : > { %v433_v24 = vpop.permute.xlu0 %432  ;;  %486 = vst.msk [vmem:[#allocation2 + $0xc] sm:$0xf] %vm330_vm1, %v484_v23 }
  0xa1   : > { %435 = vst.msk [vmem:[#allocation2 + $0x8] sm:$0xf] %vm330_vm1, %v433_v24 }
  0xa3   : > { %v413_v27 = vpop.permute.xlu1 %412 }
  0xa4   : > { %v363_v28 = vpop.permute.xlu0 %362  ;;  %415 = vst.msk [vmem:[#allocation2 + $0x4] sm:$0xf] %vm365_vm8, %v413_v27 }
  0xa5   : > { %366 = vst.msk [vmem:[#allocation2] sm:$0xf] %vm365_vm8, %v363_v28 }
  0xa6   : > { %423 = vst.msk [vmem:[#allocation2 + $0x4] sm:$0xf] %vm375_vm9, %v421_v30  ;;  %376 = vst.msk [vmem:[#allocation2] sm:$0xf] %vm375_vm9, %v373_v29 }
  0xa7   : > { %v490_v31 = vpop.permute.xlu1 %489 }
  0xa8   : > { %v439_v32 = vpop.permute.xlu0 %438  ;;  %492 = vst.msk [vmem:[#allocation2 + $0xc] sm:$0xf] %vm337_vm2, %v490_v31 }
  0xa9   : > { %441 = vst.msk [vmem:[#allocation2 + $0x8] sm:$0xf] %vm337_vm2, %v439_v32 }
  0xab   : > { %v496_v33 = vpop.permute.xlu1 %495 }
  0xac   : > { %v445_v34 = vpop.permute.xlu0 %444  ;;  %498 = vst.msk [vmem:[#allocation2 + $0xc] sm:$0xf] %vm344_vm3, %v496_v33 }
  0xad   : > { %447 = vst.msk [vmem:[#allocation2 + $0x8] sm:$0xf] %vm344_vm3, %v445_v34  ;;  %v1687_v35 = vld [vmem:[#allocation2] sm:$0xff]  }
  0xae   : > { %1582 = vmatpush3.bf16.msra.mxu0 %v1687_v35  ;;  %v771_v35 = vld [vmem:[%s2190_s1] sm:$0xf] }
  0xaf   : > { %v469_v36 = vpop.permute.xlu1 %468  ;;  %1583 = vmatprep.subr.bf16.mxu0 %v1715_v20 }
  0xb0   : > { %v451_v37 = vpop.permute.xlu0 %450  ;;  %v470_v44 = vrot.slane %v469_v36, 4 }
  0xb1   : > { %453 = vst.msk [vmem:[#allocation2 + $0x8] sm:$0xf] %vm351_vm4, %v451_v37 }
  0xb2   : > { %v472_v47 = vsel %vm471_vm10, %v469_v36, %v470_v44  ;;  %vm890_vm10 = vcmask 314616  }
  0xb3   : > { %v526_v38 = vpop.permute.xlu1 %525 }
  0xb4   : > { %v502_v39 = vpop.permute.xlu0 %501  ;;  %528 = vst.msk [vmem:[#allocation2 + $0x10] sm:$0xf] %vm323_vm0, %v526_v38 }
  0xb5   : > { %504 = vst.msk [vmem:[#allocation2 + $0xc] sm:$0xf] %vm351_vm4, %v502_v39 }
  0xb7   : > { %v457_v40 = vpop.permute.xlu1 %456 }
  0xb8   : > { %v574_v41 = vpop.permute.xlu0 %573  ;;  %459 = vst.msk [vmem:[#allocation2 + $0x8] sm:$0xf] %vm358_vm5, %v457_v40 }
  0xb9   : > { %576 = vst.msk [vmem:[#allocation2 + $0x14] sm:$0xf] %vm323_vm0, %v574_v41 }
  0xbb   : > { %v532_v42 = vpop.permute.xlu1 %531 }
  0xbc   : > { %v508_v43 = vpop.permute.xlu0 %507  ;;  %534 = vst.msk [vmem:[#allocation2 + $0x10] sm:$0xf] %vm330_vm1, %v532_v42 }
  0xbd   : > { %510 = vst.msk [vmem:[#allocation2 + $0xc] sm:$0xf] %vm358_vm5, %v508_v43 }
  0xbf   : > { %v463_v45 = vpop.permute.xlu1 %462 }
  0xc0   : > { %v580_v46 = vpop.permute.xlu0 %579  ;;  %465 = vst.msk [vmem:[#allocation2 + $0x8] sm:$0xf] %vm365_vm8, %v463_v45 }
  0xc1   : > { %582 = vst.msk [vmem:[#allocation2 + $0x14] sm:$0xf] %vm330_vm1, %v580_v46 }
  0xc2   : > { %474 = vst.msk [vmem:[#allocation2 + $0x8] sm:$0xf] %vm375_vm9, %v472_v47 }
  0xc3   : > { %v538_v48 = vpop.permute.xlu1 %537 }
  0xc4   : > { %v514_v49 = vpop.permute.xlu0 %513  ;;  %540 = vst.msk [vmem:[#allocation2 + $0x10] sm:$0xf] %vm337_vm2, %v538_v48 }
  0xc5   : > { %516 = vst.msk [vmem:[#allocation2 + $0xc] sm:$0xf] %vm365_vm8, %v514_v49 }
  0xc7   : > { %v520_v50 = vpop.permute.xlu1 %519 }
  0xc8   : > { %v586_v51 = vpop.permute.xlu0 %585  ;;  %522 = vst.msk [vmem:[#allocation2 + $0xc] sm:$0xf] %vm375_vm9, %v520_v50 }
  0xc9   : > { %588 = vst.msk [vmem:[#allocation2 + $0x14] sm:$0xf] %vm337_vm2, %v586_v51 }
  0xcb   : > { %v592_v52 = vpop.permute.xlu1 %591 }
  0xcc   : > { %v544_v53 = vpop.permute.xlu0 %543  ;;  %594 = vst.msk [vmem:[#allocation2 + $0x14] sm:$0xf] %vm344_vm3, %v592_v52 }
  0xcd   : > { %546 = vst.msk [vmem:[#allocation2 + $0x10] sm:$0xf] %vm344_vm3, %v544_v53 }
  0xcf   : > { %v598_v54 = vpop.permute.xlu1 %597  ;;  %v1688_v56 = vld [vmem:[#allocation2 + $0x8] sm:$0xff]  }
  0xd0   : > { %v550_v55 = vpop.permute.xlu0 %549  ;;  %600 = vst.msk [vmem:[#allocation2 + $0x14] sm:$0xf] %vm351_vm4, %v598_v54  ;;  %1584 = vmatpush3.bf16.msra.mxu0 %v1688_v56 }
  0xd1   : > { %552 = vst.msk [vmem:[#allocation2 + $0x10] sm:$0xf] %vm351_vm4, %v550_v55  ;;  %1585 = vmatprep.subr.bf16.mxu0 %v1715_v20 }
  0xd3   : > { %v673_v57 = vpop.permute.xlu1 %672 }
  0xd4   : > { %v622_v58 = vpop.permute.xlu0 %621  ;;  %675 = vst.msk [vmem:[#allocation2 + $0x1c] sm:$0xf] %vm323_vm0, %v673_v57 }
  0xd5   : > { %624 = vst.msk [vmem:[#allocation2 + $0x18] sm:$0xf] %vm323_vm0, %v622_v58 }
  0xd7   : > { %v604_v59 = vpop.permute.xlu1 %603 }
  0xd8   : > { %v556_v60 = vpop.permute.xlu0 %555  ;;  %606 = vst.msk [vmem:[#allocation2 + $0x14] sm:$0xf] %vm358_vm5, %v604_v59 }
  0xd9   : > { %558 = vst.msk [vmem:[#allocation2 + $0x10] sm:$0xf] %vm358_vm5, %v556_v60 }
  0xdb   : > { %v679_v61 = vpop.permute.xlu1 %678 }
  0xdc   : > { %v628_v62 = vpop.permute.xlu0 %627  ;;  %681 = vst.msk [vmem:[#allocation2 + $0x1c] sm:$0xf] %vm330_vm1, %v679_v61 }
  0xdd   : > { %630 = vst.msk [vmem:[#allocation2 + $0x18] sm:$0xf] %vm330_vm1, %v628_v62 }
  0xdf   : > { %v610_v63 = vpop.permute.xlu1 %609 }
  0xe0   : > { %v562_v0 = vpop.permute.xlu0 %561  ;;  %612 = vst.msk [vmem:[#allocation2 + $0x14] sm:$0xf] %vm365_vm8, %v610_v63 }
  0xe1   : > { %564 = vst.msk [vmem:[#allocation2 + $0x10] sm:$0xf] %vm365_vm8, %v562_v0 }
  0xe3   : > { %v685_v1 = vpop.permute.xlu1 %684 }
  0xe4   : > { %v634_v2 = vpop.permute.xlu0 %633  ;;  %687 = vst.msk [vmem:[#allocation2 + $0x1c] sm:$0xf] %vm337_vm2, %v685_v1 }
  0xe5   : > { %636 = vst.msk [vmem:[#allocation2 + $0x18] sm:$0xf] %vm337_vm2, %v634_v2 }
  0xe7   : > { %v616_v3 = vpop.permute.xlu1 %615 }
  0xe8   : > { %v568_v4 = vpop.permute.xlu0 %567  ;;  %618 = vst.msk [vmem:[#allocation2 + $0x14] sm:$0xf] %vm375_vm9, %v616_v3 }
  0xe9   : > { %570 = vst.msk [vmem:[#allocation2 + $0x10] sm:$0xf] %vm375_vm9, %v568_v4 }
  0xeb   : > { %v658_v5 = vpop.permute.xlu1 %657 }
  0xec   : > { %v640_v7 = vpop.permute.xlu0 %639  ;;  %v659_v15 = vrot.slane %v658_v5, 4 }
  0xed   : > { %642 = vst.msk [vmem:[#allocation2 + $0x18] sm:$0xf] %vm344_vm3, %v640_v7 }
  0xee   : > { %v661_v18 = vsel %vm660_vm11, %v658_v5, %v659_v15 }
  0xef   : > { %v709_v8 = vpop.permute.xlu1 %708 }
  0xf0   : > { %v691_v9 = vpop.permute.xlu0 %690  ;;  %v1689_v10 = vld [vmem:[#allocation2 + $0x10] sm:$0xff]   ;;  %v710_v16 = vrot.slane %v709_v8, 4 }
  0xf1   : > { %693 = vst.msk [vmem:[#allocation2 + $0x1c] sm:$0xf] %vm344_vm3, %v691_v9  ;;  %1586 = vmatpush3.bf16.msra.mxu0 %v1689_v10 }
  0xf2   : > { %1587 = vmatprep.subr.bf16.mxu0 %v1715_v20  ;;  %v711_v19 = vsel %vm660_vm11, %v709_v8, %v710_v16  ;;  %vm895_vm11 = vcmask 396616  }
  0xf3   : > { %v646_v11 = vpop.permute.xlu1 %645 }
  0xf4   : > { %v723_v12 = vpop.permute.xlu0 %722  ;;  %648 = vst.msk [vmem:[#allocation2 + $0x18] sm:$0xf] %vm351_vm4, %v646_v11 }
  0xf5   : > { %725 = vst.msk [vmem:[#allocation2 + $0x20] sm:$0xf] %vm323_vm0, %v723_v12 }
  0xf7   : > { %v729_v13 = vpop.permute.xlu1 %728 }
  0xf8   : > { %v697_v14 = vpop.permute.xlu0 %696  ;;  %731 = vst.msk [vmem:[#allocation2 + $0x20] sm:$0xf] %vm330_vm1, %v729_v13 }
  0xf9   : > { %699 = vst.msk [vmem:[#allocation2 + $0x1c] sm:$0xf] %vm351_vm4, %v697_v14 }
  0xfb   : > { %v703_v17 = vpop.permute.xlu1 %702 }
  0xfc   : > { %v652_v6 = vpop.permute.xlu0 %651  ;;  %705 = vst.msk [vmem:[#allocation2 + $0x1c] sm:$0xf] %vm358_vm5, %v703_v17 }
  0xfd   : > { %654 = vst.msk [vmem:[#allocation2 + $0x18] sm:$0xf] %vm358_vm5, %v652_v6 }
  0xfe   : > { %713 = vst.msk [vmem:[#allocation2 + $0x1c] sm:$0xf] %vm365_vm8, %v711_v19  ;;  %663 = vst.msk [vmem:[#allocation2 + $0x18] sm:$0xf] %vm365_vm8, %v661_v18 }
  0xff   : > { %v741_v23 = vpop.permute.xlu1 %740 }
 0x100   : > { %v735_v21 = vpop.permute.xlu0 %734 }
 0x101   : > { %737 = vst.msk [vmem:[#allocation2 + $0x20] sm:$0xf] %vm337_vm2, %v735_v21 }
 0x102   : > { %743 = vst.msk [vmem:[#allocation2 + $0x20] sm:$0xf] %vm344_vm3, %v741_v23 }
 0x103   : > { %v667_v25 = vpop.permute.xlu1 %666 }
 0x104   : > { %v759_v24 = vpop.permute.xlu0 %758  ;;  %669 = vst.msk [vmem:[#allocation2 + $0x18] sm:$0xf] %vm375_vm9, %v667_v25 }
 0x105   : > { %v760_v28 = vrot.slane %v759_v24, 4 }
 0x107   : > { %v747_v27 = vpop.permute.xlu1 %746  ;;  %v762_v31 = vsel %vm761_vm12, %v759_v24, %v760_v28  ;;  %vm900_vm12 = vcmask 478616  }
 0x108   : > { %v717_v26 = vpop.permute.xlu0 %716  ;;  %749 = vst.msk [vmem:[#allocation2 + $0x20] sm:$0xf] %vm351_vm4, %v747_v27 }
 0x109   : > { %719 = vst.msk [vmem:[#allocation2 + $0x1c] sm:$0xf] %vm375_vm9, %v717_v26 }
 0x10b   : > { %v768_v30 = vpop.permute.xlu1 %767 }
 0x10c   : > { %v753_v29 = vpop.permute.xlu0 %752 }
 0x10d   : > { %755 = vst.msk [vmem:[#allocation2 + $0x20] sm:$0xf] %vm358_vm5, %v753_v29 }
 0x10e   : > { %764 = vst.msk [vmem:[#allocation2 + $0x20] sm:$0xf] %vm365_vm8, %v762_v31 }
 0x10f   : > { %770 = vst.msk [vmem:[#allocation2 + $0x20] sm:$0xf] %vm375_vm9, %v768_v30 }
 0x110   : > { %v1690_v32 = vld [vmem:[#allocation2 + $0x18] sm:$0xff]  }
 0x111   : > { %1588 = vmatpush3.bf16.msra.mxu0 %v1690_v32 }
 0x112   : > { %1589 = vmatprep.subr.bf16.mxu0 %v1715_v20 }
 0x116   : > { %v1691_v33 = vld [vmem:[#allocation2 + $0x20] ss:$0 sps:$4 sm:$0xff]  }
 0x117   : > { %v814_v34 = vsel %vm2202_vm13, %v1691_v33, 0  ;;  %vm915_vm13 = vcmask 724616  }
 0x118   : > { %1590 = vmatpush3.bf16.msra.mxu0 %v814_v34 }
 0x11b   : > { %1592 = vmatmul.mubr.msk.bf16.vlgmr.msra.gmra.mrb[0].mxu0 %vm2201_vm14, %v771_v35  ;;  %vm910_vm14 = vcmask 642616  }
 0x11c   : > { %v867_v38 = vpop.permute.xlu1 %866 }
 0x11d   : > { %v860_v36 = vpop.permute.xlu0 %859 }
 0x1ee   : > { %v850_v37 = vpop.f32.mrb[0].mxu0 }
 0x1ef   : > { %v862_v39 = vmul.f32 %v860_v36, %v850_v37  ;;  %v1593_v40 = vpop.f32.mrb[1].mxu0 }
 0x1f0   : > { %v853_v41 = vpop.f32.mrb[2].mxu0 }
 0x1f1   : > { %v869_v42 = vadd.f32 %v867_v38, %v862_v39  ;;  %v1594_v43 = vpop.f32.mrb[3].mxu0 }
 0x1f3   : > { %v870_v44 = vmax.f32 %v869_v42, 0.0 }
 0x1f5   : > { %v1568_v45 = vpack.c.bf16 %v870_v44, %v870_v44 }
 0x1f7   : > { %882 = vrot.lane.b32.xlu0 %v1568_v45, %s1741_s18  ;;  %877 = vrot.lane.b32.xlu1 %v1568_v45, %s1742_s13  ;;  %s1751_s18 = smov 124   ;;  %s1752_s13 = smov 123  }
 0x1fb   : > { %892 = vrot.lane.b32.xlu0 %v1568_v45, %s1743_s21  ;;  %887 = vrot.lane.b32.xlu1 %v1568_v45, %s1744_s24  ;;  %s1753_s21 = smov 122   ;;  %s1754_s24 = smov 121  }
 0x1ff   : > { %902 = vrot.lane.b32.xlu0 %v1568_v45, %s1745_s25  ;;  %897 = vrot.lane.b32.xlu1 %v1568_v45, %s1746_s10  ;;  %s1756_s25 = smov 116   ;;  %s1758_s10 = smov 114  }
 0x203   : > { %912 = vrot.lane.b32.xlu0 %v1568_v45, %s1747_s30  ;;  %907 = vrot.lane.b32.xlu1 %v1568_v45, %s1748_s26  ;;  %s1759_s30 = smov 113   ;;  %s1760_s26 = smov 112  }
 0x269   : > { %v883_v22 = vpop.permute.xlu0 %882  ;;  %v878_v46 = vpop.permute.xlu1 %877 }
 0x26a   : > { %881 = vst.msk [vmem:[#allocation4] sm:$0xf] %vm880_vm6, %v878_v46 }
 0x26b   : > { %886 = vst.msk [vmem:[#allocation4] sm:$0xf] %vm885_vm7, %v883_v22 }
 0x26d   : > { %v893_v47 = vpop.permute.xlu0 %892  ;;  %v888_v48 = vpop.permute.xlu1 %887 }
 0x26e   : > { %891 = vst.msk [vmem:[#allocation4] sm:$0xf] %vm890_vm10, %v888_v48 }
 0x26f   : > { %896 = vst.msk [vmem:[#allocation4] sm:$0xf] %vm895_vm11, %v893_v47 }
 0x271   : > { %v903_v49 = vpop.permute.xlu0 %902  ;;  %v898_v50 = vpop.permute.xlu1 %897 }
 0x272   : > { %901 = vst.msk [vmem:[#allocation4] sm:$0xf] %vm900_vm12, %v898_v50 }
 0x273   : > { %906 = vst.msk [vmem:[#allocation4] sm:$0xf] %vm905_vm15, %v903_v49 }
 0x275   : > { %v913_v51 = vpop.permute.xlu0 %912  ;;  %v908_v52 = vpop.permute.xlu1 %907 }
 0x276   : > { %911 = vst.msk [vmem:[#allocation4] sm:$0xf] %vm910_vm14, %v908_v52 }
 0x277   : > { %916 = vst.msk [vmem:[#allocation4] sm:$0xf] %vm915_vm13, %v913_v51 }
 0x27e   : > { %v961_v53 = vld [vmem:[#allocation4] sm:$0xf] }
 0x27f   : > { %v919_v54 = vld [vmem:[#allocation4] sm:$0xf]  ;;  %963 = vrot.lane.b32.xlu1 %v961_v53, %s1711_s17  ;;  %s1755_s17 = smov 120  }
 0x280   : > { %921 = vrot.lane.b32.xlu0 %v919_v54, %s1749_s9  ;;  %v967_v55 = vld [vmem:[#allocation4] sm:$0xf] }
 0x281   : > { %v925_v56 = vld [vmem:[#allocation4] sm:$0xf] }
 0x282   : > { %v973_v57 = vld [vmem:[#allocation4] sm:$0xf] }
 0x283   : > { %969 = vrot.lane.b32.xlu1 %v967_v55, %s1750_s14  ;;  %v931_v58 = vld [vmem:[#allocation4] sm:$0xf]  ;;  %s2203_s14 = smov 98  }
 0x284   : > { %927 = vrot.lane.b32.xlu0 %v925_v56, %s1751_s18  ;;  %v979_v59 = vld [vmem:[#allocation4] sm:$0xf] }
 0x285   : > { %v937_v60 = vld [vmem:[#allocation4] sm:$0xf] }
 0x286   : > { %v985_v61 = vld [vmem:[#allocation4] sm:$0xf] }
 0x287   : > { %975 = vrot.lane.b32.xlu1 %v973_v57, %s1752_s13  ;;  %v1009_v62 = vld [vmem:[#allocation4] sm:$0xf]  ;;  %s1769_s13 = smov 95  }
 0x288   : > { %933 = vrot.lane.b32.xlu0 %v931_v58, %s1753_s21  ;;  %v917_v63 = vld [vmem:[#allocation4] sm:$0xf] }
 0x289   : > { %v1057_v0 = vld [vmem:[#allocation4] sm:$0xf]  ;;  %918 = vst.msk [vmem:[#allocation3] sm:$0xf] %vm323_vm0, %v917_v63 }
 0x28a   : > { %v943_v1 = vld [vmem:[#allocation4] sm:$0xf] }
 0x28b   : > { %981 = vrot.lane.b32.xlu1 %v979_v59, %s1754_s24  ;;  %v991_v2 = vld [vmem:[#allocation4] sm:$0xf]  ;;  %s1771_s24 = smov 93  }
 0x28c   : > { %939 = vrot.lane.b32.xlu0 %v937_v60, %s1755_s17  ;;  %v1015_v3 = vld [vmem:[#allocation4] sm:$0xf] }
 0x28d   : > { %v1063_v4 = vld [vmem:[#allocation4] sm:$0xf] }
 0x28e   : > { %v949_v5 = vld [vmem:[#allocation4] sm:$0xf] }
 0x28f   : > { %987 = vrot.lane.b32.xlu1 %v985_v61, %s1710_s16  ;;  %v997_v7 = vld [vmem:[#allocation4] sm:$0xf]  ;;  %s1757_s16 = smov 115  }
 0x290   : > { %1011 = vrot.lane.b32.xlu0 %v1009_v62, %s1749_s9  ;;  %v1021_v8 = vld [vmem:[#allocation4] sm:$0xf]  ;;  %s1763_s9 = smov 111  }
 0x291   : > { %v1069_v9 = vld [vmem:[#allocation4] sm:$0xf] }
 0x292   : > { %v955_v10 = vld [vmem:[#allocation4] sm:$0xf] }
 0x293   : > { %1059 = vrot.lane.b32.xlu1 %v1057_v0, %s1706_s12  ;;  %v1003_v11 = vld [vmem:[#allocation4] sm:$0xf] }
 0x294   : > { %945 = vrot.lane.b32.xlu0 %v943_v1, %s1706_s12  ;;  %v1027_v12 = vld [vmem:[#allocation4] sm:$0xf] }
 0x295   : > { %v1075_v13 = vld [vmem:[#allocation4] sm:$0xf] }
 0x296   : > { %v1033_v14 = vld [vmem:[#allocation4] sm:$0xf] }
 0x297   : > { %993 = vrot.lane.b32.xlu1 %v991_v2, %s1714_s20  ;;  %v1081_v15 = vld [vmem:[#allocation4] sm:$0xf] }
 0x298   : > { %1017 = vrot.lane.b32.xlu0 %v1015_v3, %s1751_s18  ;;  %v1105_v16 = vld [vmem:[#allocation4] sm:$0xf]  ;;  %s1768_s18 = smov 96  }
 0x299   : > { %v1153_v17 = vld [vmem:[#allocation4] sm:$0xf] }
 0x29a   : > { %v1039_v6 = vld [vmem:[#allocation4] sm:$0xf] }
 0x29b   : > { %1065 = vrot.lane.b32.xlu1 %v1063_v4, %s1756_s25  ;;  %v1087_v18 = vld [vmem:[#allocation4] sm:$0xf] }
 0x29c   : > { %951 = vrot.lane.b32.xlu0 %v949_v5, %s1756_s25  ;;  %v1111_v19 = vld [vmem:[#allocation4] sm:$0xf] }
 0x29d   : > { %v1159_v21 = vld [vmem:[#allocation4] sm:$0xf] }
 0x29e   : > { %v1045_v23 = vld [vmem:[#allocation4] sm:$0xf] }
 0x29f   : > { %999 = vrot.lane.b32.xlu1 %v997_v7, %s1757_s16  ;;  %v1093_v24 = vld [vmem:[#allocation4] sm:$0xf] }
 0x2a0   : > { %1023 = vrot.lane.b32.xlu0 %v1021_v8, %s1753_s21  ;;  %v1117_v25 = vld [vmem:[#allocation4] sm:$0xf]  ;;  %s1770_s21 = smov 94  }
 0x2a1   : > { %v1165_v26 = vld [vmem:[#allocation4] sm:$0xf] }
 0x2a2   : > { %v1051_v27 = vld [vmem:[#allocation4] sm:$0xf] }
 0x2a3   : > { %1071 = vrot.lane.b32.xlu1 %v1069_v9, %s1758_s10  ;;  %v1099_v28 = vld [vmem:[#allocation4] sm:$0xf] }
 0x2a4   : > { %957 = vrot.lane.b32.xlu0 %v955_v10, %s1758_s10  ;;  %v1123_v29 = vld [vmem:[#allocation4] sm:$0xf]  ;;  %v1428_v10 = vld [vmem:[%s2194_s5] sm:$0xff] }
 0x2a5   : > { %v1171_v30 = vld [vmem:[#allocation4] sm:$0xf] }
 0x2a6   : > { %v1129_v31 = vld [vmem:[#allocation4] sm:$0xf] }
 0x2a7   : > { %1005 = vrot.lane.b32.xlu1 %v1003_v11, %s1759_s30  ;;  %v1177_v32 = vld [vmem:[#allocation4] sm:$0xf] }
 0x2a8   : > { %1029 = vrot.lane.b32.xlu0 %v1027_v12, %s1755_s17  ;;  %v1201_v33 = vld [vmem:[#allocation4] sm:$0xf] }
 0x2a9   : > { %v1249_v34 = vld [vmem:[#allocation4] sm:$0xf] }
 0x2aa   : > { %v1135_v35 = vld [vmem:[#allocation4] sm:$0xf] }
 0x2ab   : > { %1077 = vrot.lane.b32.xlu1 %v1075_v13, %s1760_s26  ;;  %v1183_v36 = vld [vmem:[#allocation4] sm:$0xf] }
 0x2ac   : > { %1035 = vrot.lane.b32.xlu0 %v1033_v14, %s1706_s12  ;;  %s1761_s12 = smov 106   ;;  %v1207_v37 = vld [vmem:[#allocation4] sm:$0xf]  ;;  %v1435_v14 = vld [vmem:[%s2195_s6] sm:$0xff] }
 0x2ad   : > { %v1255_v38 = vld [vmem:[#allocation4] sm:$0xf] }
 0x2ae   : > { %v1141_v39 = vld [vmem:[#allocation4] sm:$0xf] }
 0x2af   : > { %1083 = vrot.lane.b32.xlu1 %v1081_v15, %s1729_s29  ;;  %v1189_v40 = vld [vmem:[#allocation4] sm:$0xf] }
 0x2b0   : > { %1107 = vrot.lane.b32.xlu0 %v1105_v16, %s1714_s20  ;;  %s1762_s20 = smov 104   ;;  %v1213_v41 = vld [vmem:[#allocation4] sm:$0xf] }
 0x2b1   : > { %v1261_v42 = vld [vmem:[#allocation4] sm:$0xf] }
 0x2b2   : > { %v1147_v43 = vld [vmem:[#allocation4] sm:$0xf] }
 0x2b3   : > { %1155 = vrot.lane.b32.xlu1 %v1153_v17, %s1756_s25  ;;  %v1195_v44 = vld [vmem:[#allocation4] sm:$0xf] }
 0x2b4   : > { %1041 = vrot.lane.b32.xlu0 %v1039_v6, %s1756_s25  ;;  %v1219_v45 = vld [vmem:[#allocation4] sm:$0xf]  ;;  %s1772_s25 = smov 92  }
 0x2b5   : > { %v1267_v22 = vld [vmem:[#allocation4] sm:$0xf] }
 0x2b6   : > { %v1297_v46 = vld [vmem:[#allocation4] sm:$0xf] }
 0x2b7   : > { %1089 = vrot.lane.b32.xlu1 %v1087_v18, %s1705_s11  ;;  %v1225_v47 = vld [vmem:[#allocation4] sm:$0xf] }
 0x2b8   : > { %1113 = vrot.lane.b32.xlu0 %v1111_v19, %s1757_s16  ;;  %v1273_v48 = vld [vmem:[#allocation4] sm:$0xf] }
 0x2b9   : > { %v1303_v51 = vld [vmem:[#allocation4] sm:$0xf] }
 0x2ba   : > { %v1231_v52 = vld [vmem:[#allocation4] sm:$0xf] }
 0x2bb   : > { %1161 = vrot.lane.b32.xlu1 %v1159_v21, %s1758_s10  ;;  %v1279_v55 = vld [vmem:[#allocation4] sm:$0xf] }
 0x2bc   : > { %1047 = vrot.lane.b32.xlu0 %v1045_v23, %s1758_s10  ;;  %v1309_v56 = vld [vmem:[#allocation4] sm:$0xf] }
 0x2bd   : > { %v1237_v59 = vld [vmem:[#allocation4] sm:$0xf] }
 0x2be   : > { %v1285_v60 = vld [vmem:[#allocation4] sm:$0xf] }
 0x2bf   : > { %1095 = vrot.lane.b32.xlu1 %v1093_v24, %s1761_s12  ;;  %v1315_v63 = vld [vmem:[#allocation4] sm:$0xf] }
 0x2c0   : > { %1119 = vrot.lane.b32.xlu0 %v1117_v25, %s1759_s30  ;;  %v1243_v0 = vld [vmem:[#allocation4] sm:$0xf] }
 0x2c1   : > { %v1291_v3 = vld [vmem:[#allocation4] sm:$0xf] }
 0x2c2   : > { %v1321_v4 = vld [vmem:[#allocation4] sm:$0xf] }
 0x2c3   : > { %1167 = vrot.lane.b32.xlu1 %v1165_v26, %s1760_s26  ;;  %v1327_v8 = vld [vmem:[#allocation4] sm:$0xf] }
 0x2c4   : > { %1053 = vrot.lane.b32.xlu0 %v1051_v27, %s1760_s26  ;;  %v1333_v9 = vld [vmem:[#allocation4] sm:$0xf] }
 0x2c5   : > { %v1339_v13 = vld [vmem:[#allocation4] sm:$0xf] }
 0x2c7   : > { %1101 = vrot.lane.b32.xlu1 %v1099_v28, %s1762_s20 }
 0x2c8   : > { %1125 = vrot.lane.b32.xlu0 %v1123_v29, %s1763_s9 }
 0x2cb   : > { %1173 = vrot.lane.b32.xlu1 %v1171_v30, %s1729_s29  ;;  %s1767_s29 = smov 101  }
 0x2cc   : > { %1131 = vrot.lane.b32.xlu0 %v1129_v31, %s1713_s19  ;;  %s1764_s19 = smov 105  }
 0x2cf   : > { %1179 = vrot.lane.b32.xlu1 %v1177_v32, %s1705_s11 }
 0x2d0   : > { %1203 = vrot.lane.b32.xlu0 %v1201_v33, %s1705_s11  ;;  %s1765_s11 = smov 103  }
 0x2d3   : > { %1251 = vrot.lane.b32.xlu1 %v1249_v34, %s1718_s23 }
 0x2d4   : > { %1137 = vrot.lane.b32.xlu0 %v1135_v35, %s1718_s23  ;;  %s1766_s23 = smov 102  }
 0x2d7   : > { %1185 = vrot.lane.b32.xlu1 %v1183_v36, %s1761_s12 }
 0x2d8   : > { %1209 = vrot.lane.b32.xlu0 %v1207_v37, %s1761_s12 }
 0x2db   : > { %1257 = vrot.lane.b32.xlu1 %v1255_v38, %s1764_s19 }
 0x2dc   : > { %1143 = vrot.lane.b32.xlu0 %v1141_v39, %s1764_s19 }
 0x2df   : > { %1191 = vrot.lane.b32.xlu1 %v1189_v40, %s1762_s20 }
 0x2e0   : > { %1215 = vrot.lane.b32.xlu0 %v1213_v41, %s1762_s20 }
 0x2e3   : > { %1263 = vrot.lane.b32.xlu1 %v1261_v42, %s1765_s11 }
 0x2e4   : > { %1149 = vrot.lane.b32.xlu0 %v1147_v43, %s1765_s11  ;;  %s1527_s11 = sshll.u32 %s2208_s28, 3 }
 0x2e7   : > { %1197 = vrot.lane.b32.xlu1 %v1195_v44, %s1766_s23 }
 0x2e8   : > { %1221 = vrot.lane.b32.xlu0 %v1219_v45, %s1766_s23 }
 0x2eb   : > { %1269 = vrot.lane.b32.xlu1 %v1267_v22, %s1767_s29 }
 0x2ec   : > { %1299 = vrot.lane.b32.xlu0 %v1297_v46, %s1761_s12  ;;  %s1526_s12 = sshll.u32 %s2208_s28, 2 }
 0x2ed   : > { %s316_s19 = scalar_lea.vmem %s2196_s7, %s1526_s12 }
 0x2ef   : > { %1227 = vrot.lane.b32.xlu1 %v1225_v47, %s1730_s15 }
 0x2f0   : > { %1275 = vrot.lane.b32.xlu0 %v1273_v48, %s1717_s22  ;;  %s2204_s22 = smov 97  }
 0x2f1   : > { %v964_v49 = vpop.permute.xlu1 %963 }
 0x2f2   : > { %v922_v50 = vpop.permute.xlu0 %921  ;;  %966 = vst.msk [vmem:[#allocation3 + $0x4] sm:$0xf] %vm323_vm0, %v964_v49 }
 0x2f3   : > { %924 = vst.msk [vmem:[#allocation3] sm:$0xf] %vm330_vm1, %v922_v50  ;;  %1305 = vrot.lane.b32.xlu1 %v1303_v51, %s1762_s20 }
 0x2f4   : > { %1233 = vrot.lane.b32.xlu0 %v1231_v52, %s2203_s14 }
 0x2f5   : > { %v970_v53 = vpop.permute.xlu1 %969 }
 0x2f6   : > { %v928_v54 = vpop.permute.xlu0 %927  ;;  %972 = vst.msk [vmem:[#allocation3 + $0x4] sm:$0xf] %vm330_vm1, %v970_v53 }
 0x2f7   : > { %930 = vst.msk [vmem:[#allocation3] sm:$0xf] %vm337_vm2, %v928_v54  ;;  %1281 = vrot.lane.b32.xlu1 %v1279_v55, %s2204_s22 }
 0x2f8   : > { %1311 = vrot.lane.b32.xlu0 %v1309_v56, %s1766_s23 }
 0x2f9   : > { %v976_v57 = vpop.permute.xlu1 %975 }
 0x2fa   : > { %v934_v58 = vpop.permute.xlu0 %933  ;;  %978 = vst.msk [vmem:[#allocation3 + $0x4] sm:$0xf] %vm337_vm2, %v976_v57 }
 0x2fb   : > { %936 = vst.msk [vmem:[#allocation3] sm:$0xf] %vm344_vm3, %v934_v58  ;;  %1239 = vrot.lane.b32.xlu1 %v1237_v59, %s1768_s18 }
 0x2fc   : > { %1287 = vrot.lane.b32.xlu0 %v1285_v60, %s1769_s13 }
 0x2fd   : > { %v982_v61 = vpop.permute.xlu1 %981 }
 0x2fe   : > { %v940_v62 = vpop.permute.xlu0 %939  ;;  %984 = vst.msk [vmem:[#allocation3 + $0x4] sm:$0xf] %vm344_vm3, %v982_v61 }
 0x2ff   : > { %942 = vst.msk [vmem:[#allocation3] sm:$0xf] %vm351_vm4, %v940_v62  ;;  %1317 = vrot.lane.b32.xlu1 %v1315_v63, %s1730_s15 }
 0x300   : > { %1245 = vrot.lane.b32.xlu0 %v1243_v0, %s1770_s21 }
 0x301   : > { %v988_v1 = vpop.permute.xlu1 %987 }
 0x302   : > { %v1012_v2 = vpop.permute.xlu0 %1011  ;;  %990 = vst.msk [vmem:[#allocation3 + $0x4] sm:$0xf] %vm351_vm4, %v988_v1 }
 0x303   : > { %1014 = vst.msk [vmem:[#allocation3 + $0x8] sm:$0xf] %vm323_vm0, %v1012_v2  ;;  %1293 = vrot.lane.b32.xlu1 %v1291_v3, %s1771_s24 }
 0x304   : > { %1323 = vrot.lane.b32.xlu0 %v1321_v4, %s2203_s14  ;;  %s320_s14 = scalar_lea.vmem %s2197_s8, %s1527_s11 }
 0x305   : > { %v1060_v5 = vpop.permute.xlu1 %1059 }
 0x306   : > { %v946_v7 = vpop.permute.xlu0 %945  ;;  %1062 = vst.msk [vmem:[#allocation3 + $0xc] sm:$0xf] %vm323_vm0, %v1060_v5 }
 0x307   : > { %948 = vst.msk [vmem:[#allocation3] sm:$0xf] %vm358_vm5, %v946_v7  ;;  %1329 = vrot.lane.b32.xlu1 %v1327_v8, %s1768_s18 }
 0x308   : > { %1335 = vrot.lane.b32.xlu0 %v1333_v9, %s1770_s21 }
 0x309   : > { %v994_v11 = vpop.permute.xlu1 %993 }
 0x30a   : > { %v1018_v12 = vpop.permute.xlu0 %1017  ;;  %996 = vst.msk [vmem:[#allocation3 + $0x4] sm:$0xf] %vm358_vm5, %v994_v11 }
 0x30b   : > { %1020 = vst.msk [vmem:[#allocation3 + $0x8] sm:$0xf] %vm330_vm1, %v1018_v12  ;;  %1341 = vrot.lane.b32.xlu1 %v1339_v13, %s1772_s25 }
 0x30c   : > { %1431 = vperm.xlu0 %1685, %v1428_v10  }
 0x30d   : > { %v1066_v15 = vpop.permute.xlu1 %1065 }
 0x30e   : > { %v952_v16 = vpop.permute.xlu0 %951  ;;  %1068 = vst.msk [vmem:[#allocation3 + $0xc] sm:$0xf] %vm330_vm1, %v1066_v15  ;;  %v1345_v15 = vld [vmem:[%s2193_s4] sm:$0xf] }
 0x30f   : > { %954 = vst.msk [vmem:[#allocation3] sm:$0xf] %vm365_vm8, %v952_v16  ;;  %1438 = vperm.xlu1 %1686, %v1435_v14   ;;  %v1442_v16 = vld [vmem:[%s316_s19] sm:$0xf] }
 0x311   : > { %v1000_v17 = vpop.permute.xlu1 %999 }
 0x312   : > { %v1024_v6 = vpop.permute.xlu0 %1023  ;;  %1002 = vst.msk [vmem:[#allocation3 + $0x4] sm:$0xf] %vm365_vm8, %v1000_v17 }
 0x313   : > { %1026 = vst.msk [vmem:[#allocation3 + $0x8] sm:$0xf] %vm337_vm2, %v1024_v6 }
 0x315   : > { %v1072_v18 = vpop.permute.xlu1 %1071 }
 0x316   : > { %v958_v19 = vpop.permute.xlu0 %957  ;;  %1074 = vst.msk [vmem:[#allocation3 + $0xc] sm:$0xf] %vm337_vm2, %v1072_v18  ;;  %v1444_v18 = vrot.slane %v1442_v16, 6 }
 0x317   : > { %960 = vst.msk [vmem:[#allocation3] sm:$0xf] %vm375_vm9, %v958_v19 }
 0x319   : > { %v1006_v21 = vpop.permute.xlu1 %1005 }
 0x31a   : > { %v1030_v23 = vpop.permute.xlu0 %1029  ;;  %1008 = vst.msk [vmem:[#allocation3 + $0x4] sm:$0xf] %vm375_vm9, %v1006_v21 }
 0x31b   : > { %1032 = vst.msk [vmem:[#allocation3 + $0x8] sm:$0xf] %vm344_vm3, %v1030_v23 }
 0x31d   : > { %v1078_v24 = vpop.permute.xlu1 %1077 }
 0x31e   : > { %v1036_v25 = vpop.permute.xlu0 %1035  ;;  %1080 = vst.msk [vmem:[#allocation3 + $0xc] sm:$0xf] %vm344_vm3, %v1078_v24 }
 0x31f   : > { %1038 = vst.msk [vmem:[#allocation3 + $0x8] sm:$0xf] %vm351_vm4, %v1036_v25 }
 0x321   : > { %v1084_v26 = vpop.permute.xlu1 %1083  ;;  %v1692_v28 = vld [vmem:[#allocation3] sm:$0xff]  }
 0x322   : > { %v1108_v27 = vpop.permute.xlu0 %1107  ;;  %1086 = vst.msk [vmem:[#allocation3 + $0xc] sm:$0xf] %vm351_vm4, %v1084_v26  ;;  %1596 = vmatpush3.bf16.msra.mxu1 %v1692_v28 }
 0x323   : > { %1110 = vst.msk [vmem:[#allocation3 + $0x10] sm:$0xf] %vm323_vm0, %v1108_v27  ;;  %1597 = vmatprep.subr.bf16.mxu1 %v1715_v20 }
 0x325   : > { %v1156_v29 = vpop.permute.xlu1 %1155 }
 0x326   : > { %v1042_v30 = vpop.permute.xlu0 %1041  ;;  %1158 = vst.msk [vmem:[#allocation3 + $0x14] sm:$0xf] %vm323_vm0, %v1156_v29 }
 0x327   : > { %1044 = vst.msk [vmem:[#allocation3 + $0x8] sm:$0xf] %vm358_vm5, %v1042_v30 }
 0x329   : > { %v1090_v31 = vpop.permute.xlu1 %1089 }
 0x32a   : > { %v1114_v32 = vpop.permute.xlu0 %1113  ;;  %1092 = vst.msk [vmem:[#allocation3 + $0xc] sm:$0xf] %vm358_vm5, %v1090_v31 }
 0x32b   : > { %1116 = vst.msk [vmem:[#allocation3 + $0x10] sm:$0xf] %vm330_vm1, %v1114_v32 }
 0x32d   : > { %v1162_v33 = vpop.permute.xlu1 %1161 }
 0x32e   : > { %v1048_v34 = vpop.permute.xlu0 %1047  ;;  %1164 = vst.msk [vmem:[#allocation3 + $0x14] sm:$0xf] %vm330_vm1, %v1162_v33 }
 0x32f   : > { %1050 = vst.msk [vmem:[#allocation3 + $0x8] sm:$0xf] %vm365_vm8, %v1048_v34 }
 0x331   : > { %v1096_v35 = vpop.permute.xlu1 %1095 }
 0x332   : > { %v1120_v36 = vpop.permute.xlu0 %1119  ;;  %1098 = vst.msk [vmem:[#allocation3 + $0xc] sm:$0xf] %vm365_vm8, %v1096_v35 }
 0x333   : > { %1122 = vst.msk [vmem:[#allocation3 + $0x10] sm:$0xf] %vm337_vm2, %v1120_v36 }
 0x335   : > { %v1168_v37 = vpop.permute.xlu1 %1167 }
 0x336   : > { %v1054_v38 = vpop.permute.xlu0 %1053  ;;  %1170 = vst.msk [vmem:[#allocation3 + $0x14] sm:$0xf] %vm337_vm2, %v1168_v37 }
 0x337   : > { %1056 = vst.msk [vmem:[#allocation3 + $0x8] sm:$0xf] %vm375_vm9, %v1054_v38 }
 0x339   : > { %v1102_v39 = vpop.permute.xlu1 %1101 }
 0x33a   : > { %v1126_v40 = vpop.permute.xlu0 %1125  ;;  %1104 = vst.msk [vmem:[#allocation3 + $0xc] sm:$0xf] %vm375_vm9, %v1102_v39 }
 0x33b   : > { %1128 = vst.msk [vmem:[#allocation3 + $0x10] sm:$0xf] %vm344_vm3, %v1126_v40 }
 0x33d   : > { %v1174_v41 = vpop.permute.xlu1 %1173 }
 0x33e   : > { %v1132_v42 = vpop.permute.xlu0 %1131  ;;  %1176 = vst.msk [vmem:[#allocation3 + $0x14] sm:$0xf] %vm344_vm3, %v1174_v41 }
 0x33f   : > { %1134 = vst.msk [vmem:[#allocation3 + $0x10] sm:$0xf] %vm351_vm4, %v1132_v42 }
 0x341   : > { %v1180_v43 = vpop.permute.xlu1 %1179  ;;  %v1693_v45 = vld [vmem:[#allocation3 + $0x8] sm:$0xff]  }
 0x342   : > { %v1204_v44 = vpop.permute.xlu0 %1203  ;;  %1182 = vst.msk [vmem:[#allocation3 + $0x14] sm:$0xf] %vm351_vm4, %v1180_v43  ;;  %1598 = vmatpush3.bf16.msra.mxu1 %v1693_v45 }
 0x343   : > { %1206 = vst.msk [vmem:[#allocation3 + $0x18] sm:$0xf] %vm323_vm0, %v1204_v44  ;;  %1599 = vmatprep.subr.bf16.mxu1 %v1715_v20 }
 0x345   : > { %v1252_v22 = vpop.permute.xlu1 %1251 }
 0x346   : > { %v1138_v46 = vpop.permute.xlu0 %1137  ;;  %1254 = vst.msk [vmem:[#allocation3 + $0x1c] sm:$0xf] %vm323_vm0, %v1252_v22 }
 0x347   : > { %1140 = vst.msk [vmem:[#allocation3 + $0x10] sm:$0xf] %vm358_vm5, %v1138_v46 }
 0x349   : > { %v1186_v47 = vpop.permute.xlu1 %1185 }
 0x34a   : > { %v1210_v48 = vpop.permute.xlu0 %1209  ;;  %1188 = vst.msk [vmem:[#allocation3 + $0x14] sm:$0xf] %vm358_vm5, %v1186_v47 }
 0x34b   : > { %1212 = vst.msk [vmem:[#allocation3 + $0x18] sm:$0xf] %vm330_vm1, %v1210_v48 }
 0x34d   : > { %v1258_v49 = vpop.permute.xlu1 %1257 }
 0x34e   : > { %v1144_v50 = vpop.permute.xlu0 %1143  ;;  %1260 = vst.msk [vmem:[#allocation3 + $0x1c] sm:$0xf] %vm330_vm1, %v1258_v49 }
 0x34f   : > { %1146 = vst.msk [vmem:[#allocation3 + $0x10] sm:$0xf] %vm365_vm8, %v1144_v50 }
 0x351   : > { %v1192_v51 = vpop.permute.xlu1 %1191 }
 0x352   : > { %v1216_v52 = vpop.permute.xlu0 %1215  ;;  %1194 = vst.msk [vmem:[#allocation3 + $0x14] sm:$0xf] %vm365_vm8, %v1192_v51 }
 0x353   : > { %1218 = vst.msk [vmem:[#allocation3 + $0x18] sm:$0xf] %vm337_vm2, %v1216_v52 }
 0x355   : > { %v1264_v53 = vpop.permute.xlu1 %1263 }
 0x356   : > { %v1150_v54 = vpop.permute.xlu0 %1149  ;;  %1266 = vst.msk [vmem:[#allocation3 + $0x1c] sm:$0xf] %vm337_vm2, %v1264_v53 }
 0x357   : > { %1152 = vst.msk [vmem:[#allocation3 + $0x10] sm:$0xf] %vm375_vm9, %v1150_v54 }
 0x359   : > { %v1198_v55 = vpop.permute.xlu1 %1197 }
 0x35a   : > { %v1222_v56 = vpop.permute.xlu0 %1221  ;;  %1200 = vst.msk [vmem:[#allocation3 + $0x14] sm:$0xf] %vm375_vm9, %v1198_v55 }
 0x35b   : > { %1224 = vst.msk [vmem:[#allocation3 + $0x18] sm:$0xf] %vm344_vm3, %v1222_v56 }
 0x35d   : > { %v1270_v57 = vpop.permute.xlu1 %1269 }
 0x35e   : > { %v1300_v58 = vpop.permute.xlu0 %1299  ;;  %1272 = vst.msk [vmem:[#allocation3 + $0x1c] sm:$0xf] %vm344_vm3, %v1270_v57 }
 0x35f   : > { %1302 = vst.msk [vmem:[#allocation3 + $0x20] sm:$0xf] %vm323_vm0, %v1300_v58  ;;  %vm2205_vm0 = vcmask 1043456  }
 0x361   : > { %v1228_v59 = vpop.permute.xlu1 %1227  ;;  %v1694_v61 = vld [vmem:[#allocation3 + $0x10] sm:$0xff]  }
 0x362   : > { %v1276_v60 = vpop.permute.xlu0 %1275  ;;  %1230 = vst.msk [vmem:[#allocation3 + $0x18] sm:$0xf] %vm351_vm4, %v1228_v59  ;;  %1600 = vmatpush3.bf16.msra.mxu1 %v1694_v61 }
 0x363   : > { %1278 = vst.msk [vmem:[#allocation3 + $0x1c] sm:$0xf] %vm351_vm4, %v1276_v60  ;;  %1601 = vmatprep.subr.bf16.mxu1 %v1715_v20 }
 0x365   : > { %v1306_v62 = vpop.permute.xlu1 %1305 }
 0x366   : > { %v1234_v63 = vpop.permute.xlu0 %1233  ;;  %1308 = vst.msk [vmem:[#allocation3 + $0x20] sm:$0xf] %vm330_vm1, %v1306_v62  ;;  %vm2206_vm1 = vcmask 588800  }
 0x367   : > { %1236 = vst.msk [vmem:[#allocation3 + $0x18] sm:$0xf] %vm358_vm5, %v1234_v63 }
 0x369   : > { %v1282_v0 = vpop.permute.xlu1 %1281 }
 0x36a   : > { %v1312_v1 = vpop.permute.xlu0 %1311  ;;  %1284 = vst.msk [vmem:[#allocation3 + $0x1c] sm:$0xf] %vm358_vm5, %v1282_v0 }
 0x36b   : > { %1314 = vst.msk [vmem:[#allocation3 + $0x20] sm:$0xf] %vm337_vm2, %v1312_v1  ;;  %vm1447_vm2 = vcmask 1041408  }
 0x36d   : > { %v1240_v2 = vpop.permute.xlu1 %1239 }
 0x36e   : > { %v1288_v3 = vpop.permute.xlu0 %1287  ;;  %1242 = vst.msk [vmem:[#allocation3 + $0x18] sm:$0xf] %vm365_vm8, %v1240_v2 }
 0x36f   : > { %1290 = vst.msk [vmem:[#allocation3 + $0x1c] sm:$0xf] %vm365_vm8, %v1288_v3 }
 0x371   : > { %v1318_v4 = vpop.permute.xlu1 %1317 }
 0x372   : > { %v1246_v5 = vpop.permute.xlu0 %1245  ;;  %1320 = vst.msk [vmem:[#allocation3 + $0x20] sm:$0xf] %vm344_vm3, %v1318_v4  ;;  %vm1449_vm3 = vcmask 1045504  }
 0x373   : > { %1248 = vst.msk [vmem:[#allocation3 + $0x18] sm:$0xf] %vm375_vm9, %v1246_v5 }
 0x375   : > { %v1294_v7 = vpop.permute.xlu1 %1293 }
 0x376   : > { %v1324_v8 = vpop.permute.xlu0 %1323  ;;  %1296 = vst.msk [vmem:[#allocation3 + $0x1c] sm:$0xf] %vm375_vm9, %v1294_v7 }
 0x377   : > { %1326 = vst.msk [vmem:[#allocation3 + $0x20] sm:$0xf] %vm351_vm4, %v1324_v8  ;;  %vm1452_vm4 = vcmask 523264  }
 0x379   : > { %v1330_v9 = vpop.permute.xlu1 %1329 }
 0x37a   : > { %v1336_v10 = vpop.permute.xlu0 %1335  ;;  %1332 = vst.msk [vmem:[#allocation3 + $0x20] sm:$0xf] %vm358_vm5, %v1330_v9 }
 0x37b   : > { %1338 = vst.msk [vmem:[#allocation3 + $0x20] sm:$0xf] %vm365_vm8, %v1336_v10 }
 0x37d   : > { %v1342_v11 = vpop.permute.xlu1 %1341  ;;  %v1695_v12 = vld [vmem:[#allocation3 + $0x18] sm:$0xff]  }
 0x37e   : > { %1344 = vst.msk [vmem:[#allocation3 + $0x20] sm:$0xf] %vm375_vm9, %v1342_v11  ;;  %1602 = vmatpush3.bf16.msra.mxu1 %v1695_v12 }
 0x37f   : > { %1603 = vmatprep.subr.bf16.mxu1 %v1715_v20 }
 0x385   : > { %v1696_v13 = vld [vmem:[#allocation3 + $0x20] ss:$0 sps:$4 sm:$0xff]  }
 0x386   : > { %v1386_v14 = vsel %vm2205_vm0, %v1696_v13, 0 }
 0x387   : > { %1604 = vmatpush3.bf16.msra.mxu1 %v1386_v14 }
 0x38a   : > { %1606 = vmatmul.mubr.msk.bf16.vlgmr.msra.gmra.mrb[0].mxu1 %vm2206_vm1, %v1345_v15 }
 0x38b   : > { %v1432_v17 = vpop.permute.xlu0 %1431 }
 0x38e   : > { %v1439_v21 = vpop.permute.xlu1 %1438 }
 0x45d   : > { %v1422_v6 = vpop.f32.mrb[0].mxu1 }
 0x45e   : > { %v1434_v20 = vmul.f32 %v1432_v17, %v1422_v6  ;;  %v1607_v19 = vpop.f32.mrb[1].mxu1 }
 0x45f   : > { %v1425_v23 = vpop.f32.mrb[2].mxu1 }
 0x460   : > { %v1441_v24 = vadd.f32 %v1439_v21, %v1434_v20  ;;  %v1608_v25 = vpop.f32.mrb[3].mxu1 }
 0x462   : > { %v1446_v26 = vadd.f32 %v1444_v18, %v1441_v24 }
 0x464   : > { %v1448_v27 = vsel %vm1447_vm2, %v1441_v24, %v1446_v26 }
 0x465   : > { %v1450_v28 = vsel %vm1449_vm3, %v1448_v27, %v1441_v24 }
 0x466   : > { %v1451_v29 = vmax.f32 %v1450_v28, 0.0 }
 0x468   : > { %1453 = vst.msk [vmem:[%s320_s14] sm:$0xff] %vm1452_vm4, %v1451_v29 }
 0x469 PF: > { %s18_s27 = sadd.s32 1, %s1703_s27  }
 0x46a   : > { %p15_p4 = scmp.ge.s32.totalorder %s18_s27, 4  }
 0x46c   :  { %17 = sbr.rel (!%p15_p4) target bundleno = 1 (0x1), region = 86 }

</bundles_post_ra>
